<compile_context>
chip_gen: v7x
topology: tpu7x:2x2x1
jax: 0.10.0
libtpu: 0.0.40
codegen_flags: <defaults>
</compile_context>

<pallas_src>
import jax
import jax.numpy as jnp
from jax.experimental import pallas as pl
from jax.experimental.pallas import tpu as pltpu

K = 7                      # conv kernel size
PAD = (K - 1) // 2
_CH_CHUNK = 8              # channel chunk for the large-C fori_loop paths


def sam_kernel(x_ref, m_ref, shift_ref, o_ref, pooled_ref):
    # x_ref:      (Bt, C, HW)        VMEM, lane-dense input tile
    # m_ref:      (2*HW, HW)         VMEM, conv+BN-scale as a matmul matrix
    # shift_ref:  (1,)               SMEM, folded BN shift (beta - mean*scale)
    # o_ref:      (Bt, C, HW)        VMEM, lane-dense output tile
    # pooled_ref: (pool_rows, 2*HW)  VMEM scratch, row b = [max_b | sum_b]
    Bt, C, HW = x_ref.shape
    pool_rows = pooled_ref.shape[0]

    # Zero the MXU-alignment padding rows (tiny: <= 7 x 2*HW f32).  Done every
    # grid step because the batch axis is "parallel": on megacore parts each
    # TensorCore has its own scratch instance and only sees a subset of
    # program ids, so an init-once guard would leave one core uninitialised.
    if pool_rows > Bt:
        pooled_ref[Bt:pool_rows, :] = jnp.zeros(
            (pool_rows - Bt, 2 * HW), jnp.float32)

    # ---- Stage 1: channel pooling (lane-dense), per batch element. ----
    for b in range(Bt):
        if C <= _CH_CHUNK:
            # Small C: fully unrolled per-channel loop; p_max stays in the
            # input dtype (matches torch.max), p_sum accumulates in f32 (the
            # 1/C of the mean is folded into the conv matrix).
            p_max = x_ref[b, 0:1, :]                       # (1, HW)
            p_sum = p_max.astype(jnp.float32)
            for c in range(1, C):
                xc = x_ref[b, c:c + 1, :]
                p_max = jnp.maximum(p_max, xc)
                p_sum = p_sum + xc.astype(jnp.float32)
        else:
            # Large C: chunked fori_loop keeps code size / live ranges bounded;
            # per-chunk tree reductions + unroll=2 give the VALU some ILP.
            n_chunks = C // _CH_CHUNK

            def pool_body(i, carry, b=b):
                pm, ps = carry
                c0 = pl.multiple_of(i * _CH_CHUNK, _CH_CHUNK)
                blk = x_ref[b, pl.ds(c0, _CH_CHUNK), :]    # (CH, HW)
                pm = jnp.maximum(pm, jnp.max(blk, axis=0, keepdims=True))
                ps = ps + jnp.sum(blk.astype(jnp.float32), axis=0,
                                  keepdims=True)
                return pm, ps

            p_max, p_sum = jax.lax.fori_loop(
                0, n_chunks, pool_body,
                (jnp.full((1, HW), -jnp.inf, dtype=x_ref.dtype),
                 jnp.zeros((1, HW), dtype=jnp.float32)),
                unroll=2)
            for c in range(n_chunks * _CH_CHUNK, C):       # static tail (< CH)
                xc = x_ref[b, c:c + 1, :]
                p_max = jnp.maximum(p_max, xc)
                p_sum = p_sum + xc.astype(jnp.float32)

        # Lane-aligned stores (offsets 0 and HW, both multiples of 128).
        pooled_ref[b:b + 1, 0:HW] = p_max.astype(jnp.float32)
        pooled_ref[b:b + 1, HW:2 * HW] = p_sum

    # ---- Stage 2: 7x7 conv + BN scale as ONE MXU matmul, then sigmoid. ----
    # (pool_rows, 2*HW) @ (2*HW, HW) -> (pool_rows, HW); the boundary handling,
    # BN scale and 1/C are all baked into m_ref by the wrapper.
    conv = jnp.dot(pooled_ref[...], m_ref[...],
                   precision=jax.lax.Precision.HIGHEST,
                   preferred_element_type=jnp.float32)
    gate = jax.nn.sigmoid(conv + shift_ref[0])             # (pool_rows, HW) f32

    if o_ref.dtype == jnp.bfloat16:
        # v6e/v7x have bf16 VALU: gate/store in bf16 (half the store bytes).
        gate = gate.astype(jnp.bfloat16)

    # ---- Stage 3: apply the spatial gate; lane-dense, unmasked stores. ----
    for b in range(Bt):
        g = gate[b:b + 1, :]                               # (1, HW)
        if C <= _CH_CHUNK:
            o_ref[b] = (x_ref[b] * g).astype(o_ref.dtype)  # full-tile store
        else:
            n_chunks = C // _CH_CHUNK

            def gate_body(i, carry, b=b, g=g):
                c0 = pl.multiple_of(i * _CH_CHUNK, _CH_CHUNK)
                xblk = x_ref[b, pl.ds(c0, _CH_CHUNK), :]
                o_ref[b, pl.ds(c0, _CH_CHUNK), :] = (
                    xblk * g).astype(o_ref.dtype)
                return carry

            jax.lax.fori_loop(0, n_chunks, gate_body, 0, unroll=2)
            for c in range(n_chunks * _CH_CHUNK, C):       # static tail (< CH)
                o_ref[b, c:c + 1, :] = (
                    x_ref[b, c:c + 1, :] * g).astype(o_ref.dtype)


def _build_conv_matrix(w_folded, H, W):
    """(2*H*W, H*W) matrix of the 7x7 'same' conv with folded BN scale / 1/C.

    Built by pushing the identity basis through the reference conv, so the
    zero-padding boundary handling is baked into the matrix exactly.
    """
    HW = H * W
    eye = jnp.eye(2 * HW, dtype=jnp.float32).reshape(2 * HW, 2, H, W)
    cols = jax.lax.conv_general_dilated(
        eye, w_folded.reshape(1, 2, K, K), window_strides=(1, 1),
        padding=[(PAD, PAD), (PAD, PAD)],
        dimension_numbers=("NCHW", "OIHW", "NCHW"))        # (2*HW, 1, H, W)
    return cols.reshape(2 * HW, HW)


def _pick_batch_tile(B, bytes_per_elem, target_bytes=2 * 1024 * 1024, max_bt=16):
    """Batch elements per grid step: aim for ~2 MiB blocks, keep grid >= 2."""
    bt = max(1, min(B, max_bt, target_bytes // max(bytes_per_elem, 1)))
    # v7x megacore: keep >= 2 "parallel" grid steps when B >= 2 so both
    # TensorCores get work.
    while bt > 1 and B // bt < 2:
        bt -= 1
    while B % bt:                                          # bt must divide B
        bt -= 1
    return bt


def sam_forward(x, conv_w, bn_gamma, bn_beta, bn_mean, bn_var, eps=1e-5):
    """x: (B, C, H, W), conv_w: (1, 2, 7, 7), bn_* scalars (running stats)."""
    B, C, H, W = x.shape
    HW = H * W

    bn_scale = bn_gamma / jnp.sqrt(bn_var + eps)
    bn_shift = bn_beta - bn_mean * bn_scale

    # Fold BN scale into the conv weights (conv is linear, 1 output channel)
    # and fold 1/C into the mean-branch weights so the kernel only needs a
    # channel SUM and a single post-matmul scalar add.
    w = conv_w.reshape(2, K, K).astype(jnp.float32)
    w_folded = jnp.stack([w[0] * bn_scale, w[1] * (bn_scale / C)])  # (2, 7, 7)

    conv_mat = _build_conv_matrix(w_folded, H, W)           # (2*HW, HW) f32
    shift_arr = jnp.reshape(bn_shift, (1,)).astype(jnp.float32)

    # Lane-dense view: H*W on the 128-wide lane axis (free reshape in XLA).
    x_flat = x.reshape(B, C, HW)

    bt = _pick_batch_tile(B, C * HW * x.dtype.itemsize)
    grid = (B // bt,)
    pool_rows = ((bt + 7) // 8) * 8                         # 8-sublane MXU tile

    # VMEM limit from the reported capacity: ~96 MiB on 128-MiB parts
    # (v5e/v6e), ~48 MiB on v7x (64 MiB per TC).
    try:
        vmem_cap = pltpu.get_tpu_info().vmem_capacity_bytes
    except Exception:
        vmem_cap = 64 * 1024 * 1024
    vmem_limit = int(min(96 * 1024 * 1024, (3 * vmem_cap) // 4))

    out_flat = pl.pallas_call(
        sam_kernel,
        out_shape=jax.ShapeDtypeStruct((B, C, HW), x.dtype),
        grid=grid,
        in_specs=[
            pl.BlockSpec((bt, C, HW), lambda i: (i, 0, 0)),        # x, lane-dense
            pl.BlockSpec((2 * HW, HW), lambda i: (0, 0)),          # conv matrix
            pl.BlockSpec(memory_space=pltpu.MemorySpace.SMEM),     # BN shift
        ],
        out_specs=pl.BlockSpec((bt, C, HW), lambda i: (i, 0, 0)),
        scratch_shapes=[pltpu.VMEM((pool_rows, 2 * HW), jnp.float32)],
        compiler_params=pltpu.CompilerParams(
            dimension_semantics=("parallel",),
            vmem_limit_bytes=vmem_limit,
        ),
    )(x_flat, conv_mat, shift_arr)

    return out_flat.reshape(B, C, H, W)


def sam_reference(x, conv_w, bn_gamma, bn_beta, bn_mean, bn_var, eps=1e-5):
    """Pure-JAX reference for correctness check."""
    pooled = jnp.concatenate(
        [jnp.max(x, axis=1, keepdims=True), jnp.mean(x, axis=1, keepdims=True)],
        axis=1)
    conv = jax.lax.conv_general_dilated(
        pooled, conv_w, window_strides=(1, 1), padding=[(PAD, PAD), (PAD, PAD)],
        dimension_numbers=("NCHW", "OIHW", "NCHW"))
    bn = (conv - bn_mean) / jnp.sqrt(bn_var + eps) * bn_gamma + bn_beta
    return x * jax.nn.sigmoid(bn)


if __name__ == "__main__":
    B, C, H, W = 2, 4, 16, 16

    key = jax.random.PRNGKey(0)
    kx, kw, kg, kb, km, kv = jax.random.split(key, 6)

    x = jax.random.normal(kx, (B, C, H, W), dtype=jnp.float32)
    conv_w = 0.1 * jax.random.normal(kw, (1, 2, K, K), dtype=jnp.float32)
    bn_gamma = 1.0 + 0.1 * jax.random.normal(kg, (), dtype=jnp.float32)
    bn_beta = 0.1 * jax.random.normal(kb, (), dtype=jnp.float32)
    bn_mean = 0.1 * jax.random.normal(km, (), dtype=jnp.float32)
    bn_var = 1.0 + 0.1 * jax.random.uniform(kv, (), dtype=jnp.float32)

    out = sam_forward(x, conv_w, bn_gamma, bn_beta, bn_mean, bn_var)
    out = jax.block_until_ready(out)

    ref = sam_reference(x, conv_w, bn_gamma, bn_beta, bn_mean, bn_var)
    if not bool(jnp.allclose(out, ref, atol=1e-4, rtol=1e-4)):
        raise AssertionError("Pallas SAM output mismatch vs JAX reference")

    print("KERNEL_OK")
</pallas_src>

<mosaic_0001>
module attributes {stable_mosaic.version = 11 : i64} {
  func.func @sam_kernel(%arg0: i32, %arg1: memref<1x4x256xf32, #tpu.memory_space<vmem>>, %arg2: memref<512x256xf32, #tpu.memory_space<vmem>>, %arg3: memref<1xf32, #tpu.memory_space<smem>>, %arg4: memref<1x4x256xf32, #tpu.memory_space<vmem>>, %arg5: memref<8x512xf32, #tpu.memory_space<vmem>>) attributes {dimension_semantics = [#tpu.dimension_semantics<parallel>], iteration_bounds = array<i64: 2>, scalar_prefetch = 0 : i64, scratch_operands = 1 : i64, tpu.core_type = #tpu.core_type<tc>, window_params = [{transform_indices = @transform_0, window_bounds = array<i64: 1, 4, 256>}, {pipeline_mode = #tpu.pipeline_mode<synchronous>, transform_indices = @transform_1, window_bounds = array<i64: 512, 256>}, {transform_indices = @transform_2, window_bounds = array<i64: 1>}, {transform_indices = @transform_3, window_bounds = array<i64: 1, 4, 256>}]} {
    %cst = arith.constant 0.000000e+00 : f32
    %0 = vector.broadcast %cst : f32 to vector<7x512xf32>
    %c1 = arith.constant 1 : index
    %c0 = arith.constant 0 : index
    %1 = vector.load %arg5[%c1, %c0] : memref<8x512xf32, #tpu.memory_space<vmem>>, vector<7x512xf32>
    tpu.vector_store %arg5[%c1, %c0], %0 {strides = array<i32>} : memref<8x512xf32, #tpu.memory_space<vmem>>, vector<7x512xf32>,
    %c0_0 = arith.constant 0 : index
    %c0_1 = arith.constant 0 : index
    %c0_2 = arith.constant 0 : index
    %2 = vector.load %arg1[%c0_0, %c0_1, %c0_2] : memref<1x4x256xf32, #tpu.memory_space<vmem>>, vector<1x1x256xf32>
    %3 = vector.shape_cast %2 : vector<1x1x256xf32> to vector<1x256xf32>
    %c0_3 = arith.constant 0 : index
    %c1_4 = arith.constant 1 : index
    %c0_5 = arith.constant 0 : index
    %4 = vector.load %arg1[%c0_3, %c1_4, %c0_5] : memref<1x4x256xf32, #tpu.memory_space<vmem>>, vector<1x1x256xf32>
    %5 = vector.shape_cast %4 : vector<1x1x256xf32> to vector<1x256xf32>
    %6 = arith.maximumf %3, %5 : vector<1x256xf32>
    %7 = arith.addf %3, %5 : vector<1x256xf32>
    %c0_6 = arith.constant 0 : index
    %c2 = arith.constant 2 : index
    %c0_7 = arith.constant 0 : index
    %8 = vector.load %arg1[%c0_6, %c2, %c0_7] : memref<1x4x256xf32, #tpu.memory_space<vmem>>, vector<1x1x256xf32>
    %9 = vector.shape_cast %8 : vector<1x1x256xf32> to vector<1x256xf32>
    %10 = arith.maximumf %6, %9 : vector<1x256xf32>
    %11 = arith.addf %7, %9 : vector<1x256xf32>
    %c0_8 = arith.constant 0 : index
    %c3 = arith.constant 3 : index
    %c0_9 = arith.constant 0 : index
    %12 = vector.load %arg1[%c0_8, %c3, %c0_9] : memref<1x4x256xf32, #tpu.memory_space<vmem>>, vector<1x1x256xf32>
    %13 = vector.shape_cast %12 : vector<1x1x256xf32> to vector<1x256xf32>
    %14 = arith.maximumf %10, %13 : vector<1x256xf32>
    %15 = arith.addf %11, %13 : vector<1x256xf32>
    %c0_10 = arith.constant 0 : index
    %c0_11 = arith.constant 0 : index
    %16 = vector.load %arg5[%c0_10, %c0_11] : memref<8x512xf32, #tpu.memory_space<vmem>>, vector<1x256xf32>
    tpu.vector_store %arg5[%c0_10, %c0_11], %14 {strides = array<i32>} : memref<8x512xf32, #tpu.memory_space<vmem>>, vector<1x256xf32>,
    %c0_12 = arith.constant 0 : index
    %c256 = arith.constant 256 : index
    %17 = vector.load %arg5[%c0_12, %c256] : memref<8x512xf32, #tpu.memory_space<vmem>>, vector<1x256xf32>
    tpu.vector_store %arg5[%c0_12, %c256], %15 {strides = array<i32>} : memref<8x512xf32, #tpu.memory_space<vmem>>, vector<1x256xf32>,
    %c0_13 = arith.constant 0 : index
    %c0_14 = arith.constant 0 : index
    %18 = vector.load %arg5[%c0_13, %c0_14] : memref<8x512xf32, #tpu.memory_space<vmem>>, vector<8x512xf32>
    %c0_15 = arith.constant 0 : index
    %c0_16 = arith.constant 0 : index
    %19 = vector.load %arg2[%c0_15, %c0_16] : memref<512x256xf32, #tpu.memory_space<vmem>>, vector<512x256xf32>
    %cst_17 = arith.constant dense<0.000000e+00> : vector<8x256xf32>
    %20 = tpu.matmul %18, %19, %cst_17 {dimension_numbers = #tpu.dot_dimension_numbers<[1], [0], [0], [1], [0, 0, 1, 1], [], []>, precision = #tpu.contract_precision<fp32>} : vector<8x512xf32>, vector<512x256xf32>, vector<8x256xf32> -> vector<8x256xf32>
    %c0_18 = arith.constant 0 : index
    %21 = memref.load %arg3[%c0_18] : memref<1xf32, #tpu.memory_space<smem>>
    %22 = vector.broadcast %21 : f32 to vector<8x256xf32>
    %23 = arith.addf %20, %22 : vector<8x256xf32>
    %24 = arith.negf %23 : vector<8x256xf32>
    %25 = math.exp %24 : vector<8x256xf32>
    %cst_19 = arith.constant 1.000000e+00 : f32
    %26 = vector.broadcast %cst_19 : f32 to vector<8x256xf32>
    %27 = arith.addf %26, %25 : vector<8x256xf32>
    %28 = arith.divf %26, %27 : vector<8x256xf32>
    %29 = vector.extract_strided_slice %28 {offsets = [0, 0], sizes = [1, 256], strides = [1, 1]} : vector<8x256xf32> to vector<1x256xf32>
    %c0_20 = arith.constant 0 : index
    %c0_21 = arith.constant 0 : index
    %c0_22 = arith.constant 0 : index
    %30 = vector.load %arg1[%c0_20, %c0_21, %c0_22] : memref<1x4x256xf32, #tpu.memory_space<vmem>>, vector<1x4x256xf32>
    %31 = vector.shape_cast %30 : vector<1x4x256xf32> to vector<4x256xf32>
    %32 = vector.broadcast %29 : vector<1x256xf32> to vector<4x256xf32>
    %33 = arith.mulf %31, %32 : vector<4x256xf32>
    %c0_23 = arith.constant 0 : index
    %c0_24 = arith.constant 0 : index
    %c0_25 = arith.constant 0 : index
    %34 = vector.load %arg4[%c0_23, %c0_24, %c0_25] : memref<1x4x256xf32, #tpu.memory_space<vmem>>, vector<1x4x256xf32>
    %35 = vector.shape_cast %34 : vector<1x4x256xf32> to vector<4x256xf32>
    %36 = vector.shape_cast %33 : vector<4x256xf32> to vector<1x4x256xf32>
    tpu.vector_store %arg4[%c0_23, %c0_24, %c0_25], %36 {strides = array<i32>} : memref<1x4x256xf32, #tpu.memory_space<vmem>>, vector<1x4x256xf32>,
    return
  }
  func.func @transform_0(%arg0: i32) -> (i32, i32, i32) {
    %c0_i32 = arith.constant 0 : i32
    %c0_i32_0 = arith.constant 0 : i32
    %c0_i32_1 = arith.constant 0 : i32
    return %arg0, %c0_i32, %c0_i32_0 : i32, i32, i32
  }
  func.func @transform_1(%arg0: i32) -> (i32, i32) {
    %c0_i32 = arith.constant 0 : i32
    %c0_i32_0 = arith.constant 0 : i32
    %c0_i32_1 = arith.constant 0 : i32
    return %c0_i32, %c0_i32_0 : i32, i32
  }
  func.func @transform_2(%arg0: i32) -> i32 {
    %c0_i32 = arith.constant 0 : i32
    %c0_i32_0 = arith.constant 0 : i32
    return %c0_i32 : i32
  }
  func.func @transform_3(%arg0: i32) -> (i32, i32, i32) {
    %c0_i32 = arith.constant 0 : i32
    %c0_i32_0 = arith.constant 0 : i32
    %c0_i32_1 = arith.constant 0 : i32
    return %arg0, %c0_i32, %c0_i32_0 : i32, i32, i32
  }
}

</mosaic_0001>

<bundles_post_ra>
// kernel: tpu_custom_call.1
= control target key start
LH: loop header
LB: loop body
LE: loop exit
PB: predicated region body
PF: predicated region fallthrough
CT: control target
= control target key end

     0   :  { %s5940_s0 = inlined_call_operand.hbm [shape: f32[2,4,256], index: 0, kind: input, shape index: {}]   ;;  %s5941_s1 = inlined_call_operand.hbm [shape: f32[512,256], index: 1, kind: input, shape index: {}]   ;;  %s5942_s2 = inlined_call_operand.<no memory space> [shape: f32[1], index: 2, kind: input, shape index: {}]   ;;  %s5943_s3 = inlined_call_operand.hbm [shape: f32[2,4,256], index: 3, kind: output, shape index: {}]  }
   0x1   :  { %8 = sst [smem:[#allocation3]] %s5942_s2 }
   0x2   :  { %9 = vsyncpa [#allocation5], 0 }
   0x3   :  { %11 = vsyncpa [#allocation5 + $0x1], 0 }
   0x4   :  { %12 = vsyncpa [#allocation8], 0 }
   0x5   :  { %13 = vsyncpa [#allocation6], 0 }
   0x6   :  { %15 = vsyncpa [#allocation6 + $0x1], 0  ;;  %s4095_s14 = smov 0   ;;  %s4097_s15 = smov 0  }
   0x7   :  { %s4099_s16 = smov 0   ;;  %s4101_s17 = smov 0  }
   0x8 LB: > { %s4116_s2 = sadd.s32 4294967295, %s4064_s17   ;;  %s3053_s18 = sadd.s32 4294967294, %s4064_s17   ;;  %s4064_s17 = sphi %s4101_s17, %s7260_s17   ;;  %s4060_s16 = sphi %s4099_s16, %s7259_s16   ;;  %s4056_s15 = sphi %s4097_s15, %s7258_s15   ;;  %s4052_s14 = sphi %s4095_s14, %s7257_s14  }
   0x9   : > { %p41_p0 = scmp.ne.s32.totalorder %s4056_s15, %s4052_s14  ;;  %p5944_p1 = scmp.eq.s32.totalorder %s4116_s2, 0 }
   0xa   : > { %p113_p3 = scmp.eq.s32.totalorder %s3053_s18, 1  ;;  %p3054_p5 = scmp.ge.s32.totalorder %s4064_s17, 1 }
   0xb   : > { %p4125_p4 = por %p5944_p1, %p41_p0  ;;  %p120_p7 = scmp.lt.s32.totalorder %s4064_s17, 3 }
   0xc   : > { %p4130_p6 = por %p113_p3, %p41_p0  ;;  %s4066_s22 = smov [#allocation7]  }
   0xd   : > { %s6462_s19 = scalar_select %p4125_p4, 1, 0 }
   0xe   : > { %s6463_s20 = scalar_select %p4130_p6, 1, 0 }
   0xf   : > { %p4135_p8 = pnand %p3054_p5, %p120_p7  ;;  %s132_s23 = sshll.u32 %s4066_s22, 4  ;;  %s4139_s23 = int_to_ptr.vmem [resolvable:$true] %s132_s23 }
  0x10   : > { %s4151_s25 = sadd.s32 1, %s4064_s17   ;;  %s28_s26 = sadd.s32 1, %s4060_s16 }
  0x11   : > { %s6464_s21 = scalar_select %p4135_p8, 1, 0 }
  0x12   : > { %p3876_p9 = pneg %p4135_p8  ;;  %s25_s27 = ssub.s32 %s4064_s17, %s4151_s25 }
  0x13   : > { %s3936_s30 = scalar_lea.hbm %s5941_s1, 16384 }
  0x14   : > { %p4146_p11 = pnand %p3876_p9, %p5944_p1  ;;  %p3937_p12 = scmp.ne.s32.totalorder %s5941_s1, %s3936_s30 }
  0x15   : > { %p3943_p5 = scmp.lt.u32.totalorder %s3936_s30, %s5941_s1 }
  0x16   : > { %p3938_p13 = pneg %p4146_p11 }
  0x18   : > { %p3939_p0 = pnand %p3938_p13, %p3937_p12 }
  0x1a   : > { %p3940_p3 = pneg %p3939_p0 }
  0x1c   : > { %p3945_p7 = pnand %p3943_p5, %p3940_p3 }
  0x1e   : > { %3948 = shalt.err (!%p3945_p7)
}
  0x1f   : > { %s3949_s8 = scalar_lea.vmem %s4139_s23, 16384  ;;  %p3957_p2 = scmp.lt.s32.totalorder %s4139_s23, %s4139_s23 }
  0x20   : > { %p3950_p9 = scmp.ne.s32.totalorder %s4139_s23, %s3949_s8  ;;  %p3958_p6 = scmp.lt.s32.totalorder %s3949_s8, %s3949_s8 }
  0x22   : > { %p3952_p10 = pnand %p3950_p9, %p3938_p13  ;;  %p3959_p4 = por %p3958_p6, %p3957_p2 }
  0x24   : > { %p3953_p1 = pneg %p3952_p10 }
  0x26   : > { %p3960_p8 = pnand %p3959_p4, %p3953_p1 }
  0x28   : > { %3963 = shalt.err (!%p3960_p8)
}
  0x29   : > { %s4067_s9 = smov 256   ;;  %s4068_s10 = smov 16  }
  0x2a   : > { %3879 = dma.hbm_to_vmem [thread:$0]  (!%p4146_p11), %s5941_s1, 16384, %s4139_s23, [#allocation8], %s4067_s9, %s4067_s9, %s4068_s10  }
  0x2b   : > { %p26_p2 = scmp.eq.s32.totalorder %s25_s27, 0  ;;  %p35_p1 = scmp.ne.s32.totalorder %s4060_s16, %s4056_s15 }
  0x2c   : > { %p36_p4 = scmp.eq.s32.totalorder %s4064_s17, 0  ;;  %p3889_p6 = scmp.lt.s32.totalorder %s4064_s17, 2 }
  0x2d   : > { %s4182_s13 = scalar_select %p26_p2, %s4060_s16, %s28_s26  }
  0x2e   : > { %p37_p8 = por %p36_p4, %p35_p1  ;;  %p6466_p10 = scmp.eq.s32.totalorder %s4116_s2, 1 }
  0x2f   : > { %s149_s22 = sand.u32 1, %s4060_s16   ;;  %s3074_s28 = sshll.u32 %s4064_s17, 7 }
  0x30   : > { %p4186_p12 = por %p6466_p10, %p35_p1  ;;  %s3057_s29 = sshll.u32 %s149_s22, 3 }
  0x31   : > { %s4195_s4 = scalar_lea.hbm %s5940_s0, %s3074_s28  ;;  %s153_s23 = scalar_lea.vmem [#allocation4], %s3057_s29 }
  0x32   : > { %s161_s26 = sshll.u32 %s153_s23, 4  ;;  %p4197_p11 = pnand %p3889_p6, %p37_p8  ;;  %s4201_s26 = int_to_ptr.vmem [resolvable:$true] %s161_s26 }
  0x33   : > { %s150_s5 = scalar_lea.sflag [#allocation5], %s149_s22  ;;  %s3964_s6 = scalar_lea.hbm %s4195_s4, 128 }
  0x34   : > { %p3965_p13 = scmp.ne.s32.totalorder %s4195_s4, %s3964_s6  ;;  %p3966_p0 = pneg %p4197_p11 }
  0x35   : > { %s3969_s9 = scalar_lea.hbm %s5940_s0, 256  ;;  %p3970_p7 = scmp.lt.u32.totalorder %s4195_s4, %s5940_s0 }
  0x36   : > { %p3967_p3 = pnand %p3966_p0, %p3965_p13  ;;  %p3971_p9 = scmp.lt.u32.totalorder %s3969_s9, %s3964_s6 }
  0x37   : > { %p3973_p1 = scmp.lt.u32.totalorder %s3964_s6, %s4195_s4 }
  0x38   : > { %p3968_p5 = pneg %p3967_p3  ;;  %p3972_p2 = por %p3971_p9, %p3970_p7 }
  0x3a   : > { %p3974_p4 = por %p3973_p1, %p3972_p2 }
  0x3c   : > { %p3975_p6 = pnand %p3974_p4, %p3968_p5 }
  0x3e   : > { %3978 = shalt.err (!%p3975_p6)
}
  0x3f   : > { %s3979_s12 = scalar_lea.vmem %s4201_s26, 128  ;;  %s4069_s22 = smov [#allocation4]  }
  0x40   : > { %p3980_p8 = scmp.ne.s32.totalorder %s4201_s26, %s3979_s12  ;;  %s3984_s28 = sshll.u32 %s4069_s22, 4  ;;  %s3985_s28 = int_to_ptr.vmem [resolvable:$false] %s3984_s28 }
  0x41   : > { %s3986_s29 = scalar_lea.vmem %s3985_s28, 256  ;;  %p3987_p3 = scmp.lt.s32.totalorder %s4201_s26, %s3985_s28 }
  0x42   : > { %p3982_p10 = pnand %p3980_p8, %p3966_p0  ;;  %p3988_p7 = scmp.lt.s32.totalorder %s3986_s29, %s3979_s12 }
  0x44   : > { %p3983_p13 = pneg %p3982_p10  ;;  %p3989_p9 = por %p3988_p7, %p3987_p3 }
  0x46   : > { %p3990_p2 = pnand %p3989_p9, %p3983_p13 }
  0x48   : > { %3993 = shalt.err (!%p3990_p2)
}
  0x49   : > { %3883 = dma.hbm_to_vmem [thread:$0]  (!%p4197_p11), %s4195_s4, 128, %s4201_s26, %s150_s5  }
  0x4a   : > { %p6469_p5 = scmp.ne.s32.totalorder %s6464_s21, 0 }
  0x4c   : > { %170 = sbr.rel (%p6469_p5) target bundleno = 830 (0x33e), region = 32 }
  0x53   : > { %s4231_s24 = sand.u32 1, %s4056_s15   ;;  %p6470_p0 = scmp.ne.s32.totalorder %s6462_s19, 0 }
  0x54   : > { %s3061_s30 = sshll.u32 %s4231_s24, 3  ;;  %s173_s23 = scalar_lea.sflag [#allocation5], %s4231_s24 }
  0x55   : > { %s4237_s6 = scalar_lea.vmem [#allocation4], %s3061_s30 }
  0x56   : > { %4039 = dma.done.wait (%p6470_p0), %s173_s23, 128  }
  0x57   : > { %4041 = vsyncadd (%p6470_p0), %s173_s23, 4294967168  ;;  %p6471_p11 = scmp.eq.s32.totalorder %s4116_s2, 0 }
  0x59   : > { %4043 = dma.done.wait (%p6471_p11), [#allocation8], 16384   ;;  %p6472_p1 = pmov %p6471_p11 }
  0x5a   : > { %v4070_v0 = vmov 0.0   ;;  %v234_v1 = vld [vmem:[#allocation7 + $0x8] sm:$0xff]  ;;  %v236_v2 = vld [vmem:[#allocation7 + $0x18] sm:$0xff]  ;;  %v233_v8 = vld [vmem:[#allocation7] sm:$0xff]  ;;  %s361_s19 = sld [smem:[#allocation3]]  ;;  %s3075_s21 = sshll.u32 %s4116_s2, 7 }
  0x5b   : > { %4045 = vsyncadd (%p6472_p1), [#allocation8], 4294950912  ;;  %204 = vst [vmem:[#allocation2 + $0x8] sm:$0xfe] %v4070_v0  ;;  %v298_v3 = vld [vmem:[#allocation7 + $0x208] sm:$0xff]  ;;  %v363_v4 = vand.u32 4294901760, %v234_v1  ;;  %s5896_s7 = scalar_lea.hbm %s5943_s3, %s3075_s21 }
  0x5c   : > { %203 = vst [vmem:[#allocation2] sm:$0xfe] %v4070_v0  ;;  %205 = vst [vmem:[#allocation2 + $0x10] sm:$0xfe] %v4070_v0  ;;  %v367_v5 = vand.u32 4294901760, %v236_v2  ;;  %v300_v6 = vld [vmem:[#allocation7 + $0x218] sm:$0xff] }
  0x5d   : > { %206 = vst [vmem:[#allocation2 + $0x18] sm:$0xfe] %v4070_v0  ;;  %v1647_v7 = vand.u32 4294901760, %v298_v3  ;;  %v235_v9 = vld [vmem:[#allocation7 + $0x10] sm:$0xff]  ;;  %v1651_v10 = vand.u32 4294901760, %v300_v6  ;;  %v365_v11 = vand.u32 4294901760, %v233_v8  ;;  %v4249_v18 = vsub.f32 %v234_v1, %v363_v4 }
  0x5e   : > { %v369_v12 = vand.u32 4294901760, %v235_v9  ;;  %v297_v13 = vld [vmem:[#allocation7 + $0x200] sm:$0xff]  ;;  %v299_v14 = vld [vmem:[#allocation7 + $0x210] sm:$0xff]  ;;  %v238_v15 = vld [vmem:[#allocation7 + $0x28] sm:$0xff]  ;;  %v4247_v17 = vpack.c.bf16 %v367_v5, %v363_v4  ;;  %v4251_v19 = vsub.f32 %v236_v2, %v367_v5  ;;  %s202_s4 = scalar_lea.vmem [#allocation9], %s3061_s30  ;;  %s2959_s8 = scalar_lea.sflag [#allocation6], %s4231_s24 }
  0x5f   : > { %6474 = vst [vmem:[#allocation14_spill] sm:$0xff] %v4249_v18  ;;  %v4253_v20 = vsub.f32 %v298_v3, %v1647_v7  ;;  %v240_v21 = vld [vmem:[#allocation7 + $0x38] sm:$0xff]  ;;  %v302_v22 = vld [vmem:[#allocation7 + $0x228] sm:$0xff]  ;;  %v4255_v24 = vpack.c.bf16 %v1651_v10, %v1647_v7  ;;  %v4257_v25 = vsub.f32 %v300_v6, %v1651_v10  ;;  %v4261_v27 = vsub.f32 %v233_v8, %v365_v11  ;;  %v237_v28 = vld [vmem:[#allocation7 + $0x20] sm:$0xff]  ;;  %s2973_s26 = sshll.u32 %s202_s4, 4  ;;  %s4071_s2 = smov [#allocation9]   ;;  %s5898_s26 = int_to_ptr.vmem [resolvable:$true] %s2973_s26 }
  0x60   : > { %6473 = vst [vmem:[#allocation13_spill] sm:$0xff] %v4247_v17  ;;  %6475 = vst [vmem:[#allocation15_spill] sm:$0xff] %v4251_v19  ;;  %v304_v23 = vld [vmem:[#allocation7 + $0x238] sm:$0xff]  ;;  %v4259_v26 = vpack.c.bf16 %v369_v12, %v365_v11  ;;  %3077 = vmatprep.subr.bf16.mxu1 %v4247_v17  ;;  %v4264_v29 = vsub.f32 %v235_v9, %v369_v12  ;;  %v1649_v30 = vand.u32 4294901760, %v297_v13  ;;  %v1653_v31 = vand.u32 4294901760, %v299_v14  ;;  %v239_v33 = vld [vmem:[#allocation7 + $0x30] sm:$0xff] }
  0x61   : > { %6476 = vst [vmem:[#allocation16_spill] sm:$0xff] %v4253_v20  ;;  %6477 = vst [vmem:[#allocation17_spill] sm:$0xff] %v4255_v24  ;;  %v371_v32 = vand.u32 4294901760, %v238_v15  ;;  %3461 = vmatprep.subr.bf16.mxu0 %v4255_v24  ;;  %v375_v34 = vand.u32 4294901760, %v240_v21  ;;  %v1655_v35 = vand.u32 4294901760, %v302_v22  ;;  %v1659_v36 = vand.u32 4294901760, %v304_v23 }
  0x62   : > { %6478 = vst [vmem:[#allocation18_spill] sm:$0xff] %v4257_v25  ;;  %6479 = vst [vmem:[#allocation19_spill] sm:$0xff] %v4259_v26  ;;  %3079 = vmatpush1.bf16.msra.mxu1 %v4259_v26  ;;  %v373_v37 = vand.u32 4294901760, %v237_v28  ;;  %v301_v38 = vld [vmem:[#allocation7 + $0x220] sm:$0xff]  ;;  %v303_v39 = vld [vmem:[#allocation7 + $0x230] sm:$0xff]  ;;  %v4268_v40 = vpack.c.bf16 %v1653_v31, %v1649_v30  ;;  %v4270_v41 = vsub.f32 %v297_v13, %v1649_v30  ;;  %v377_v53 = vand.u32 4294901760, %v239_v33 }
  0x63   : > { %6480 = vst [vmem:[#allocation20_spill] sm:$0xff] %v4261_v27  ;;  %6481 = vst [vmem:[#allocation21_spill] sm:$0xff] %v4264_v29  ;;  %v4272_v42 = vsub.f32 %v299_v14, %v1653_v31  ;;  %v4274_v43 = vsub.f32 %v238_v15, %v371_v32  ;;  %v242_v44 = vld [vmem:[#allocation7 + $0x48] sm:$0xff]  ;;  %v244_v45 = vld [vmem:[#allocation7 + $0x58] sm:$0xff]  ;;  %v4276_v47 = vpack.c.bf16 %v375_v34, %v371_v32  ;;  %v1657_v55 = vand.u32 4294901760, %v301_v38  ;;  %s3994_s9 = scalar_lea.vmem %s5898_s26, 128 }
  0x64   : > { %6482 = vst [vmem:[#allocation22_spill] sm:$0xff] %v4268_v40  ;;  %6483 = vst [vmem:[#allocation23_spill] sm:$0xff] %v4270_v41  ;;  %v306_v46 = vld [vmem:[#allocation7 + $0x248] sm:$0xff]  ;;  %v4278_v48 = vsub.f32 %v240_v21, %v375_v34  ;;  %v4280_v49 = vpack.c.bf16 %v1659_v36, %v1655_v35  ;;  %v4282_v50 = vsub.f32 %v302_v22, %v1655_v35  ;;  %v308_v51 = vld [vmem:[#allocation7 + $0x258] sm:$0xff]  ;;  %3463 = vmatpush1.bf16.msra.mxu0 %v4268_v40  ;;  %p3995_p4 = scmp.ne.s32.totalorder %s5898_s26, %s3994_s9  ;;  %s3998_s10 = sshll.u32 %s4071_s2, 4  ;;  %s3999_s10 = int_to_ptr.vmem [resolvable:$false] %s3998_s10 }
  0x65   : > { %6484 = vst [vmem:[#allocation24_spill] sm:$0xff] %v4272_v42  ;;  %6485 = vst [vmem:[#allocation25_spill] sm:$0xff] %v4274_v43  ;;  %v4285_v52 = vsub.f32 %v304_v23, %v1659_v36  ;;  %v4287_v54 = vsub.f32 %v237_v28, %v373_v37  ;;  %3081 = vmatprep.subr.bf16.mxu1 %v4276_v47  ;;  %v1661_v56 = vand.u32 4294901760, %v303_v39  ;;  %v379_v57 = vand.u32 4294901760, %v242_v44  ;;  %v241_v60 = vld [vmem:[#allocation7 + $0x40] sm:$0xff]  ;;  %v243_v61 = vld [vmem:[#allocation7 + $0x50] sm:$0xff]  ;;  %p4001_p10 = scmp.lt.s32.totalorder %s5898_s26, %s3999_s10 }
  0x66   : > { %6486 = vst [vmem:[#allocation26_spill] sm:$0xff] %v4276_v47  ;;  %6487 = vst [vmem:[#allocation27_spill] sm:$0xff] %v4278_v48  ;;  %3465 = vmatprep.subr.bf16.mxu0 %v4280_v49  ;;  %v383_v58 = vand.u32 4294901760, %v244_v45  ;;  %v1663_v59 = vand.u32 4294901760, %v306_v46  ;;  %v4291_v62 = vpack.c.bf16 %v377_v53, %v373_v37  ;;  %v4293_v63 = vsub.f32 %v239_v33, %v377_v53  ;;  %v305_v2 = vld [vmem:[#allocation7 + $0x240] sm:$0xff]  ;;  %v307_v3 = vld [vmem:[#allocation7 + $0x250] sm:$0xff]  ;;  %p3996_p6 = pnand %p3995_p4, %p4186_p12 }
  0x67   : > { %6488 = vst [vmem:[#allocation28_spill] sm:$0xff] %v4280_v49  ;;  %6489 = vst [vmem:[#allocation29_spill] sm:$0xff] %v4282_v50  ;;  %v4295_v0 = vsub.f32 %v301_v38, %v1657_v55  ;;  %v1667_v1 = vand.u32 4294901760, %v308_v51  ;;  %v246_v4 = vld [vmem:[#allocation7 + $0x68] sm:$0xff]  ;;  %v4297_v5 = vpack.c.bf16 %v1661_v56, %v1657_v55  ;;  %v4299_v6 = vsub.f32 %v303_v39, %v1661_v56  ;;  %v248_v9 = vld [vmem:[#allocation7 + $0x78] sm:$0xff]  ;;  %s4000_s11 = scalar_lea.vmem %s3999_s10, 256 }
  0x68   : > { %6490 = vst [vmem:[#allocation30_spill] sm:$0xff] %v4285_v52  ;;  %6491 = vst [vmem:[#allocation31_spill] sm:$0xff] %v4287_v54  ;;  %v4301_v7 = vpack.c.bf16 %v383_v58, %v379_v57  ;;  %v4303_v8 = vsub.f32 %v242_v44, %v379_v57  ;;  %v310_v10 = vld [vmem:[#allocation7 + $0x268] sm:$0xff]  ;;  %v312_v11 = vld [vmem:[#allocation7 + $0x278] sm:$0xff]  ;;  %3083 = vmatpush1.bf16.msra.mxu1 %v4291_v62  ;;  %v4306_v12 = vsub.f32 %v244_v45, %v383_v58  ;;  %p3997_p8 = pneg %p3996_p6  ;;  %p4002_p13 = scmp.lt.s32.totalorder %s4000_s11, %s3994_s9 }
  0x69   : > { %6492 = vst [vmem:[#allocation32_spill] sm:$0xff] %v4291_v62  ;;  %6493 = vst [vmem:[#allocation33_spill] sm:$0xff] %v4293_v63  ;;  %v4308_v13 = vpack.c.bf16 %v1667_v1, %v1663_v59  ;;  %v4310_v14 = vsub.f32 %v306_v46, %v1663_v59  ;;  %v4312_v15 = vsub.f32 %v308_v51, %v1667_v1  ;;  %3467 = vmatpush1.bf16.msra.mxu0 %v4297_v5  ;;  %v245_v34 = vld [vmem:[#allocation7 + $0x60] sm:$0xff]  ;;  %v247_v39 = vld [vmem:[#allocation7 + $0x70] sm:$0xff] }
  0x6a   : > { %6494 = vst [vmem:[#allocation34_spill] sm:$0xff] %v4295_v0  ;;  %6495 = vst [vmem:[#allocation35_spill] sm:$0xff] %v4297_v5  ;;  %3085 = vmatprep.subr.bf16.mxu1 %v4301_v7  ;;  %v381_v21 = vand.u32 4294901760, %v241_v60  ;;  %v385_v22 = vand.u32 4294901760, %v243_v61  ;;  %v1665_v23 = vand.u32 4294901760, %v305_v2  ;;  %v1669_v28 = vand.u32 4294901760, %v307_v3  ;;  %p4003_p3 = por %p4002_p13, %p4001_p10 }
  0x6b   : > { %6496 = vst [vmem:[#allocation36_spill] sm:$0xff] %v4299_v6  ;;  %6497 = vst [vmem:[#allocation37_spill] sm:$0xff] %v4301_v7  ;;  %3469 = vmatprep.subr.bf16.mxu0 %v4308_v13  ;;  %v387_v30 = vand.u32 4294901760, %v246_v4  ;;  %v391_v31 = vand.u32 4294901760, %v248_v9  ;;  %v1671_v32 = vand.u32 4294901760, %v310_v10  ;;  %v1675_v33 = vand.u32 4294901760, %v312_v11 }
  0x6c   : > { %6498 = vst [vmem:[#allocation38_spill] sm:$0xff] %v4303_v8  ;;  %6499 = vst [vmem:[#allocation39_spill] sm:$0xff] %v4306_v12  ;;  %v4317_v35 = vpack.c.bf16 %v385_v22, %v381_v21  ;;  %v4319_v36 = vsub.f32 %v241_v60, %v381_v21  ;;  %v4321_v37 = vsub.f32 %v243_v61, %v385_v22  ;;  %v309_v44 = vld [vmem:[#allocation7 + $0x260] sm:$0xff]  ;;  %v311_v45 = vld [vmem:[#allocation7 + $0x270] sm:$0xff]  ;;  %v389_v1 = vand.u32 4294901760, %v245_v34  ;;  %p4004_p7 = pnand %p4003_p3, %p3997_p8 }
  0x6d   : > { %6500 = vst [vmem:[#allocation40_spill] sm:$0xff] %v4308_v13  ;;  %6501 = vst [vmem:[#allocation41_spill] sm:$0xff] %v4310_v14  ;;  %v4323_v38 = vpack.c.bf16 %v1669_v28, %v1665_v23  ;;  %v4325_v46 = vsub.f32 %v305_v2, %v1665_v23  ;;  %v4327_v51 = vsub.f32 %v307_v3, %v1669_v28  ;;  %v250_v56 = vld [vmem:[#allocation7 + $0x88] sm:$0xff]  ;;  %v252_v57 = vld [vmem:[#allocation7 + $0x98] sm:$0xff]  ;;  %v393_v3 = vand.u32 4294901760, %v247_v39 }
  0x6e   : > { %6502 = vst [vmem:[#allocation42_spill] sm:$0xff] %v4312_v15  ;;  %6503 = vst [vmem:[#allocation43_spill] sm:$0xff] %v4317_v35  ;;  %v4329_v53 = vpack.c.bf16 %v391_v31, %v387_v30  ;;  %v4331_v55 = vsub.f32 %v246_v4, %v387_v30  ;;  %v314_v58 = vld [vmem:[#allocation7 + $0x288] sm:$0xff]  ;;  %3087 = vmatpush1.bf16.msra.mxu1 %v4317_v35  ;;  %v4335_v59 = vsub.f32 %v248_v9, %v391_v31  ;;  %v316_v22 = vld [vmem:[#allocation7 + $0x298] sm:$0xff] }
  0x6f   : > { %6504 = vst [vmem:[#allocation44_spill] sm:$0xff] %v4319_v36  ;;  %6505 = vst [vmem:[#allocation45_spill] sm:$0xff] %v4321_v37  ;;  %3471 = vmatpush1.bf16.msra.mxu0 %v4323_v38  ;;  %v4337_v60 = vpack.c.bf16 %v1675_v33, %v1671_v32  ;;  %v4339_v61 = vsub.f32 %v310_v10, %v1671_v32  ;;  %v4342_v2 = vsub.f32 %v312_v11, %v1675_v33  ;;  %v249_v31 = vld [vmem:[#allocation7 + $0x80] sm:$0xff]  ;;  %v251_v16 = vld [vmem:[#allocation7 + $0x90] sm:$0xff] }
  0x70   : > { %6506 = vst [vmem:[#allocation46_spill] sm:$0xff] %v4323_v38  ;;  %6507 = vst [vmem:[#allocation47_spill] sm:$0xff] %v4325_v46  ;;  %3089 = vmatprep.subr.bf16.mxu1 %v4329_v53  ;;  %v1673_v4 = vand.u32 4294901760, %v309_v44  ;;  %v1677_v21 = vand.u32 4294901760, %v311_v45  ;;  %v4345_v23 = vsub.f32 %v245_v34, %v389_v1  ;;  %v395_v28 = vand.u32 4294901760, %v250_v56  ;;  %v313_v10 = vld [vmem:[#allocation7 + $0x280] sm:$0xff] }
  0x71   : > { %6508 = vst [vmem:[#allocation48_spill] sm:$0xff] %v4327_v51  ;;  %6509 = vst [vmem:[#allocation49_spill] sm:$0xff] %v4329_v53  ;;  %3473 = vmatprep.subr.bf16.mxu0 %v4337_v60  ;;  %v399_v9 = vand.u32 4294901760, %v252_v57  ;;  %v1679_v30 = vand.u32 4294901760, %v314_v58  ;;  %v4347_v32 = vpack.c.bf16 %v393_v3, %v389_v1  ;;  %v4349_v38 = vsub.f32 %v247_v39, %v393_v3  ;;  %v315_v53 = vld [vmem:[#allocation7 + $0x290] sm:$0xff]  ;;  %v254_v35 = vld [vmem:[#allocation7 + $0xa8] sm:$0xff] }
  0x72   : > { %6510 = vst [vmem:[#allocation50_spill] sm:$0xff] %v4331_v55  ;;  %6511 = vst [vmem:[#allocation51_spill] sm:$0xff] %v4335_v59  ;;  %v4351_v11 = vpack.c.bf16 %v1677_v21, %v1673_v4  ;;  %v4353_v33 = vsub.f32 %v309_v44, %v1673_v4  ;;  %v256_v13 = vld [vmem:[#allocation7 + $0xb8] sm:$0xff]  ;;  %v4359_v7 = vsub.f32 %v250_v56, %v395_v28  ;;  %v1683_v39 = vand.u32 4294901760, %v316_v22  ;;  %v318_v49 = vld [vmem:[#allocation7 + $0x2a8] sm:$0xff] }
  0x73   : > { %6512 = vst [vmem:[#allocation52_spill] sm:$0xff] %v4337_v60  ;;  %6513 = vst [vmem:[#allocation53_spill] sm:$0xff] %v4339_v61  ;;  %v4355_v60 = vsub.f32 %v311_v45, %v1677_v21  ;;  %v4357_v34 = vpack.c.bf16 %v399_v9, %v395_v28  ;;  %v4361_v5 = vsub.f32 %v252_v57, %v399_v9  ;;  %3091 = vmatpush1.bf16.msra.mxu1 %v4347_v32  ;;  %v320_v56 = vld [vmem:[#allocation7 + $0x2b8] sm:$0xff]  ;;  %v317_v47 = vld [vmem:[#allocation7 + $0x2a0] sm:$0xff] }
  0x74   : > { %6514 = vst [vmem:[#allocation54_spill] sm:$0xff] %v4342_v2  ;;  %6515 = vst [vmem:[#allocation55_spill] sm:$0xff] %v4345_v23  ;;  %3475 = vmatpush1.bf16.msra.mxu0 %v4351_v11  ;;  %v4365_v1 = vsub.f32 %v314_v58, %v1679_v30  ;;  %v397_v44 = vand.u32 4294901760, %v249_v31  ;;  %v401_v3 = vand.u32 4294901760, %v251_v16  ;;  %v1681_v4 = vand.u32 4294901760, %v313_v10  ;;  %v253_v58 = vld [vmem:[#allocation7 + $0xa0] sm:$0xff] }
  0x75   : > { %6516 = vst [vmem:[#allocation56_spill] sm:$0xff] %v4347_v32  ;;  %6517 = vst [vmem:[#allocation57_spill] sm:$0xff] %v4349_v38  ;;  %3093 = vmatprep.subr.bf16.mxu1 %v4357_v34  ;;  %v1685_v45 = vand.u32 4294901760, %v315_v53  ;;  %v403_v21 = vand.u32 4294901760, %v254_v35  ;;  %v407_v62 = vand.u32 4294901760, %v256_v13  ;;  %v4368_v28 = vpack.c.bf16 %v1683_v39, %v1679_v30  ;;  %v255_v32 = vld [vmem:[#allocation7 + $0xb0] sm:$0xff] }
  0x76   : > { %6518 = vst [vmem:[#allocation58_spill] sm:$0xff] %v4351_v11  ;;  %6519 = vst [vmem:[#allocation59_spill] sm:$0xff] %v4353_v33  ;;  %v4370_v57 = vsub.f32 %v316_v22, %v1683_v39  ;;  %v4372_v9 = vpack.c.bf16 %v401_v3, %v397_v44  ;;  %v4374_v11 = vsub.f32 %v249_v31, %v397_v44  ;;  %v319_v17 = vld [vmem:[#allocation7 + $0x2b0] sm:$0xff]  ;;  %v258_v30 = vld [vmem:[#allocation7 + $0xc8] sm:$0xff]  ;;  %v405_v44 = vand.u32 4294901760, %v253_v58 }
  0x77   : > { %6520 = vst [vmem:[#allocation60_spill] sm:$0xff] %v4355_v60  ;;  %6521 = vst [vmem:[#allocation61_spill] sm:$0xff] %v4357_v34  ;;  %v4376_v40 = vsub.f32 %v251_v16, %v401_v3  ;;  %v4378_v34 = vpack.c.bf16 %v1685_v45, %v1681_v4  ;;  %v4380_v26 = vsub.f32 %v313_v10, %v1681_v4  ;;  %3477 = vmatprep.subr.bf16.mxu0 %v4368_v28 }
  0x78   : > { %6522 = vst [vmem:[#allocation62_spill] sm:$0xff] %v4359_v7  ;;  %6523 = vst [vmem:[#allocation63_spill] sm:$0xff] %v4361_v5  ;;  %v4382_v24 = vsub.f32 %v315_v53, %v1685_v45  ;;  %3095 = vmatpush1.bf16.msra.mxu1 %v4372_v9  ;;  %v4386_v22 = vpack.c.bf16 %v407_v62, %v403_v21  ;;  %v4388_v31 = vsub.f32 %v254_v35, %v403_v21 }
  0x79   : > { %6524 = vst [vmem:[#allocation64_spill] sm:$0xff] %v4365_v1  ;;  %6525 = vst [vmem:[#allocation65_spill] sm:$0xff] %v4368_v28  ;;  %v260_v1 = vld [vmem:[#allocation7 + $0xd8] sm:$0xff]  ;;  %v4390_v39 = vsub.f32 %v256_v13, %v407_v62  ;;  %v1687_v16 = vand.u32 4294901760, %v318_v49  ;;  %3479 = vmatpush1.bf16.msra.mxu0 %v4378_v34  ;;  %v1691_v10 = vand.u32 4294901760, %v320_v56  ;;  %v409_v53 = vand.u32 4294901760, %v255_v32 }
  0x7a   : > { %6526 = vst [vmem:[#allocation66_spill] sm:$0xff] %v4370_v57  ;;  %6527 = vst [vmem:[#allocation67_spill] sm:$0xff] %v4372_v9  ;;  %v1689_v3 = vand.u32 4294901760, %v317_v47  ;;  %3097 = vmatprep.subr.bf16.mxu1 %v4386_v22  ;;  %v1693_v45 = vand.u32 4294901760, %v319_v17  ;;  %v411_v28 = vand.u32 4294901760, %v258_v30  ;;  %v415_v9 = vand.u32 4294901760, %v260_v1 }
  0x7b   : > { %6528 = vst [vmem:[#allocation68_spill] sm:$0xff] %v4374_v11  ;;  %6529 = vst [vmem:[#allocation69_spill] sm:$0xff] %v4376_v40  ;;  %v4394_v4 = vsub.f32 %v318_v49, %v1687_v16  ;;  %v4396_v35 = vpack.c.bf16 %v1691_v10, %v1687_v16  ;;  %v4398_v62 = vsub.f32 %v320_v56, %v1691_v10  ;;  %v323_v11 = vld [vmem:[#allocation7 + $0x2d0] sm:$0xff]  ;;  %v262_v16 = vld [vmem:[#allocation7 + $0xe8] sm:$0xff] }
  0x7c   : > { %6530 = vst [vmem:[#allocation70_spill] sm:$0xff] %v4378_v34  ;;  %6531 = vst [vmem:[#allocation71_spill] sm:$0xff] %v4380_v26  ;;  %v324_v26 = vld [vmem:[#allocation7 + $0x2d8] sm:$0xff]  ;;  %v4400_v13 = vpack.c.bf16 %v409_v53, %v405_v44  ;;  %v4402_v21 = vsub.f32 %v253_v58, %v405_v44  ;;  %v257_v34 = vld [vmem:[#allocation7 + $0xc0] sm:$0xff]  ;;  %v4404_v40 = vsub.f32 %v255_v32, %v409_v53 }
  0x7d   : > { %6532 = vst [vmem:[#allocation72_spill] sm:$0xff] %v4382_v24  ;;  %6533 = vst [vmem:[#allocation73_spill] sm:$0xff] %v4386_v22  ;;  %v322_v24 = vld [vmem:[#allocation7 + $0x2c8] sm:$0xff]  ;;  %v4406_v49 = vpack.c.bf16 %v1693_v45, %v1689_v3  ;;  %v4408_v22 = vsub.f32 %v317_v47, %v1689_v3  ;;  %v264_v57 = vld [vmem:[#allocation7 + $0xf8] sm:$0xff]  ;;  %3481 = vmatprep.subr.bf16.mxu0 %v4396_v35  ;;  %v4414_v56 = vpack.c.bf16 %v415_v9, %v411_v28 }
  0x7e   : > { %6534 = vst [vmem:[#allocation74_spill] sm:$0xff] %v4388_v31  ;;  %6535 = vst [vmem:[#allocation75_spill] sm:$0xff] %v4390_v39  ;;  %v259_v39 = vld [vmem:[#allocation7 + $0xd0] sm:$0xff]  ;;  %v321_v31 = vld [vmem:[#allocation7 + $0x2c0] sm:$0xff]  ;;  %3099 = vmatpush1.bf16.msra.mxu1 %v4400_v13  ;;  %v4416_v58 = vsub.f32 %v258_v30, %v411_v28  ;;  %v4418_v10 = vsub.f32 %v260_v1, %v415_v9  ;;  %v1695_v32 = vand.u32 4294901760, %v322_v24  ;;  %v1699_v47 = vand.u32 4294901760, %v324_v26 }
  0x7f   : > { %6536 = vst [vmem:[#allocation76_spill] sm:$0xff] %v4394_v4  ;;  %6537 = vst [vmem:[#allocation77_spill] sm:$0xff] %v4396_v35  ;;  %v4410_v4 = vsub.f32 %v319_v17, %v1693_v45  ;;  %3483 = vmatpush1.bf16.msra.mxu0 %v4406_v49  ;;  %v413_v44 = vand.u32 4294901760, %v257_v34  ;;  %v417_v17 = vand.u32 4294901760, %v259_v39  ;;  %v1697_v53 = vand.u32 4294901760, %v321_v31  ;;  %3101 = vmatprep.subr.bf16.mxu1 %v4414_v56 }
  0x80   : > { %6538 = vst [vmem:[#allocation78_spill] sm:$0xff] %v4398_v62  ;;  %6539 = vst [vmem:[#allocation79_spill] sm:$0xff] %v4400_v13  ;;  %v4422_v3 = vsub.f32 %v322_v24, %v1695_v32  ;;  %v1701_v45 = vand.u32 4294901760, %v323_v11  ;;  %v419_v35 = vand.u32 4294901760, %v262_v16  ;;  %v423_v13 = vand.u32 4294901760, %v264_v57  ;;  %v268_v62 = vld [vmem:[#allocation7 + $0x118] sm:$0xff] }
  0x81   : > { %6540 = vst [vmem:[#allocation80_spill] sm:$0xff] %v4402_v21  ;;  %6541 = vst [vmem:[#allocation81_spill] sm:$0xff] %v4404_v40  ;;  %v4424_v28 = vpack.c.bf16 %v1699_v47, %v1695_v32  ;;  %v4426_v1 = vsub.f32 %v324_v26, %v1699_v47  ;;  %v4428_v9 = vpack.c.bf16 %v417_v17, %v413_v44  ;;  %v327_v21 = vld [vmem:[#allocation7 + $0x2f0] sm:$0xff]  ;;  %v266_v32 = vld [vmem:[#allocation7 + $0x108] sm:$0xff] }
  0x82   : > { %6542 = vst [vmem:[#allocation82_spill] sm:$0xff] %v4406_v49  ;;  %6543 = vst [vmem:[#allocation83_spill] sm:$0xff] %v4408_v22  ;;  %v328_v22 = vld [vmem:[#allocation7 + $0x2f8] sm:$0xff]  ;;  %v4430_v30 = vsub.f32 %v257_v34, %v413_v44  ;;  %v261_v49 = vld [vmem:[#allocation7 + $0xe0] sm:$0xff]  ;;  %v4432_v40 = vsub.f32 %v259_v39, %v417_v17  ;;  %v4434_v24 = vpack.c.bf16 %v1701_v45, %v1697_v53 }
  0x83   : > { %6544 = vst [vmem:[#allocation84_spill] sm:$0xff] %v4410_v4  ;;  %6545 = vst [vmem:[#allocation85_spill] sm:$0xff] %v4414_v56  ;;  %v326_v4 = vld [vmem:[#allocation7 + $0x2e8] sm:$0xff]  ;;  %v4436_v56 = vsub.f32 %v321_v31, %v1697_v53  ;;  %3485 = vmatprep.subr.bf16.mxu0 %v4424_v28  ;;  %3103 = vmatpush1.bf16.msra.mxu1 %v4428_v9  ;;  %v4442_v26 = vpack.c.bf16 %v423_v13, %v419_v35  ;;  %v1707_v31 = vand.u32 4294901760, %v328_v22 }
  0x84   : > { %6546 = vst [vmem:[#allocation86_spill] sm:$0xff] %v4416_v58  ;;  %6547 = vst [vmem:[#allocation87_spill] sm:$0xff] %v4418_v10  ;;  %v263_v10 = vld [vmem:[#allocation7 + $0xf0] sm:$0xff]  ;;  %v325_v58 = vld [vmem:[#allocation7 + $0x2e0] sm:$0xff]  ;;  %v4444_v34 = vsub.f32 %v262_v16, %v419_v35  ;;  %v4446_v47 = vsub.f32 %v264_v57, %v423_v13  ;;  %v1703_v39 = vand.u32 4294901760, %v326_v4  ;;  %3487 = vmatpush1.bf16.msra.mxu0 %v4434_v24  ;;  %v421_v44 = vand.u32 4294901760, %v261_v49 }
  0x85   : > { %6548 = vst [vmem:[#allocation88_spill] sm:$0xff] %v4422_v3  ;;  %6549 = vst [vmem:[#allocation89_spill] sm:$0xff] %v4424_v28  ;;  %v4438_v3 = vsub.f32 %v323_v11, %v1701_v45  ;;  %v425_v11 = vand.u32 4294901760, %v263_v10  ;;  %v1705_v17 = vand.u32 4294901760, %v325_v58  ;;  %3105 = vmatprep.subr.bf16.mxu1 %v4442_v26  ;;  %v1709_v45 = vand.u32 4294901760, %v327_v21 }
  0x86   : > { %6550 = vst [vmem:[#allocation90_spill] sm:$0xff] %v4426_v1  ;;  %6551 = vst [vmem:[#allocation91_spill] sm:$0xff] %v4428_v9  ;;  %v4450_v53 = vsub.f32 %v326_v4, %v1703_v39  ;;  %v427_v28 = vand.u32 4294901760, %v266_v32  ;;  %v431_v9 = vand.u32 4294901760, %v268_v62  ;;  %v4452_v35 = vpack.c.bf16 %v1707_v31, %v1703_v39  ;;  %v270_v39 = vld [vmem:[#allocation7 + $0x128] sm:$0xff]  ;;  %v272_v1 = vld [vmem:[#allocation7 + $0x138] sm:$0xff] }
  0x87   : > { %6552 = vst [vmem:[#allocation92_spill] sm:$0xff] %v4430_v30  ;;  %6553 = vst [vmem:[#allocation93_spill] sm:$0xff] %v4432_v40  ;;  %v4454_v57 = vsub.f32 %v328_v22, %v1707_v31  ;;  %v4456_v13 = vpack.c.bf16 %v425_v11, %v421_v44  ;;  %v4458_v16 = vsub.f32 %v261_v49, %v421_v44  ;;  %v331_v30 = vld [vmem:[#allocation7 + $0x310] sm:$0xff] }
  0x88   : > { %6554 = vst [vmem:[#allocation94_spill] sm:$0xff] %v4434_v24  ;;  %6555 = vst [vmem:[#allocation95_spill] sm:$0xff] %v4436_v56  ;;  %v332_v56 = vld [vmem:[#allocation7 + $0x318] sm:$0xff]  ;;  %v265_v24 = vld [vmem:[#allocation7 + $0x100] sm:$0xff]  ;;  %v4460_v40 = vsub.f32 %v263_v10, %v425_v11  ;;  %v4462_v4 = vpack.c.bf16 %v1709_v45, %v1705_v17  ;;  %3489 = vmatprep.subr.bf16.mxu0 %v4452_v35  ;;  %v4470_v22 = vpack.c.bf16 %v431_v9, %v427_v28 }
  0x89   : > { %6556 = vst [vmem:[#allocation96_spill] sm:$0xff] %v4438_v3  ;;  %6557 = vst [vmem:[#allocation97_spill] sm:$0xff] %v4442_v26  ;;  %v330_v3 = vld [vmem:[#allocation7 + $0x308] sm:$0xff]  ;;  %v4464_v26 = vsub.f32 %v325_v58, %v1705_v17  ;;  %3107 = vmatpush1.bf16.msra.mxu1 %v4456_v13  ;;  %v4472_v49 = vsub.f32 %v266_v32, %v427_v28  ;;  %v4474_v31 = vsub.f32 %v268_v62, %v431_v9 }
  0x8a   : > { %6558 = vst [vmem:[#allocation98_spill] sm:$0xff] %v4444_v34  ;;  %6559 = vst [vmem:[#allocation99_spill] sm:$0xff] %v4446_v47  ;;  %v267_v47 = vld [vmem:[#allocation7 + $0x110] sm:$0xff]  ;;  %v329_v34 = vld [vmem:[#allocation7 + $0x300] sm:$0xff]  ;;  %v1711_v10 = vand.u32 4294901760, %v330_v3  ;;  %3491 = vmatpush1.bf16.msra.mxu0 %v4462_v4  ;;  %v1715_v58 = vand.u32 4294901760, %v332_v56  ;;  %3109 = vmatprep.subr.bf16.mxu1 %v4470_v22 }
  0x8b   : > { %6560 = vst [vmem:[#allocation100_spill] sm:$0xff] %v4450_v53  ;;  %6561 = vst [vmem:[#allocation101_spill] sm:$0xff] %v4452_v35  ;;  %v4466_v53 = vsub.f32 %v327_v21, %v1709_v45  ;;  %v429_v44 = vand.u32 4294901760, %v265_v24  ;;  %v433_v21 = vand.u32 4294901760, %v267_v47  ;;  %v1713_v11 = vand.u32 4294901760, %v329_v34 }
  0x8c   : > { %6562 = vst [vmem:[#allocation102_spill] sm:$0xff] %v4454_v57  ;;  %6563 = vst [vmem:[#allocation103_spill] sm:$0xff] %v4456_v13  ;;  %v4478_v17 = vsub.f32 %v330_v3, %v1711_v10  ;;  %v1717_v45 = vand.u32 4294901760, %v331_v30  ;;  %v435_v35 = vand.u32 4294901760, %v270_v39  ;;  %v439_v13 = vand.u32 4294901760, %v272_v1  ;;  %v276_v57 = vld [vmem:[#allocation7 + $0x158] sm:$0xff] }
  0x8d   : > { %6564 = vst [vmem:[#allocation104_spill] sm:$0xff] %v4458_v16  ;;  %6565 = vst [vmem:[#allocation105_spill] sm:$0xff] %v4460_v40  ;;  %v4480_v28 = vpack.c.bf16 %v1715_v58, %v1711_v10  ;;  %v4482_v62 = vsub.f32 %v332_v56, %v1715_v58  ;;  %v4484_v9 = vpack.c.bf16 %v433_v21, %v429_v44  ;;  %v335_v16 = vld [vmem:[#allocation7 + $0x330] sm:$0xff]  ;;  %v274_v10 = vld [vmem:[#allocation7 + $0x148] sm:$0xff] }
  0x8e   : > { %6566 = vst [vmem:[#allocation106_spill] sm:$0xff] %v4462_v4  ;;  %6567 = vst [vmem:[#allocation107_spill] sm:$0xff] %v4464_v26  ;;  %v336_v26 = vld [vmem:[#allocation7 + $0x338] sm:$0xff]  ;;  %v4486_v32 = vsub.f32 %v265_v24, %v429_v44  ;;  %v269_v4 = vld [vmem:[#allocation7 + $0x120] sm:$0xff]  ;;  %v4488_v40 = vsub.f32 %v267_v47, %v433_v21  ;;  %v4490_v3 = vpack.c.bf16 %v1717_v45, %v1713_v11 }
  0x8f   : > { %6568 = vst [vmem:[#allocation108_spill] sm:$0xff] %v4466_v53  ;;  %6569 = vst [vmem:[#allocation109_spill] sm:$0xff] %v4470_v22  ;;  %v334_v53 = vld [vmem:[#allocation7 + $0x328] sm:$0xff]  ;;  %v4492_v22 = vsub.f32 %v329_v34, %v1713_v11  ;;  %3493 = vmatprep.subr.bf16.mxu0 %v4480_v28  ;;  %3111 = vmatpush1.bf16.msra.mxu1 %v4484_v9  ;;  %v4498_v56 = vpack.c.bf16 %v439_v13, %v435_v35  ;;  %v1723_v34 = vand.u32 4294901760, %v336_v26 }
  0x90   : > { %6570 = vst [vmem:[#allocation110_spill] sm:$0xff] %v4472_v49  ;;  %6571 = vst [vmem:[#allocation111_spill] sm:$0xff] %v4474_v31  ;;  %v271_v31 = vld [vmem:[#allocation7 + $0x130] sm:$0xff]  ;;  %v333_v49 = vld [vmem:[#allocation7 + $0x320] sm:$0xff]  ;;  %v4500_v24 = vsub.f32 %v270_v39, %v435_v35  ;;  %v4502_v58 = vsub.f32 %v272_v1, %v439_v13  ;;  %v1719_v47 = vand.u32 4294901760, %v334_v53  ;;  %3495 = vmatpush1.bf16.msra.mxu0 %v4490_v3  ;;  %v437_v44 = vand.u32 4294901760, %v269_v4 }
  0x91   : > { %6572 = vst [vmem:[#allocation112_spill] sm:$0xff] %v4478_v17  ;;  %6573 = vst [vmem:[#allocation113_spill] sm:$0xff] %v4480_v28  ;;  %v4494_v17 = vsub.f32 %v331_v30, %v1717_v45  ;;  %v441_v30 = vand.u32 4294901760, %v271_v31  ;;  %v1721_v21 = vand.u32 4294901760, %v333_v49  ;;  %3113 = vmatprep.subr.bf16.mxu1 %v4498_v56  ;;  %v1725_v45 = vand.u32 4294901760, %v335_v16 }
  0x92   : > { %6574 = vst [vmem:[#allocation114_spill] sm:$0xff] %v4482_v62  ;;  %6575 = vst [vmem:[#allocation115_spill] sm:$0xff] %v4484_v9  ;;  %v4506_v11 = vsub.f32 %v334_v53, %v1719_v47  ;;  %v443_v28 = vand.u32 4294901760, %v274_v10  ;;  %v447_v9 = vand.u32 4294901760, %v276_v57  ;;  %v4508_v35 = vpack.c.bf16 %v1723_v34, %v1719_v47  ;;  %v278_v47 = vld [vmem:[#allocation7 + $0x168] sm:$0xff]  ;;  %v280_v62 = vld [vmem:[#allocation7 + $0x178] sm:$0xff] }
  0x93   : > { %6576 = vst [vmem:[#allocation116_spill] sm:$0xff] %v4486_v32  ;;  %6577 = vst [vmem:[#allocation117_spill] sm:$0xff] %v4488_v40  ;;  %v4510_v1 = vsub.f32 %v336_v26, %v1723_v34  ;;  %v4512_v13 = vpack.c.bf16 %v441_v30, %v437_v44  ;;  %v4514_v39 = vsub.f32 %v269_v4, %v437_v44  ;;  %v339_v32 = vld [vmem:[#allocation7 + $0x350] sm:$0xff] }
  0x94   : > { %6578 = vst [vmem:[#allocation118_spill] sm:$0xff] %v4490_v3  ;;  %6579 = vst [vmem:[#allocation119_spill] sm:$0xff] %v4492_v22  ;;  %v340_v22 = vld [vmem:[#allocation7 + $0x358] sm:$0xff]  ;;  %v273_v3 = vld [vmem:[#allocation7 + $0x140] sm:$0xff]  ;;  %v4516_v40 = vsub.f32 %v271_v31, %v441_v30  ;;  %v4518_v53 = vpack.c.bf16 %v1725_v45, %v1721_v21  ;;  %3497 = vmatprep.subr.bf16.mxu0 %v4508_v35  ;;  %v4526_v26 = vpack.c.bf16 %v447_v9, %v443_v28 }
  0x95   : > { %6580 = vst [vmem:[#allocation120_spill] sm:$0xff] %v4494_v17  ;;  %6581 = vst [vmem:[#allocation121_spill] sm:$0xff] %v4498_v56  ;;  %v338_v17 = vld [vmem:[#allocation7 + $0x348] sm:$0xff]  ;;  %v4520_v56 = vsub.f32 %v333_v49, %v1721_v21  ;;  %3115 = vmatpush1.bf16.msra.mxu1 %v4512_v13  ;;  %v4528_v4 = vsub.f32 %v274_v10, %v443_v28  ;;  %v4530_v34 = vsub.f32 %v276_v57, %v447_v9 }
  0x96   : > { %6582 = vst [vmem:[#allocation122_spill] sm:$0xff] %v4500_v24  ;;  %6583 = vst [vmem:[#allocation123_spill] sm:$0xff] %v4502_v58  ;;  %v275_v58 = vld [vmem:[#allocation7 + $0x150] sm:$0xff]  ;;  %v337_v24 = vld [vmem:[#allocation7 + $0x340] sm:$0xff]  ;;  %v1727_v31 = vand.u32 4294901760, %v338_v17  ;;  %3499 = vmatpush1.bf16.msra.mxu0 %v4518_v53  ;;  %v1731_v49 = vand.u32 4294901760, %v340_v22  ;;  %3117 = vmatprep.subr.bf16.mxu1 %v4526_v26 }
  0x97   : > { %6584 = vst [vmem:[#allocation124_spill] sm:$0xff] %v4506_v11  ;;  %6585 = vst [vmem:[#allocation125_spill] sm:$0xff] %v4508_v35  ;;  %v4522_v11 = vsub.f32 %v335_v16, %v1725_v45  ;;  %v445_v44 = vand.u32 4294901760, %v273_v3  ;;  %v449_v16 = vand.u32 4294901760, %v275_v58  ;;  %v1729_v30 = vand.u32 4294901760, %v337_v24 }
  0x98   : > { %6586 = vst [vmem:[#allocation126_spill] sm:$0xff] %v4510_v1  ;;  %6587 = vst [vmem:[#allocation127_spill] sm:$0xff] %v4512_v13  ;;  %v4534_v21 = vsub.f32 %v338_v17, %v1727_v31  ;;  %v1733_v45 = vand.u32 4294901760, %v339_v32  ;;  %v451_v35 = vand.u32 4294901760, %v278_v47  ;;  %v455_v13 = vand.u32 4294901760, %v280_v62  ;;  %v284_v1 = vld [vmem:[#allocation7 + $0x198] sm:$0xff] }
  0x99   : > { %6588 = vst [vmem:[#allocation128_spill] sm:$0xff] %v4514_v39  ;;  %6589 = vst [vmem:[#allocation129_spill] sm:$0xff] %v4516_v40  ;;  %v4536_v28 = vpack.c.bf16 %v1731_v49, %v1727_v31  ;;  %v4538_v57 = vsub.f32 %v340_v22, %v1731_v49  ;;  %v4540_v9 = vpack.c.bf16 %v449_v16, %v445_v44  ;;  %v343_v39 = vld [vmem:[#allocation7 + $0x370] sm:$0xff]  ;;  %v282_v31 = vld [vmem:[#allocation7 + $0x188] sm:$0xff] }
  0x9a   : > { %6590 = vst [vmem:[#allocation130_spill] sm:$0xff] %v4518_v53  ;;  %6591 = vst [vmem:[#allocation131_spill] sm:$0xff] %v4520_v56  ;;  %v344_v56 = vld [vmem:[#allocation7 + $0x378] sm:$0xff]  ;;  %v4542_v10 = vsub.f32 %v273_v3, %v445_v44  ;;  %v277_v53 = vld [vmem:[#allocation7 + $0x160] sm:$0xff]  ;;  %v4544_v40 = vsub.f32 %v275_v58, %v449_v16  ;;  %v4546_v17 = vpack.c.bf16 %v1733_v45, %v1729_v30 }
  0x9b   : > { %6592 = vst [vmem:[#allocation132_spill] sm:$0xff] %v4522_v11  ;;  %6593 = vst [vmem:[#allocation133_spill] sm:$0xff] %v4526_v26  ;;  %v342_v11 = vld [vmem:[#allocation7 + $0x368] sm:$0xff]  ;;  %v4548_v26 = vsub.f32 %v337_v24, %v1729_v30  ;;  %3501 = vmatprep.subr.bf16.mxu0 %v4536_v28  ;;  %3119 = vmatpush1.bf16.msra.mxu1 %v4540_v9  ;;  %v4554_v22 = vpack.c.bf16 %v455_v13, %v451_v35  ;;  %v1739_v24 = vand.u32 4294901760, %v344_v56 }
  0x9c   : > { %6594 = vst [vmem:[#allocation134_spill] sm:$0xff] %v4528_v4  ;;  %6595 = vst [vmem:[#allocation135_spill] sm:$0xff] %v4530_v34  ;;  %v279_v34 = vld [vmem:[#allocation7 + $0x170] sm:$0xff]  ;;  %v341_v4 = vld [vmem:[#allocation7 + $0x360] sm:$0xff]  ;;  %v4556_v3 = vsub.f32 %v278_v47, %v451_v35  ;;  %v4558_v49 = vsub.f32 %v280_v62, %v455_v13  ;;  %v1735_v58 = vand.u32 4294901760, %v342_v11  ;;  %3503 = vmatpush1.bf16.msra.mxu0 %v4546_v17  ;;  %v453_v44 = vand.u32 4294901760, %v277_v53 }
  0x9d   : > { %6596 = vst [vmem:[#allocation136_spill] sm:$0xff] %v4534_v21  ;;  %6597 = vst [vmem:[#allocation137_spill] sm:$0xff] %v4536_v28  ;;  %v4550_v21 = vsub.f32 %v339_v32, %v1733_v45  ;;  %v457_v32 = vand.u32 4294901760, %v279_v34  ;;  %v1737_v16 = vand.u32 4294901760, %v341_v4  ;;  %3121 = vmatprep.subr.bf16.mxu1 %v4554_v22  ;;  %v1741_v45 = vand.u32 4294901760, %v343_v39 }
  0x9e   : > { %6598 = vst [vmem:[#allocation138_spill] sm:$0xff] %v4538_v57  ;;  %6599 = vst [vmem:[#allocation139_spill] sm:$0xff] %v4540_v9  ;;  %v4562_v30 = vsub.f32 %v342_v11, %v1735_v58  ;;  %v459_v28 = vand.u32 4294901760, %v282_v31  ;;  %v463_v9 = vand.u32 4294901760, %v284_v1  ;;  %v4564_v35 = vpack.c.bf16 %v1739_v24, %v1735_v58  ;;  %v286_v58 = vld [vmem:[#allocation7 + $0x1a8] sm:$0xff]  ;;  %v288_v57 = vld [vmem:[#allocation7 + $0x1b8] sm:$0xff] }
  0x9f   : > { %6600 = vst [vmem:[#allocation140_spill] sm:$0xff] %v4542_v10  ;;  %6601 = vst [vmem:[#allocation141_spill] sm:$0xff] %v4544_v40  ;;  %v4566_v62 = vsub.f32 %v344_v56, %v1739_v24  ;;  %v4568_v13 = vpack.c.bf16 %v457_v32, %v453_v44  ;;  %v4570_v47 = vsub.f32 %v277_v53, %v453_v44  ;;  %v347_v10 = vld [vmem:[#allocation7 + $0x390] sm:$0xff] }
  0xa0   : > { %6602 = vst [vmem:[#allocation142_spill] sm:$0xff] %v4546_v17  ;;  %6603 = vst [vmem:[#allocation143_spill] sm:$0xff] %v4548_v26  ;;  %v348_v26 = vld [vmem:[#allocation7 + $0x398] sm:$0xff]  ;;  %v281_v17 = vld [vmem:[#allocation7 + $0x180] sm:$0xff]  ;;  %v4572_v40 = vsub.f32 %v279_v34, %v457_v32  ;;  %v4574_v11 = vpack.c.bf16 %v1741_v45, %v1737_v16  ;;  %3505 = vmatprep.subr.bf16.mxu0 %v4564_v35  ;;  %v4582_v56 = vpack.c.bf16 %v463_v9, %v459_v28 }
  0xa1   : > { %6604 = vst [vmem:[#allocation144_spill] sm:$0xff] %v4550_v21  ;;  %6605 = vst [vmem:[#allocation145_spill] sm:$0xff] %v4554_v22  ;;  %v346_v21 = vld [vmem:[#allocation7 + $0x388] sm:$0xff]  ;;  %v4576_v22 = vsub.f32 %v341_v4, %v1737_v16  ;;  %3123 = vmatpush1.bf16.msra.mxu1 %v4568_v13  ;;  %v4584_v53 = vsub.f32 %v282_v31, %v459_v28  ;;  %v4586_v24 = vsub.f32 %v284_v1, %v463_v9 }
  0xa2   : > { %6606 = vst [vmem:[#allocation146_spill] sm:$0xff] %v4556_v3  ;;  %6607 = vst [vmem:[#allocation147_spill] sm:$0xff] %v4558_v49  ;;  %v283_v49 = vld [vmem:[#allocation7 + $0x190] sm:$0xff]  ;;  %v345_v3 = vld [vmem:[#allocation7 + $0x380] sm:$0xff]  ;;  %v1743_v34 = vand.u32 4294901760, %v346_v21  ;;  %3507 = vmatpush1.bf16.msra.mxu0 %v4574_v11  ;;  %v1747_v4 = vand.u32 4294901760, %v348_v26  ;;  %3125 = vmatprep.subr.bf16.mxu1 %v4582_v56 }
  0xa3   : > { %6608 = vst [vmem:[#allocation148_spill] sm:$0xff] %v4562_v30  ;;  %6609 = vst [vmem:[#allocation149_spill] sm:$0xff] %v4564_v35  ;;  %v4578_v30 = vsub.f32 %v343_v39, %v1741_v45  ;;  %v461_v44 = vand.u32 4294901760, %v281_v17  ;;  %v465_v39 = vand.u32 4294901760, %v283_v49  ;;  %v1745_v32 = vand.u32 4294901760, %v345_v3 }
  0xa4   : > { %6610 = vst [vmem:[#allocation150_spill] sm:$0xff] %v4566_v62  ;;  %6611 = vst [vmem:[#allocation151_spill] sm:$0xff] %v4568_v13  ;;  %v4590_v16 = vsub.f32 %v346_v21, %v1743_v34  ;;  %v1749_v45 = vand.u32 4294901760, %v347_v10  ;;  %v467_v35 = vand.u32 4294901760, %v286_v58  ;;  %v471_v13 = vand.u32 4294901760, %v288_v57  ;;  %v292_v62 = vld [vmem:[#allocation7 + $0x1d8] sm:$0xff] }
  0xa5   : > { %6612 = vst [vmem:[#allocation152_spill] sm:$0xff] %v4570_v47  ;;  %6613 = vst [vmem:[#allocation153_spill] sm:$0xff] %v4572_v40  ;;  %v4592_v28 = vpack.c.bf16 %v1747_v4, %v1743_v34  ;;  %v4594_v1 = vsub.f32 %v348_v26, %v1747_v4  ;;  %v4596_v9 = vpack.c.bf16 %v465_v39, %v461_v44  ;;  %v351_v47 = vld [vmem:[#allocation7 + $0x3b0] sm:$0xff]  ;;  %v290_v34 = vld [vmem:[#allocation7 + $0x1c8] sm:$0xff] }
  0xa6   : > { %6614 = vst [vmem:[#allocation154_spill] sm:$0xff] %v4574_v11  ;;  %6615 = vst [vmem:[#allocation155_spill] sm:$0xff] %v4576_v22  ;;  %v352_v22 = vld [vmem:[#allocation7 + $0x3b8] sm:$0xff]  ;;  %v4598_v31 = vsub.f32 %v281_v17, %v461_v44  ;;  %v285_v11 = vld [vmem:[#allocation7 + $0x1a0] sm:$0xff]  ;;  %v4600_v40 = vsub.f32 %v283_v49, %v465_v39  ;;  %v4602_v21 = vpack.c.bf16 %v1749_v45, %v1745_v32 }
  0xa7   : > { %6616 = vst [vmem:[#allocation156_spill] sm:$0xff] %v4578_v30  ;;  %6617 = vst [vmem:[#allocation157_spill] sm:$0xff] %v4582_v56  ;;  %v350_v30 = vld [vmem:[#allocation7 + $0x3a8] sm:$0xff]  ;;  %v4604_v56 = vsub.f32 %v345_v3, %v1745_v32  ;;  %3509 = vmatprep.subr.bf16.mxu0 %v4592_v28  ;;  %3127 = vmatpush1.bf16.msra.mxu1 %v4596_v9  ;;  %v4610_v26 = vpack.c.bf16 %v471_v13, %v467_v35  ;;  %v1755_v3 = vand.u32 4294901760, %v352_v22 }
  0xa8   : > { %6618 = vst [vmem:[#allocation158_spill] sm:$0xff] %v4584_v53  ;;  %6619 = vst [vmem:[#allocation159_spill] sm:$0xff] %v4586_v24  ;;  %v287_v24 = vld [vmem:[#allocation7 + $0x1b0] sm:$0xff]  ;;  %v349_v53 = vld [vmem:[#allocation7 + $0x3a0] sm:$0xff]  ;;  %v4612_v17 = vsub.f32 %v286_v58, %v467_v35  ;;  %v4614_v4 = vsub.f32 %v288_v57, %v471_v13  ;;  %v1751_v49 = vand.u32 4294901760, %v350_v30  ;;  %3511 = vmatpush1.bf16.msra.mxu0 %v4602_v21  ;;  %v469_v44 = vand.u32 4294901760, %v285_v11 }
  0xa9   : > { %6620 = vst [vmem:[#allocation160_spill] sm:$0xff] %v4590_v16  ;;  %6621 = vst [vmem:[#allocation161_spill] sm:$0xff] %v4592_v28  ;;  %v4606_v16 = vsub.f32 %v347_v10, %v1749_v45  ;;  %v473_v10 = vand.u32 4294901760, %v287_v24  ;;  %v1753_v39 = vand.u32 4294901760, %v349_v53  ;;  %3129 = vmatprep.subr.bf16.mxu1 %v4610_v26  ;;  %v1757_v45 = vand.u32 4294901760, %v351_v47 }
  0xaa   : > { %6622 = vst [vmem:[#allocation162_spill] sm:$0xff] %v4594_v1  ;;  %6623 = vst [vmem:[#allocation163_spill] sm:$0xff] %v4596_v9  ;;  %v4618_v32 = vsub.f32 %v350_v30, %v1751_v49  ;;  %v475_v28 = vand.u32 4294901760, %v290_v34  ;;  %v479_v9 = vand.u32 4294901760, %v292_v62  ;;  %v4620_v35 = vpack.c.bf16 %v1755_v3, %v1751_v49  ;;  %v294_v49 = vld [vmem:[#allocation7 + $0x1e8] sm:$0xff]  ;;  %v296_v1 = vld [vmem:[#allocation7 + $0x1f8] sm:$0xff] }
  0xab   : > { %6624 = vst [vmem:[#allocation164_spill] sm:$0xff] %v4598_v31  ;;  %6625 = vst [vmem:[#allocation165_spill] sm:$0xff] %v4600_v40  ;;  %v4622_v57 = vsub.f32 %v352_v22, %v1755_v3  ;;  %v4624_v13 = vpack.c.bf16 %v473_v10, %v469_v44  ;;  %v4626_v58 = vsub.f32 %v285_v11, %v469_v44  ;;  %v355_v31 = vld [vmem:[#allocation7 + $0x3d0] sm:$0xff] }
  0xac   : > { %6626 = vst [vmem:[#allocation166_spill] sm:$0xff] %v4602_v21  ;;  %6627 = vst [vmem:[#allocation167_spill] sm:$0xff] %v4604_v56  ;;  %v356_v56 = vld [vmem:[#allocation7 + $0x3d8] sm:$0xff]  ;;  %v289_v21 = vld [vmem:[#allocation7 + $0x1c0] sm:$0xff]  ;;  %v4628_v40 = vsub.f32 %v287_v24, %v473_v10  ;;  %v4630_v30 = vpack.c.bf16 %v1757_v45, %v1753_v39  ;;  %3513 = vmatprep.subr.bf16.mxu0 %v4620_v35  ;;  %v4638_v22 = vpack.c.bf16 %v479_v9, %v475_v28 }
  0xad   : > { %6628 = vst [vmem:[#allocation168_spill] sm:$0xff] %v4606_v16  ;;  %6629 = vst [vmem:[#allocation169_spill] sm:$0xff] %v4610_v26  ;;  %v354_v16 = vld [vmem:[#allocation7 + $0x3c8] sm:$0xff]  ;;  %v4632_v26 = vsub.f32 %v349_v53, %v1753_v39  ;;  %3131 = vmatpush1.bf16.msra.mxu1 %v4624_v13  ;;  %v4640_v11 = vsub.f32 %v290_v34, %v475_v28  ;;  %v4642_v3 = vsub.f32 %v292_v62, %v479_v9  ;;  %v360_v28 = vld [vmem:[#allocation7 + $0x3f8] sm:$0xff] }
  0xae   : > { %6630 = vst [vmem:[#allocation170_spill] sm:$0xff] %v4612_v17  ;;  %6631 = vst [vmem:[#allocation171_spill] sm:$0xff] %v4614_v4  ;;  %v291_v4 = vld [vmem:[#allocation7 + $0x1d0] sm:$0xff]  ;;  %v353_v17 = vld [vmem:[#allocation7 + $0x3c0] sm:$0xff]  ;;  %v1759_v24 = vand.u32 4294901760, %v354_v16  ;;  %3515 = vmatpush1.bf16.msra.mxu0 %v4630_v30  ;;  %v1763_v53 = vand.u32 4294901760, %v356_v56  ;;  %3133 = vmatprep.subr.bf16.mxu1 %v4638_v22 }
  0xaf   : > { %6632 = vst [vmem:[#allocation172_spill] sm:$0xff] %v4618_v32  ;;  %6633 = vst [vmem:[#allocation173_spill] sm:$0xff] %v4620_v35  ;;  %v4634_v32 = vsub.f32 %v351_v47, %v1757_v45  ;;  %v477_v44 = vand.u32 4294901760, %v289_v21  ;;  %v481_v47 = vand.u32 4294901760, %v291_v4  ;;  %v1761_v10 = vand.u32 4294901760, %v353_v17  ;;  %v293_v62 = vld [vmem:[#allocation7 + $0x1e0] sm:$0xff] }
  0xb0   : > { %6634 = vst [vmem:[#allocation174_spill] sm:$0xff] %v4622_v57  ;;  %6635 = vst [vmem:[#allocation175_spill] sm:$0xff] %v4624_v13  ;;  %v4646_v39 = vsub.f32 %v354_v16, %v1759_v24  ;;  %v1765_v45 = vand.u32 4294901760, %v355_v31  ;;  %v483_v35 = vand.u32 4294901760, %v294_v49  ;;  %v487_v13 = vand.u32 4294901760, %v296_v1  ;;  %v359_v16 = vld [vmem:[#allocation7 + $0x3f0] sm:$0xff] }
  0xb1   : > { %6636 = vst [vmem:[#allocation176_spill] sm:$0xff] %v4626_v58  ;;  %6637 = vst [vmem:[#allocation177_spill] sm:$0xff] %v4628_v40  ;;  %v4648_v9 = vpack.c.bf16 %v1763_v53, %v1759_v24  ;;  %v4650_v34 = vsub.f32 %v356_v56, %v1763_v53  ;;  %v4661_v40 = vsub.f32 %v291_v4, %v481_v47  ;;  %v207_v53 = vld [vmem:[%s4237_s6] ss:$4 sm:$0x3] }
  0xb2   : > { %6638 = vst [vmem:[#allocation178_spill] sm:$0xff] %v4630_v30  ;;  %6639 = vst [vmem:[#allocation179_spill] sm:$0xff] %v4632_v26  ;;  %v4652_v30 = vpack.c.bf16 %v481_v47, %v477_v44  ;;  %v4663_v58 = vpack.c.bf16 %v1765_v45, %v1761_v10  ;;  %v4665_v24 = vsub.f32 %v353_v17, %v1761_v10  ;;  %v1771_v17 = vand.u32 4294901760, %v360_v28 }
  0xb3   : > { %6640 = vst [vmem:[#allocation180_spill] sm:$0xff] %v4634_v32  ;;  %6641 = vst [vmem:[#allocation181_spill] sm:$0xff] %v4638_v22  ;;  %v358_v32 = vld [vmem:[#allocation7 + $0x3e8] sm:$0xff]  ;;  %v357_v22 = vld [vmem:[#allocation7 + $0x3e0] sm:$0xff]  ;;  %v4667_v56 = vsub.f32 %v355_v31, %v1765_v45  ;;  %3517 = vmatprep.subr.bf16.mxu0 %v4648_v9  ;;  %v485_v47 = vand.u32 4294901760, %v293_v62 }
  0xb4   : > { %6642 = vst [vmem:[#allocation182_spill] sm:$0xff] %v4640_v11  ;;  %6643 = vst [vmem:[#allocation183_spill] sm:$0xff] %v4642_v3  ;;  %v4654_v3 = vsub.f32 %v289_v21, %v477_v44  ;;  %v295_v11 = vld [vmem:[#allocation7 + $0x1f0] sm:$0xff]  ;;  %3135 = vmatpush1.bf16.msra.mxu1 %v4652_v30  ;;  %v4673_v21 = vpack.c.bf16 %v487_v13, %v483_v35  ;;  %v4675_v44 = vsub.f32 %v294_v49, %v483_v35 }
  0xb5   : > { %6644 = vst [vmem:[#allocation184_spill] sm:$0xff] %v4646_v39  ;;  %6645 = vst [vmem:[#allocation185_spill] sm:$0xff] %v4648_v9  ;;  %v6649_v39 = vlaneseq  ;;  %v1767_v4 = vand.u32 4294901760, %v358_v32  ;;  %3519 = vmatpush1.bf16.msra.mxu0 %v4663_v58  ;;  %v489_v31 = vand.u32 4294901760, %v295_v11  ;;  %v1769_v10 = vand.u32 4294901760, %v357_v22 }
  0xb6   : > { %6646 = vst [vmem:[#allocation186_spill] sm:$0xff] %v4650_v34  ;;  %6647 = vst [vmem:[#allocation187_spill] sm:$0xff] %v4652_v30  ;;  %v3064_v34 = vld [vmem:[%s4237_s6 + $0x1] ss:$4 sm:$0x3]  ;;  %3137 = vmatprep.subr.bf16.mxu1 %v4673_v21  ;;  %v1773_v9 = vand.u32 4294901760, %v359_v16 }
  0xb7   : > { %6648 = vst [vmem:[#allocation188_spill] sm:$0xff] %v4654_v3  ;;  %vm4657_vm0 = vcmp.lt.s32.totalorder %v6649_v39, 256  ;;  %6652 = vst [vmem:[#allocation189_spill] sm:$0xff] %v4661_v40  ;;  %v4677_v39 = vsub.f32 %v296_v1, %v487_v13  ;;  %v4681_v45 = vsub.f32 %v358_v32, %v1767_v4  ;;  %v210_v30 = vmax.f32 %v207_v53, %v3064_v34 }
  0xb8   : > { %6653 = vst [vmem:[#allocation190_spill] sm:$0xff] %v4663_v58  ;;  %6654 = vst [vmem:[#allocation191_spill] sm:$0xff] %v4665_v24  ;;  %v6155_v35 = vand.u32 4294901760, %v4249_v18  ;;  %v4685_v49 = vpack.c.bf16 %v1771_v17, %v1767_v4  ;;  %v4687_v1 = vsub.f32 %v360_v28, %v1771_v17  ;;  %v4689_v13 = vpack.c.bf16 %v489_v31, %v485_v47 }
  0xb9   : > { %6655 = vst [vmem:[#allocation192_spill] sm:$0xff] %v4667_v56  ;;  %6656 = vst [vmem:[#allocation193_spill] sm:$0xff] %v4673_v21  ;;  %v3065_v56 = vld [vmem:[%s4237_s6 + $0x2] ss:$4 sm:$0x3]  ;;  %v4691_v58 = vsub.f32 %v293_v62, %v485_v47  ;;  %v4697_v21 = vsub.f32 %v357_v22, %v1769_v10  ;;  %v4699_v32 = vsub.f32 %v359_v16, %v1773_v9  ;;  %v6157_v62 = vand.u32 4294901760, %v4251_v19 }
  0xba   : > { %6657 = vst [vmem:[#allocation194_spill] sm:$0xff] %v4675_v44  ;;  %6658 = vst [vmem:[#allocation195_spill] sm:$0xff] %v4677_v39  ;;  %v4693_v39 = vsub.f32 %v295_v11, %v489_v31  ;;  %v4695_v44 = vpack.c.bf16 %v1773_v9, %v1769_v10  ;;  %3521 = vmatprep.subr.bf16.mxu0 %v4685_v49  ;;  %3139 = vmatpush1.bf16.msra.mxu1 %v4689_v13  ;;  %v6156_v22 = vand.u32 4294901760, %v4253_v20 }
  0xbb   : > { %6659 = vst [vmem:[#allocation196_spill] sm:$0xff] %v4681_v45  ;;  %6660 = vst [vmem:[#allocation197_spill] sm:$0xff] %v4685_v49  ;;  %v3066_v45 = vld [vmem:[%s4237_s6 + $0x3] ss:$4 sm:$0x3]  ;;  %v214_v4 = vmax.f32 %v210_v30, %v3065_v56  ;;  %v511_v28 = vsub.f32 %v4249_v18, %v6155_v35  ;;  %v211_v11 = vadd.f32 %v3064_v34, %v207_v53  ;;  %v6160_v9 = vand.u32 4294901760, %v4257_v25 }
  0xbc   : > { %6661 = vst [vmem:[#allocation198_spill] sm:$0xff] %v4687_v1  ;;  %6662 = vst [vmem:[#allocation199_spill] sm:$0xff] %v4689_v13  ;;  %3523 = vmatpush1.bf16.msra.mxu0 %v4695_v44  ;;  %v6172_v16 = vand.u32 4294901760, %v4261_v27  ;;  %v6165_v17 = vand.u32 4294901760, %v4264_v29  ;;  %v523_v30 = vsub.f32 %v4251_v19, %v6157_v62  ;;  %v1795_v34 = vsub.f32 %v4253_v20, %v6156_v22 }
  0xbd   : > { %6663 = vst [vmem:[#allocation200_spill] sm:$0xff] %v4691_v58  ;;  %6664 = vst [vmem:[#allocation201_spill] sm:$0xff] %v4693_v39  ;;  %v218_v47 = vmax.f32 %v214_v4, %v3066_v45  ;;  %v512_v31 = vand.u32 4294901760, %v511_v28  ;;  %v215_v10 = vadd.f32 %v3065_v56, %v211_v11  ;;  %v1807_v53 = vsub.f32 %v4257_v25, %v6160_v9 }
  0xbe   : > { %6665 = vst [vmem:[#allocation202_spill] sm:$0xff] %v4695_v44  ;;  %6666 = vst [vmem:[#allocation203_spill] sm:$0xff] %v4697_v21  ;;  %v517_v35 = vsub.f32 %v4261_v27, %v6172_v16  ;;  %v529_v4 = vsub.f32 %v4264_v29, %v6165_v17  ;;  %v524_v56 = vand.u32 4294901760, %v523_v30  ;;  %v6171_v11 = vand.u32 4294901760, %v4270_v41 }
  0xbf   : > { %6667 = vst [vmem:[#allocation204_spill] sm:$0xff] %v4699_v32  ;;  %224 = vst.msk [vmem:[#allocation2] ss:$8 sm:$0x3] %vm4657_vm0, %v218_v47  ;;  %v219_v28 = vadd.f32 %v3066_v45, %v215_v10  ;;  %v6169_v22 = vand.u32 4294901760, %v4272_v42  ;;  %v1796_v62 = vand.u32 4294901760, %v1795_v34 }
  0xc0   : > { %v1808_v44 = vand.u32 4294901760, %v1807_v53  ;;  %v518_v9 = vand.u32 4294901760, %v517_v35  ;;  %v530_v13 = vand.u32 4294901760, %v529_v4  ;;  %v3140_v49 = vpack.c.bf16 %v524_v56, %v512_v31 }
  0xc1   : > { %227 = vst.msk [vmem:[#allocation2 + $0x10] ss:$8 sm:$0x3] %vm4657_vm0, %v219_v28  ;;  %v1801_v17 = vsub.f32 %v4270_v41, %v6171_v11  ;;  %v1813_v45 = vsub.f32 %v4272_v42, %v6169_v22  ;;  %v6167_v47 = vand.u32 4294901760, %v4274_v43  ;;  %v6166_v35 = vand.u32 4294901760, %v4278_v48 }
  0xc2   : > { %v3524_v30 = vpack.c.bf16 %v1808_v44, %v1796_v62  ;;  %v4741_v10 = vpack.c.bf16 %v530_v13, %v518_v9  ;;  %v6168_v31 = vand.u32 4294901760, %v4282_v50  ;;  %3141 = vmatprep.subr.bf16.mxu1 %v3140_v49  ;;  %v6170_v4 = vand.u32 4294901760, %v4285_v52 }
  0xc3   : > { %v1802_v26 = vand.u32 4294901760, %v1801_v17  ;;  %v1814_v34 = vand.u32 4294901760, %v1813_v45  ;;  %v535_v53 = vsub.f32 %v4274_v43, %v6167_v47  ;;  %v547_v44 = vsub.f32 %v4278_v48, %v6166_v35 }
  0xc4   : > { %3525 = vmatprep.subr.bf16.mxu0 %v3524_v30  ;;  %v1819_v13 = vsub.f32 %v4282_v50, %v6168_v31  ;;  %v6175_v62 = vand.u32 4294901760, %v4287_v54  ;;  %v6178_v49 = vand.u32 4294901760, %v4293_v63  ;;  %v1831_v56 = vsub.f32 %v4285_v52, %v6170_v4 }
  0xc5   : > { %v4757_v9 = vpack.c.bf16 %v1814_v34, %v1802_v26  ;;  %v536_v17 = vand.u32 4294901760, %v535_v53  ;;  %v6185_v28 = vand.u32 4294901760, %v4295_v0  ;;  %v548_v35 = vand.u32 4294901760, %v547_v44 }
  0xc6   : > { %v230_v45 = vld [vmem:[#allocation2 + $0x8] sm:$0xff]  ;;  %v229_v30 = vld [vmem:[#allocation2] sm:$0xff]  ;;  %v1820_v47 = vand.u32 4294901760, %v1819_v13  ;;  %v541_v31 = vsub.f32 %v4287_v54, %v6175_v62  ;;  %v553_v26 = vsub.f32 %v4293_v63, %v6178_v49  ;;  %v1832_v22 = vand.u32 4294901760, %v1831_v56 }
  0xc7   : > { %v4769_v34 = vand.u32 4294901760, %v230_v45  ;;  %v4771_v53 = vand.u32 4294901760, %v229_v30  ;;  %v1825_v4 = vsub.f32 %v4295_v0, %v6185_v28  ;;  %v3144_v13 = vpack.c.bf16 %v548_v35, %v536_v17 }
  0xc8   : > { %v232_v11 = vld [vmem:[#allocation2 + $0x18] sm:$0xff]  ;;  %v231_v44 = vld [vmem:[#allocation2 + $0x10] sm:$0xff]  ;;  %v542_v16 = vand.u32 4294901760, %v541_v31  ;;  %v554_v52 = vand.u32 4294901760, %v553_v26  ;;  %v6188_v62 = vand.u32 4294901760, %v4299_v6  ;;  %v3528_v50 = vpack.c.bf16 %v1832_v22, %v1820_v47 }
  0xc9   : > { %6668 = vst [vmem:[#allocation205_spill] sm:$0xff] %v4769_v34  ;;  %6669 = vst [vmem:[#allocation206_spill] sm:$0xff] %v4771_v53  ;;  %v4778_v54 = vsub.f32 %v230_v45, %v4769_v34  ;;  %v4780_v49 = vand.u32 4294901760, %v232_v11  ;;  %v4783_v63 = vsub.f32 %v229_v30, %v4771_v53  ;;  %v4785_v56 = vand.u32 4294901760, %v231_v44 }
  0xca   : > { %v3146_v48 = vpack.c.bf16 %v554_v52, %v542_v16  ;;  %v1826_v28 = vand.u32 4294901760, %v1825_v4  ;;  %v1837_v35 = vsub.f32 %v4299_v6, %v6188_v62  ;;  %v6195_v0 = vand.u32 4294901760, %v4303_v8 }
  0xcb   : > { %6670 = vst [vmem:[#allocation207_spill] sm:$0xff] %v4778_v54  ;;  %6671 = vst [vmem:[#allocation208_spill] sm:$0xff] %v4780_v49  ;;  %v6189_v31 = vand.u32 4294901760, %v4778_v54  ;;  %v4792_v17 = vsub.f32 %v232_v11, %v4780_v49  ;;  %v6192_v45 = vand.u32 4294901760, %v4783_v63  ;;  %v4796_v26 = vsub.f32 %v231_v44, %v4785_v56 }
  0xcc   : > { %6672 = vst [vmem:[#allocation209_spill] sm:$0xff] %v4783_v63  ;;  %6673 = vst [vmem:[#allocation210_spill] sm:$0xff] %v4785_v56  ;;  %v1838_v30 = vand.u32 4294901760, %v1837_v35  ;;  %v6200_v52 = vand.u32 4294901760, %v4306_v12  ;;  %v6203_v22 = vand.u32 4294901760, %v4310_v14  ;;  %v559_v35 = vsub.f32 %v4303_v8, %v6195_v0 }
  0xcd   : > { %6674 = vst [vmem:[#allocation211_spill] sm:$0xff] %v4792_v17  ;;  %6675 = vst [vmem:[#allocation212_spill] sm:$0xff] %v4796_v26  ;;  %v494_v16 = vsub.f32 %v4778_v54, %v6189_v31  ;;  %v500_v11 = vsub.f32 %v4783_v63, %v6192_v45  ;;  %v6220_v4 = vand.u32 4294901760, %v4796_v26  ;;  %v6676_v54 = vand.u32 4294901760, %v4792_v17 }
  0xce   : > { %v3530_v44 = vpack.c.bf16 %v1838_v30, %v1826_v28  ;;  %v571_v62 = vsub.f32 %v4306_v12, %v6200_v52  ;;  %v1843_v31 = vsub.f32 %v4310_v14, %v6203_v22  ;;  %v560_v30 = vand.u32 4294901760, %v559_v35 }
  0xcf   : > { %v495_v47 = vand.u32 4294901760, %v494_v16  ;;  %v1778_v45 = vsub.f32 %v4792_v17, %v6676_v54  ;;  %v501_v63 = vand.u32 4294901760, %v500_v11  ;;  %v1784_v28 = vsub.f32 %v4796_v26, %v6220_v4 }
  0xd0   : > { %v572_v0 = vand.u32 4294901760, %v571_v62  ;;  %v1844_v56 = vand.u32 4294901760, %v1843_v31  ;;  %v6219_v8 = vand.u32 4294901760, %v4312_v15  ;;  %v6211_v22 = vand.u32 4294901760, %v4319_v36 }
  0xd1   : > { %496 = vmatprep.mubr.f32.mxu1 %v495_v47  ;;  %v1779_v52 = vand.u32 4294901760, %v1778_v45  ;;  %v1785_v12 = vand.u32 4294901760, %v1784_v28  ;;  %v6209_v16 = vand.u32 4294901760, %v4321_v37  ;;  %v6206_v11 = vand.u32 4294901760, %v4325_v46 }
  0xd2   : > { %502 = vmatmul.mubr.f32.vlgmr.msra.gmra.mrb[0].mxu1 %v501_v63  ;;  %v3148_v14 = vpack.c.bf16 %v572_v0, %v560_v30  ;;  %v1855_v54 = vsub.f32 %v4312_v15, %v6219_v8  ;;  %v6207_v62 = vand.u32 4294901760, %v4327_v51  ;;  %v565_v31 = vsub.f32 %v4319_v36, %v6211_v22  ;;  %v6679_v8 = vld [vmem:[#allocation68_spill] sm:$0xff] }
  0xd3   : > { %1780 = vmatprep.mubr.f32.mxu0 %v1779_v52  ;;  %3143 = vmatpush1.bf16.msra.mxu1 %v4741_v10  ;;  %v577_v63 = vsub.f32 %v4321_v37, %v6209_v16  ;;  %v6208_v0 = vand.u32 4294901760, %v4331_v55  ;;  %v6210_v45 = vand.u32 4294901760, %v4335_v59  ;;  %v1849_v52 = vsub.f32 %v4325_v46, %v6206_v11 }
  0xd4   : > { %1786 = vmatmul.mubr.f32.vlgmr.msra.gmra.mrb[0].mxu0 %v1785_v12  ;;  %3145 = vmatprep.subr.bf16.mxu1 %v3144_v13  ;;  %v1856_v47 = vand.u32 4294901760, %v1855_v54  ;;  %v1861_v10 = vsub.f32 %v4327_v51, %v6207_v62  ;;  %v6217_v35 = vand.u32 4294901760, %v4339_v61  ;;  %v566_v28 = vand.u32 4294901760, %v565_v31 }
  0xd5   : > { %3527 = vmatpush1.bf16.msra.mxu0 %v4757_v9  ;;  %v578_v30 = vand.u32 4294901760, %v577_v63  ;;  %v583_v12 = vsub.f32 %v4331_v55, %v6208_v0  ;;  %v595_v13 = vsub.f32 %v4335_v59, %v6210_v45  ;;  %893 = vmatprep.mubr.f32.mxu1 %v4769_v34  ;;  %v1850_v11 = vand.u32 4294901760, %v1849_v52 }
  0xd6   : > { %3529 = vmatprep.subr.bf16.mxu0 %v3528_v50  ;;  %v3532_v54 = vpack.c.bf16 %v1856_v47, %v1844_v56  ;;  %v1862_v62 = vand.u32 4294901760, %v1861_v10  ;;  %v1867_v9 = vsub.f32 %v4339_v61, %v6217_v35  ;;  %2177 = vmatprep.mubr.f32.mxu0 %v4780_v49  ;;  %v6216_v16 = vand.u32 4294901760, %v4342_v2  ;;  %v6680_v49 = vld [vmem:[#allocation69_spill] sm:$0xff] }
  0xd7   : > { %3147 = vmatpush1.bf16.msra.mxu1 %v3146_v48  ;;  %v3150_v31 = vpack.c.bf16 %v578_v30, %v566_v28  ;;  %v584_v63 = vand.u32 4294901760, %v583_v12  ;;  %v596_v0 = vand.u32 4294901760, %v595_v13  ;;  %v6215_v50 = vand.u32 4294901760, %v4345_v23  ;;  %v6677_v12 = vld [vmem:[#allocation64_spill] sm:$0xff] }
  0xd8   : > { %3149 = vmatprep.subr.bf16.mxu1 %v3148_v14  ;;  %v3534_v45 = vpack.c.bf16 %v1862_v62, %v1850_v11  ;;  %v1868_v22 = vand.u32 4294901760, %v1867_v9  ;;  %v6213_v56 = vand.u32 4294901760, %v4349_v38  ;;  %v1879_v52 = vsub.f32 %v4342_v2, %v6216_v16 }
  0xd9   : > { %3531 = vmatpush1.bf16.msra.mxu0 %v3530_v44  ;;  %v3152_v47 = vpack.c.bf16 %v596_v0, %v584_v63  ;;  %v6212_v48 = vand.u32 4294901760, %v4353_v33  ;;  %v6214_v10 = vand.u32 4294901760, %v4355_v60  ;;  %v589_v14 = vsub.f32 %v4345_v23, %v6215_v50 }
  0xda   : > { %3533 = vmatprep.subr.bf16.mxu0 %v3532_v54  ;;  %v601_v11 = vsub.f32 %v4349_v38, %v6213_v56  ;;  %v6218_v44 = vand.u32 4294901760, %v4359_v7  ;;  %v6223_v62 = vand.u32 4294901760, %v4361_v5  ;;  %v1880_v0 = vand.u32 4294901760, %v1879_v52 }
  0xdb   : > { %3151 = vmatpush1.bf16.msra.mxu1 %v3150_v31  ;;  %v1873_v28 = vsub.f32 %v4353_v33, %v6212_v48  ;;  %v1885_v30 = vsub.f32 %v4355_v60, %v6214_v10  ;;  %v6227_v13 = vand.u32 4294901760, %v6677_v12  ;;  %v590_v54 = vand.u32 4294901760, %v589_v14 }
  0xdc   : > { %3153 = vmatprep.subr.bf16.mxu1 %v3152_v47  ;;  %v602_v9 = vand.u32 4294901760, %v601_v11  ;;  %v607_v63 = vsub.f32 %v4359_v7, %v6218_v44  ;;  %v619_v31 = vsub.f32 %v4361_v5, %v6223_v62  ;;  %v3536_v52 = vpack.c.bf16 %v1880_v0, %v1868_v22  ;;  %v6678_v11 = vld [vmem:[#allocation66_spill] sm:$0xff]  ;;  %v6681_v0 = vld [vmem:[#allocation71_spill] sm:$0xff] }
  0xdd   : > { %3535 = vmatpush1.bf16.msra.mxu0 %v3534_v45  ;;  %v1874_v48 = vand.u32 4294901760, %v1873_v28  ;;  %v1886_v56 = vand.u32 4294901760, %v1885_v30  ;;  %v1891_v10 = vsub.f32 %v6677_v12, %v6227_v13  ;;  %v6225_v16 = vand.u32 4294901760, %v6678_v11  ;;  %v6682_v30 = vld [vmem:[#allocation72_spill] sm:$0xff] }
  0xde   : > { %v3154_v50 = vpack.c.bf16 %v602_v9, %v590_v54  ;;  %v608_v47 = vand.u32 4294901760, %v607_v63  ;;  %v620_v14 = vand.u32 4294901760, %v619_v31  ;;  %3537 = vmatprep.subr.bf16.mxu0 %v3536_v52  ;;  %v6224_v4 = vand.u32 4294901760, %v6679_v8  ;;  %v6684_v9 = vld [vmem:[#allocation75_spill] sm:$0xff] }
  0xdf   : > { %v3538_v35 = vpack.c.bf16 %v1886_v56, %v1874_v48  ;;  %v1892_v44 = vand.u32 4294901760, %v1891_v10  ;;  %v6226_v62 = vand.u32 4294901760, %v6680_v49  ;;  %v1903_v45 = vsub.f32 %v6678_v11, %v6225_v16  ;;  %v6683_v10 = vld [vmem:[#allocation74_spill] sm:$0xff] }
  0xe0   : > { %3155 = vmatpush1.bf16.msra.mxu1 %v3154_v50  ;;  %v3156_v22 = vpack.c.bf16 %v620_v14, %v608_v47  ;;  %v6230_v28 = vand.u32 4294901760, %v6681_v0  ;;  %v6231_v54 = vand.u32 4294901760, %v6682_v30  ;;  %v613_v56 = vsub.f32 %v6679_v8, %v6224_v4  ;;  %v6685_v47 = vld [vmem:[#allocation76_spill] sm:$0xff]  ;;  %v6688_v8 = vld [vmem:[#allocation81_spill] sm:$0xff] }
  0xe1   : > { %3539 = vmatpush1.bf16.msra.mxu0 %v3538_v35  ;;  %v625_v48 = vsub.f32 %v6680_v49, %v6226_v62  ;;  %v6237_v50 = vand.u32 4294901760, %v6683_v10  ;;  %v6245_v63 = vand.u32 4294901760, %v6684_v9  ;;  %v1904_v31 = vand.u32 4294901760, %v1903_v45 }
  0xe2   : > { %3157 = vmatprep.subr.bf16.mxu1 %v3156_v22  ;;  %v1897_v52 = vsub.f32 %v6681_v0, %v6230_v28  ;;  %v1909_v35 = vsub.f32 %v6682_v30, %v6231_v54  ;;  %v6243_v14 = vand.u32 4294901760, %v6685_v47  ;;  %v614_v4 = vand.u32 4294901760, %v613_v56  ;;  %v6686_v56 = vld [vmem:[#allocation78_spill] sm:$0xff] }
  0xe3   : > { %v626_v16 = vand.u32 4294901760, %v625_v48  ;;  %v631_v62 = vsub.f32 %v6683_v10, %v6237_v50  ;;  %v643_v22 = vsub.f32 %v6684_v9, %v6245_v63  ;;  %v3540_v45 = vpack.c.bf16 %v1904_v31, %v1892_v44  ;;  %v6687_v50 = vld [vmem:[#allocation80_spill] sm:$0xff] }
  0xe4   : > { %v1898_v13 = vand.u32 4294901760, %v1897_v52  ;;  %v1910_v34 = vand.u32 4294901760, %v1909_v35  ;;  %v1915_v28 = vsub.f32 %v6685_v47, %v6243_v14  ;;  %v6242_v48 = vand.u32 4294901760, %v6686_v56  ;;  %v6689_v52 = vld [vmem:[#allocation83_spill] sm:$0xff]  ;;  %v6696_v47 = vld [vmem:[#allocation93_spill] sm:$0xff] }
  0xe5   : > { %v3158_v54 = vpack.c.bf16 %v626_v16, %v614_v4  ;;  %v632_v26 = vand.u32 4294901760, %v631_v62  ;;  %v644_v30 = vand.u32 4294901760, %v643_v22  ;;  %3541 = vmatprep.subr.bf16.mxu0 %v3540_v45  ;;  %v6241_v10 = vand.u32 4294901760, %v6687_v50  ;;  %v6690_v4 = vld [vmem:[#allocation84_spill] sm:$0xff] }
  0xe6   : > { %v3542_v0 = vpack.c.bf16 %v1910_v34, %v1898_v13  ;;  %v1916_v49 = vand.u32 4294901760, %v1915_v28  ;;  %v6244_v11 = vand.u32 4294901760, %v6688_v8  ;;  %v1927_v31 = vsub.f32 %v6686_v56, %v6242_v48  ;;  %v6691_v13 = vld [vmem:[#allocation86_spill] sm:$0xff]  ;;  %v6693_v45 = vld [vmem:[#allocation88_spill] sm:$0xff] }
  0xe7   : > { %3159 = vmatpush1.bf16.msra.mxu1 %v3158_v54  ;;  %v3160_v44 = vpack.c.bf16 %v644_v30, %v632_v26  ;;  %v6247_v35 = vand.u32 4294901760, %v6689_v52  ;;  %v6248_v16 = vand.u32 4294901760, %v6690_v4  ;;  %v637_v34 = vsub.f32 %v6687_v50, %v6241_v10  ;;  %v6692_v26 = vld [vmem:[#allocation87_spill] sm:$0xff] }
  0xe8   : > { %3543 = vmatpush1.bf16.msra.mxu0 %v3542_v0  ;;  %v649_v62 = vsub.f32 %v6688_v8, %v6244_v11  ;;  %v6253_v28 = vand.u32 4294901760, %v6691_v13  ;;  %v6261_v30 = vand.u32 4294901760, %v6692_v26  ;;  %v1928_v54 = vand.u32 4294901760, %v1927_v31 }
  0xe9   : > { %3161 = vmatprep.subr.bf16.mxu1 %v3160_v44  ;;  %v1921_v22 = vsub.f32 %v6689_v52, %v6247_v35  ;;  %v1933_v0 = vsub.f32 %v6690_v4, %v6248_v16  ;;  %v6259_v10 = vand.u32 4294901760, %v6693_v45  ;;  %v638_v48 = vand.u32 4294901760, %v637_v34  ;;  %v6694_v34 = vld [vmem:[#allocation90_spill] sm:$0xff] }
  0xea   : > { %v650_v14 = vand.u32 4294901760, %v649_v62  ;;  %v655_v11 = vsub.f32 %v6691_v13, %v6253_v28  ;;  %v667_v44 = vsub.f32 %v6692_v26, %v6261_v30  ;;  %v3544_v31 = vpack.c.bf16 %v1928_v54, %v1916_v49  ;;  %v6695_v28 = vld [vmem:[#allocation92_spill] sm:$0xff] }
  0xeb   : > { %v1922_v63 = vand.u32 4294901760, %v1921_v22  ;;  %v1934_v8 = vand.u32 4294901760, %v1933_v0  ;;  %v1939_v35 = vsub.f32 %v6693_v45, %v6259_v10  ;;  %v6258_v62 = vand.u32 4294901760, %v6694_v34  ;;  %v6697_v22 = vld [vmem:[#allocation95_spill] sm:$0xff]  ;;  %v6704_v45 = vld [vmem:[#allocation105_spill] sm:$0xff] }
  0xec   : > { %v3162_v16 = vpack.c.bf16 %v650_v14, %v638_v48  ;;  %v656_v4 = vand.u32 4294901760, %v655_v11  ;;  %v668_v52 = vand.u32 4294901760, %v667_v44  ;;  %3545 = vmatprep.subr.bf16.mxu0 %v3544_v31  ;;  %v6257_v13 = vand.u32 4294901760, %v6695_v28  ;;  %v6698_v14 = vld [vmem:[#allocation96_spill] sm:$0xff]  ;;  %v6699_v48 = vld [vmem:[#allocation98_spill] sm:$0xff] }
  0xed   : > { %v3546_v50 = vpack.c.bf16 %v1934_v8, %v1922_v63  ;;  %v1940_v56 = vand.u32 4294901760, %v1939_v35  ;;  %v6260_v9 = vand.u32 4294901760, %v6696_v47  ;;  %v1951_v54 = vsub.f32 %v6694_v34, %v6258_v62  ;;  %v6701_v31 = vld [vmem:[#allocation100_spill] sm:$0xff] }
  0xee   : > { %3163 = vmatpush1.bf16.msra.mxu1 %v3162_v16  ;;  %v3164_v49 = vpack.c.bf16 %v668_v52, %v656_v4  ;;  %v6263_v0 = vand.u32 4294901760, %v6697_v22  ;;  %v6264_v11 = vand.u32 4294901760, %v6698_v14  ;;  %v661_v8 = vsub.f32 %v6695_v28, %v6257_v13  ;;  %v6700_v52 = vld [vmem:[#allocation99_spill] sm:$0xff] }
  0xef   : > { %3547 = vmatpush1.bf16.msra.mxu0 %v3546_v50  ;;  %v673_v63 = vsub.f32 %v6696_v47, %v6260_v9  ;;  %v6269_v35 = vand.u32 4294901760, %v6699_v48  ;;  %v6277_v4 = vand.u32 4294901760, %v6700_v52  ;;  %v1952_v16 = vand.u32 4294901760, %v1951_v54 }
  0xf0   : > { %3165 = vmatprep.subr.bf16.mxu1 %v3164_v49  ;;  %v1945_v44 = vsub.f32 %v6697_v22, %v6263_v0  ;;  %v1957_v50 = vsub.f32 %v6698_v14, %v6264_v11  ;;  %v6275_v13 = vand.u32 4294901760, %v6701_v31  ;;  %v662_v62 = vand.u32 4294901760, %v661_v8  ;;  %v6702_v8 = vld [vmem:[#allocation102_spill] sm:$0xff] }
  0xf1   : > { %v674_v10 = vand.u32 4294901760, %v673_v63  ;;  %v679_v9 = vsub.f32 %v6699_v48, %v6269_v35  ;;  %v691_v49 = vsub.f32 %v6700_v52, %v6277_v4  ;;  %v3548_v54 = vpack.c.bf16 %v1952_v16, %v1940_v56  ;;  %v6703_v35 = vld [vmem:[#allocation104_spill] sm:$0xff] }
  0xf2   : > { %v1946_v30 = vand.u32 4294901760, %v1945_v44  ;;  %v1958_v47 = vand.u32 4294901760, %v1957_v50  ;;  %v1963_v0 = vsub.f32 %v6701_v31, %v6275_v13  ;;  %v6274_v63 = vand.u32 4294901760, %v6702_v8  ;;  %v6705_v44 = vld [vmem:[#allocation107_spill] sm:$0xff]  ;;  %v6712_v31 = vld [vmem:[#allocation117_spill] sm:$0xff] }
  0xf3   : > { %v3166_v11 = vpack.c.bf16 %v674_v10, %v662_v62  ;;  %v680_v14 = vand.u32 4294901760, %v679_v9  ;;  %v692_v22 = vand.u32 4294901760, %v691_v49  ;;  %3549 = vmatprep.subr.bf16.mxu0 %v3548_v54  ;;  %v6273_v48 = vand.u32 4294901760, %v6703_v35  ;;  %v6706_v10 = vld [vmem:[#allocation108_spill] sm:$0xff]  ;;  %v6707_v62 = vld [vmem:[#allocation110_spill] sm:$0xff] }
  0xf4   : > { %v3550_v28 = vpack.c.bf16 %v1958_v47, %v1946_v30  ;;  %v1964_v34 = vand.u32 4294901760, %v1963_v0  ;;  %v6276_v26 = vand.u32 4294901760, %v6704_v45  ;;  %v1975_v16 = vsub.f32 %v6702_v8, %v6274_v63  ;;  %v6709_v54 = vld [vmem:[#allocation112_spill] sm:$0xff] }
  0xf5   : > { %3167 = vmatpush1.bf16.msra.mxu1 %v3166_v11  ;;  %v3168_v56 = vpack.c.bf16 %v692_v22, %v680_v14  ;;  %v6279_v50 = vand.u32 4294901760, %v6705_v44  ;;  %v6280_v9 = vand.u32 4294901760, %v6706_v10  ;;  %v685_v47 = vsub.f32 %v6703_v35, %v6273_v48  ;;  %v6708_v22 = vld [vmem:[#allocation111_spill] sm:$0xff] }
  0xf6   : > { %3551 = vmatpush1.bf16.msra.mxu0 %v3550_v28  ;;  %v697_v30 = vsub.f32 %v6704_v45, %v6276_v26  ;;  %v6285_v0 = vand.u32 4294901760, %v6707_v62  ;;  %v6293_v14 = vand.u32 4294901760, %v6708_v22  ;;  %v1976_v11 = vand.u32 4294901760, %v1975_v16 }
  0xf7   : > { %3169 = vmatprep.subr.bf16.mxu1 %v3168_v56  ;;  %v1969_v49 = vsub.f32 %v6705_v44, %v6279_v50  ;;  %v1981_v28 = vsub.f32 %v6706_v10, %v6280_v9  ;;  %v6291_v48 = vand.u32 4294901760, %v6709_v54  ;;  %v686_v63 = vand.u32 4294901760, %v685_v47  ;;  %v6710_v47 = vld [vmem:[#allocation114_spill] sm:$0xff] }
  0xf8   : > { %v698_v13 = vand.u32 4294901760, %v697_v30  ;;  %v703_v26 = vsub.f32 %v6707_v62, %v6285_v0  ;;  %v715_v56 = vsub.f32 %v6708_v22, %v6293_v14  ;;  %v3552_v16 = vpack.c.bf16 %v1976_v11, %v1964_v34  ;;  %v6711_v0 = vld [vmem:[#allocation116_spill] sm:$0xff] }
  0xf9   : > { %v1970_v4 = vand.u32 4294901760, %v1969_v49  ;;  %v1982_v45 = vand.u32 4294901760, %v1981_v28  ;;  %v1987_v50 = vsub.f32 %v6709_v54, %v6291_v48  ;;  %v6290_v30 = vand.u32 4294901760, %v6710_v47  ;;  %v6713_v49 = vld [vmem:[#allocation119_spill] sm:$0xff] }
  0xfa   : > { %v3170_v9 = vpack.c.bf16 %v698_v13, %v686_v63  ;;  %v704_v10 = vand.u32 4294901760, %v703_v26  ;;  %v716_v44 = vand.u32 4294901760, %v715_v56  ;;  %3553 = vmatprep.subr.bf16.mxu0 %v3552_v16  ;;  %v6289_v62 = vand.u32 4294901760, %v6711_v0  ;;  %v6714_v13 = vld [vmem:[#allocation120_spill] sm:$0xff]  ;;  %v6715_v63 = vld [vmem:[#allocation122_spill] sm:$0xff] }
  0xfb   : > { %v3554_v35 = vpack.c.bf16 %v1982_v45, %v1970_v4  ;;  %v1988_v8 = vand.u32 4294901760, %v1987_v50  ;;  %v6292_v52 = vand.u32 4294901760, %v6712_v31  ;;  %v1999_v11 = vsub.f32 %v6710_v47, %v6290_v30  ;;  %v6717_v16 = vld [vmem:[#allocation124_spill] sm:$0xff] }
  0xfc   : > { %3171 = vmatpush1.bf16.msra.mxu1 %v3170_v9  ;;  %v3172_v34 = vpack.c.bf16 %v716_v44, %v704_v10  ;;  %v6295_v28 = vand.u32 4294901760, %v6713_v49  ;;  %v6296_v26 = vand.u32 4294901760, %v6714_v13  ;;  %v709_v45 = vsub.f32 %v6711_v0, %v6289_v62  ;;  %v6716_v44 = vld [vmem:[#allocation123_spill] sm:$0xff] }
  0xfd   : > { %3555 = vmatpush1.bf16.msra.mxu0 %v3554_v35  ;;  %v721_v4 = vsub.f32 %v6712_v31, %v6292_v52  ;;  %v6302_v50 = vand.u32 4294901760, %v6715_v63  ;;  %v6310_v10 = vand.u32 4294901760, %v6716_v44  ;;  %v2000_v9 = vand.u32 4294901760, %v1999_v11 }
  0xfe   : > { %3173 = vmatprep.subr.bf16.mxu1 %v3172_v34  ;;  %v1993_v56 = vsub.f32 %v6713_v49, %v6295_v28  ;;  %v2005_v35 = vsub.f32 %v6714_v13, %v6296_v26  ;;  %v6308_v62 = vand.u32 4294901760, %v6717_v16  ;;  %v710_v30 = vand.u32 4294901760, %v709_v45  ;;  %v6718_v45 = vld [vmem:[#allocation126_spill] sm:$0xff]  ;;  %v6720_v13 = vld [vmem:[#allocation129_spill] sm:$0xff] }
  0xff   : > { %v722_v48 = vand.u32 4294901760, %v721_v4  ;;  %v727_v52 = vsub.f32 %v6715_v63, %v6302_v50  ;;  %v739_v34 = vsub.f32 %v6716_v44, %v6310_v10  ;;  %v3556_v11 = vpack.c.bf16 %v2000_v9, %v1988_v8  ;;  %v6719_v50 = vld [vmem:[#allocation128_spill] sm:$0xff] }
 0x100   : > { %v1994_v14 = vand.u32 4294901760, %v1993_v56  ;;  %v2006_v47 = vand.u32 4294901760, %v2005_v35  ;;  %v2011_v28 = vsub.f32 %v6717_v16, %v6308_v62  ;;  %v6307_v4 = vand.u32 4294901760, %v6718_v45  ;;  %v6721_v56 = vld [vmem:[#allocation131_spill] sm:$0xff]  ;;  %v6728_v16 = vld [vmem:[#allocation141_spill] sm:$0xff] }
 0x101   : > { %v3174_v26 = vpack.c.bf16 %v722_v48, %v710_v30  ;;  %v728_v54 = vand.u32 4294901760, %v727_v52  ;;  %v740_v22 = vand.u32 4294901760, %v739_v34  ;;  %3557 = vmatprep.subr.bf16.mxu0 %v3556_v11  ;;  %v6306_v63 = vand.u32 4294901760, %v6719_v50  ;;  %v6722_v48 = vld [vmem:[#allocation132_spill] sm:$0xff]  ;;  %v6723_v30 = vld [vmem:[#allocation134_spill] sm:$0xff] }
 0x102   : > { %v3558_v12 = vpack.c.bf16 %v2006_v47, %v1994_v14  ;;  %v2012_v17 = vand.u32 4294901760, %v2011_v28  ;;  %v6309_v49 = vand.u32 4294901760, %v6720_v13  ;;  %v2023_v9 = vsub.f32 %v6718_v45, %v6307_v4  ;;  %v6725_v11 = vld [vmem:[#allocation136_spill] sm:$0xff] }
 0x103   : > { %3175 = vmatpush1.bf16.msra.mxu1 %v3174_v26  ;;  %v3176_v8 = vpack.c.bf16 %v740_v22, %v728_v54  ;;  %v6312_v35 = vand.u32 4294901760, %v6721_v56  ;;  %v6313_v52 = vand.u32 4294901760, %v6722_v48  ;;  %v733_v14 = vsub.f32 %v6719_v50, %v6306_v63  ;;  %v6724_v22 = vld [vmem:[#allocation135_spill] sm:$0xff] }
 0x104   : > { %3559 = vmatpush1.bf16.msra.mxu0 %v3558_v12  ;;  %v745_v47 = vsub.f32 %v6720_v13, %v6309_v49  ;;  %v6318_v28 = vand.u32 4294901760, %v6723_v30  ;;  %v6326_v54 = vand.u32 4294901760, %v6724_v22  ;;  %v2024_v26 = vand.u32 4294901760, %v2023_v9 }
 0x105   : > { %3177 = vmatprep.subr.bf16.mxu1 %v3176_v8  ;;  %v2017_v34 = vsub.f32 %v6721_v56, %v6312_v35  ;;  %v2029_v12 = vsub.f32 %v6722_v48, %v6313_v52  ;;  %v6324_v63 = vand.u32 4294901760, %v6725_v11  ;;  %v734_v4 = vand.u32 4294901760, %v733_v14  ;;  %v6726_v14 = vld [vmem:[#allocation138_spill] sm:$0xff] }
 0x106   : > { %v746_v62 = vand.u32 4294901760, %v745_v47  ;;  %v751_v49 = vsub.f32 %v6723_v30, %v6318_v28  ;;  %v763_v8 = vsub.f32 %v6724_v22, %v6326_v54  ;;  %v3560_v9 = vpack.c.bf16 %v2024_v26, %v2012_v17  ;;  %v6727_v28 = vld [vmem:[#allocation140_spill] sm:$0xff] }
 0x107   : > { %v2018_v10 = vand.u32 4294901760, %v2017_v34  ;;  %v2030_v13 = vand.u32 4294901760, %v2029_v12  ;;  %v2035_v35 = vsub.f32 %v6725_v11, %v6324_v63  ;;  %v6323_v47 = vand.u32 4294901760, %v6726_v14  ;;  %v6729_v34 = vld [vmem:[#allocation143_spill] sm:$0xff]  ;;  %v6736_v11 = vld [vmem:[#allocation153_spill] sm:$0xff] }
 0x108   : > { %v3178_v52 = vpack.c.bf16 %v746_v62, %v734_v4  ;;  %v752_v48 = vand.u32 4294901760, %v751_v49  ;;  %v764_v56 = vand.u32 4294901760, %v763_v8  ;;  %3561 = vmatprep.subr.bf16.mxu0 %v3560_v9  ;;  %v6322_v30 = vand.u32 4294901760, %v6727_v28  ;;  %v6730_v62 = vld [vmem:[#allocation144_spill] sm:$0xff]  ;;  %v6731_v4 = vld [vmem:[#allocation146_spill] sm:$0xff] }
 0x109   : > { %v3562_v50 = vpack.c.bf16 %v2030_v13, %v2018_v10  ;;  %v2036_v45 = vand.u32 4294901760, %v2035_v35  ;;  %v6325_v44 = vand.u32 4294901760, %v6728_v16  ;;  %v2047_v26 = vsub.f32 %v6726_v14, %v6323_v47  ;;  %v6733_v9 = vld [vmem:[#allocation148_spill] sm:$0xff] }
 0x10a   : > { %3179 = vmatpush1.bf16.msra.mxu1 %v3178_v52  ;;  %v3180_v17 = vpack.c.bf16 %v764_v56, %v752_v48  ;;  %v6328_v12 = vand.u32 4294901760, %v6729_v34  ;;  %v6329_v49 = vand.u32 4294901760, %v6730_v62  ;;  %v757_v13 = vsub.f32 %v6727_v28, %v6322_v30  ;;  %v6732_v56 = vld [vmem:[#allocation147_spill] sm:$0xff] }
 0x10b   : > { %3563 = vmatpush1.bf16.msra.mxu0 %v3562_v50  ;;  %v769_v10 = vsub.f32 %v6728_v16, %v6325_v44  ;;  %v6334_v35 = vand.u32 4294901760, %v6731_v4  ;;  %v6342_v48 = vand.u32 4294901760, %v6732_v56  ;;  %v2048_v52 = vand.u32 4294901760, %v2047_v26 }
 0x10c   : > { %3181 = vmatprep.subr.bf16.mxu1 %v3180_v17  ;;  %v2041_v8 = vsub.f32 %v6729_v34, %v6328_v12  ;;  %v2053_v50 = vsub.f32 %v6730_v62, %v6329_v49  ;;  %v6340_v30 = vand.u32 4294901760, %v6733_v9  ;;  %v758_v47 = vand.u32 4294901760, %v757_v13  ;;  %v6734_v13 = vld [vmem:[#allocation150_spill] sm:$0xff] }
 0x10d   : > { %v770_v63 = vand.u32 4294901760, %v769_v10  ;;  %v775_v44 = vsub.f32 %v6731_v4, %v6334_v35  ;;  %v787_v17 = vsub.f32 %v6732_v56, %v6342_v48  ;;  %v3564_v26 = vpack.c.bf16 %v2048_v52, %v2036_v45  ;;  %v6735_v35 = vld [vmem:[#allocation152_spill] sm:$0xff] }
 0x10e   : > { %v2042_v54 = vand.u32 4294901760, %v2041_v8  ;;  %v2054_v16 = vand.u32 4294901760, %v2053_v50  ;;  %v2059_v12 = vsub.f32 %v6733_v9, %v6340_v30  ;;  %v6339_v10 = vand.u32 4294901760, %v6734_v13  ;;  %v6737_v8 = vld [vmem:[#allocation155_spill] sm:$0xff]  ;;  %v6744_v9 = vld [vmem:[#allocation165_spill] sm:$0xff] }
 0x10f   : > { %v3182_v49 = vpack.c.bf16 %v770_v63, %v758_v47  ;;  %v776_v62 = vand.u32 4294901760, %v775_v44  ;;  %v788_v34 = vand.u32 4294901760, %v787_v17  ;;  %3565 = vmatprep.subr.bf16.mxu0 %v3564_v26  ;;  %v6338_v4 = vand.u32 4294901760, %v6735_v35  ;;  %v6738_v63 = vld [vmem:[#allocation156_spill] sm:$0xff]  ;;  %v6739_v47 = vld [vmem:[#allocation158_spill] sm:$0xff] }
 0x110   : > { %v3566_v28 = vpack.c.bf16 %v2054_v16, %v2042_v54  ;;  %v2060_v14 = vand.u32 4294901760, %v2059_v12  ;;  %v6341_v22 = vand.u32 4294901760, %v6736_v11  ;;  %v2071_v52 = vsub.f32 %v6734_v13, %v6339_v10  ;;  %v6741_v26 = vld [vmem:[#allocation160_spill] sm:$0xff] }
 0x111   : > { %3183 = vmatpush1.bf16.msra.mxu1 %v3182_v49  ;;  %v3184_v45 = vpack.c.bf16 %v788_v34, %v776_v62  ;;  %v6344_v50 = vand.u32 4294901760, %v6737_v8  ;;  %v6345_v44 = vand.u32 4294901760, %v6738_v63  ;;  %v781_v16 = vsub.f32 %v6735_v35, %v6338_v4  ;;  %v6740_v34 = vld [vmem:[#allocation159_spill] sm:$0xff] }
 0x112   : > { %3567 = vmatpush1.bf16.msra.mxu0 %v3566_v28  ;;  %v793_v54 = vsub.f32 %v6736_v11, %v6341_v22  ;;  %v6350_v12 = vand.u32 4294901760, %v6739_v47  ;;  %v6358_v62 = vand.u32 4294901760, %v6740_v34  ;;  %v2072_v49 = vand.u32 4294901760, %v2071_v52 }
 0x113   : > { %3185 = vmatprep.subr.bf16.mxu1 %v3184_v45  ;;  %v2065_v17 = vsub.f32 %v6737_v8, %v6344_v50  ;;  %v2077_v28 = vsub.f32 %v6738_v63, %v6345_v44  ;;  %v6356_v4 = vand.u32 4294901760, %v6741_v26  ;;  %v782_v10 = vand.u32 4294901760, %v781_v16  ;;  %v6742_v16 = vld [vmem:[#allocation162_spill] sm:$0xff] }
 0x114   : > { %v794_v30 = vand.u32 4294901760, %v793_v54  ;;  %v799_v22 = vsub.f32 %v6739_v47, %v6350_v12  ;;  %v811_v45 = vsub.f32 %v6740_v34, %v6358_v62  ;;  %v3568_v52 = vpack.c.bf16 %v2072_v49, %v2060_v14  ;;  %v6743_v12 = vld [vmem:[#allocation164_spill] sm:$0xff]  ;;  %v6812_v34 = vld [vmem:[#allocation211_spill] sm:$0xff] }
 0x115   : > { %v2066_v48 = vand.u32 4294901760, %v2065_v17  ;;  %v2078_v11 = vand.u32 4294901760, %v2077_v28  ;;  %v2083_v50 = vsub.f32 %v6741_v26, %v6356_v4  ;;  %v6355_v54 = vand.u32 4294901760, %v6742_v16  ;;  %v6745_v17 = vld [vmem:[#allocation167_spill] sm:$0xff] }
 0x116   : > { %v3186_v44 = vpack.c.bf16 %v794_v30, %v782_v10  ;;  %v800_v63 = vand.u32 4294901760, %v799_v22  ;;  %v812_v8 = vand.u32 4294901760, %v811_v45  ;;  %3569 = vmatprep.subr.bf16.mxu0 %v3568_v52  ;;  %v6354_v47 = vand.u32 4294901760, %v6743_v12  ;;  %v6746_v30 = vld [vmem:[#allocation168_spill] sm:$0xff]  ;;  %v6747_v10 = vld [vmem:[#allocation170_spill] sm:$0xff] }
 0x117   : > { %v3570_v35 = vpack.c.bf16 %v2078_v11, %v2066_v48  ;;  %v2084_v13 = vand.u32 4294901760, %v2083_v50  ;;  %v6357_v56 = vand.u32 4294901760, %v6744_v9  ;;  %v2095_v49 = vsub.f32 %v6742_v16, %v6355_v54  ;;  %v6749_v52 = vld [vmem:[#allocation172_spill] sm:$0xff]  ;;  %v6751_v16 = vld [vmem:[#allocation177_spill] sm:$0xff] }
 0x118   : > { %3187 = vmatpush1.bf16.msra.mxu1 %v3186_v44  ;;  %v3188_v14 = vpack.c.bf16 %v812_v8, %v800_v63  ;;  %v6360_v28 = vand.u32 4294901760, %v6745_v17  ;;  %v6361_v22 = vand.u32 4294901760, %v6746_v30  ;;  %v805_v11 = vsub.f32 %v6743_v12, %v6354_v47  ;;  %v6748_v8 = vld [vmem:[#allocation171_spill] sm:$0xff] }
 0x119   : > { %3571 = vmatpush1.bf16.msra.mxu0 %v3570_v35  ;;  %v817_v48 = vsub.f32 %v6744_v9, %v6357_v56  ;;  %v6365_v50 = vand.u32 4294901760, %v6747_v10  ;;  %v6373_v63 = vand.u32 4294901760, %v6748_v8  ;;  %v2096_v44 = vand.u32 4294901760, %v2095_v49 }
 0x11a   : > { %3189 = vmatprep.subr.bf16.mxu1 %v3188_v14  ;;  %v2089_v45 = vsub.f32 %v6745_v17, %v6360_v28  ;;  %v2101_v35 = vsub.f32 %v6746_v30, %v6361_v22  ;;  %v6371_v47 = vand.u32 4294901760, %v6749_v52  ;;  %v806_v54 = vand.u32 4294901760, %v805_v11 }
 0x11b   : > { %v818_v4 = vand.u32 4294901760, %v817_v48  ;;  %v823_v56 = vsub.f32 %v6747_v10, %v6365_v50  ;;  %v835_v14 = vsub.f32 %v6748_v8, %v6373_v63  ;;  %v3572_v49 = vpack.c.bf16 %v2096_v44, %v2084_v13  ;;  %v6750_v50 = vld [vmem:[#allocation176_spill] sm:$0xff]  ;;  %v6815_v8 = vld [vmem:[#allocation191_spill] sm:$0xff] }
 0x11c   : > { %v2090_v62 = vand.u32 4294901760, %v2089_v45  ;;  %v2102_v9 = vand.u32 4294901760, %v2101_v35  ;;  %v2107_v28 = vsub.f32 %v6749_v52, %v6371_v47  ;;  %v6370_v11 = vand.u32 4294901760, %v4622_v57  ;;  %v6752_v45 = vld [vmem:[#allocation179_spill] sm:$0xff]  ;;  %v6820_v52 = vld [vmem:[#allocation68_spill] sm:$0xff] }
 0x11d   : > { %v3190_v22 = vpack.c.bf16 %v818_v4, %v806_v54  ;;  %v824_v30 = vand.u32 4294901760, %v823_v56  ;;  %v836_v17 = vand.u32 4294901760, %v835_v14  ;;  %3573 = vmatprep.subr.bf16.mxu0 %v3572_v49  ;;  %v6369_v10 = vand.u32 4294901760, %v6750_v50  ;;  %v6753_v4 = vld [vmem:[#allocation180_spill] sm:$0xff]  ;;  %v6754_v54 = vld [vmem:[#allocation182_spill] sm:$0xff] }
 0x11e   : > { %v3574_v48 = vpack.c.bf16 %v2102_v9, %v2090_v62  ;;  %v2108_v12 = vand.u32 4294901760, %v2107_v28  ;;  %v6372_v26 = vand.u32 4294901760, %v6751_v16  ;;  %v2119_v44 = vsub.f32 %v4622_v57, %v6370_v11 }
 0x11f   : > { %3191 = vmatpush1.bf16.msra.mxu1 %v3190_v22  ;;  %v3192_v13 = vpack.c.bf16 %v836_v17, %v824_v30  ;;  %v6375_v35 = vand.u32 4294901760, %v6752_v45  ;;  %v6376_v56 = vand.u32 4294901760, %v6753_v4  ;;  %v829_v9 = vsub.f32 %v6750_v50, %v6369_v10  ;;  %v6755_v17 = vld [vmem:[#allocation183_spill] sm:$0xff] }
 0x120   : > { %3575 = vmatpush1.bf16.msra.mxu0 %v3574_v48  ;;  %v841_v62 = vsub.f32 %v6751_v16, %v6372_v26  ;;  %v6382_v28 = vand.u32 4294901760, %v6754_v54  ;;  %v6388_v30 = vand.u32 4294901760, %v6755_v17  ;;  %v2120_v22 = vand.u32 4294901760, %v2119_v44  ;;  %v6756_v48 = vld [vmem:[#allocation184_spill] sm:$0xff] }
 0x121   : > { %3193 = vmatprep.subr.bf16.mxu1 %v3192_v13  ;;  %v2113_v14 = vsub.f32 %v6752_v45, %v6375_v35  ;;  %v2125_v49 = vsub.f32 %v6753_v4, %v6376_v56  ;;  %v6387_v10 = vand.u32 4294901760, %v6756_v48  ;;  %v830_v11 = vand.u32 4294901760, %v829_v9  ;;  %v6757_v9 = vld [vmem:[#allocation186_spill] sm:$0xff] }
 0x122   : > { %v842_v47 = vand.u32 4294901760, %v841_v62  ;;  %v847_v26 = vsub.f32 %v6754_v54, %v6382_v28  ;;  %v859_v13 = vsub.f32 %v6755_v17, %v6388_v30  ;;  %v3576_v44 = vpack.c.bf16 %v2120_v22, %v2108_v12 }
 0x123   : > { %v2114_v63 = vand.u32 4294901760, %v2113_v14  ;;  %v2126_v16 = vand.u32 4294901760, %v2125_v49  ;;  %v2131_v35 = vsub.f32 %v6756_v48, %v6387_v10  ;;  %v6385_v62 = vand.u32 4294901760, %v6757_v9 }
 0x124   : > { %v3194_v56 = vpack.c.bf16 %v842_v47, %v830_v11  ;;  %v848_v4 = vand.u32 4294901760, %v847_v26  ;;  %v860_v45 = vand.u32 4294901760, %v859_v13  ;;  %3577 = vmatprep.subr.bf16.mxu0 %v3576_v44  ;;  %v6384_v28 = vand.u32 4294901760, %v4654_v3  ;;  %v6758_v47 = vld [vmem:[#allocation192_spill] sm:$0xff]  ;;  %v6759_v11 = vld [vmem:[#allocation194_spill] sm:$0xff] }
 0x125   : > { %v3578_v50 = vpack.c.bf16 %v2126_v16, %v2114_v63  ;;  %v2132_v57 = vand.u32 4294901760, %v2131_v35  ;;  %v6386_v54 = vand.u32 4294901760, %v4661_v40  ;;  %v2143_v22 = vsub.f32 %v6757_v9, %v6385_v62  ;;  %v6761_v13 = vld [vmem:[#allocation196_spill] sm:$0xff] }
 0x126   : > { %3195 = vmatpush1.bf16.msra.mxu1 %v3194_v56  ;;  %v3196_v12 = vpack.c.bf16 %v860_v45, %v848_v4  ;;  %v6389_v14 = vand.u32 4294901760, %v4665_v24  ;;  %v6390_v26 = vand.u32 4294901760, %v6758_v47  ;;  %v853_v16 = vsub.f32 %v4654_v3, %v6384_v28  ;;  %v6760_v45 = vld [vmem:[#allocation195_spill] sm:$0xff] }
 0x127   : > { %3579 = vmatpush1.bf16.msra.mxu0 %v3578_v50  ;;  %v865_v63 = vsub.f32 %v4661_v40, %v6386_v54  ;;  %v6396_v35 = vand.u32 4294901760, %v6759_v11  ;;  %v6404_v4 = vand.u32 4294901760, %v6760_v45  ;;  %v2144_v56 = vand.u32 4294901760, %v2143_v22 }
 0x128   : > { %3197 = vmatprep.subr.bf16.mxu1 %v3196_v12  ;;  %v2137_v49 = vsub.f32 %v4665_v24, %v6389_v14  ;;  %v2149_v50 = vsub.f32 %v6758_v47, %v6390_v26  ;;  %v6403_v44 = vand.u32 4294901760, %v6761_v13  ;;  %v854_v28 = vand.u32 4294901760, %v853_v16 }
 0x129   : > { %v866_v62 = vand.u32 4294901760, %v865_v63  ;;  %v871_v54 = vsub.f32 %v6759_v11, %v6396_v35  ;;  %v883_v12 = vsub.f32 %v6760_v45, %v6404_v4  ;;  %v3580_v22 = vpack.c.bf16 %v2144_v56, %v2132_v57 }
 0x12a   : > { %v2138_v10 = vand.u32 4294901760, %v2137_v49  ;;  %v2150_v30 = vand.u32 4294901760, %v2149_v50  ;;  %v2155_v14 = vsub.f32 %v6761_v13, %v6403_v44  ;;  %v6402_v16 = vand.u32 4294901760, %v4687_v1  ;;  %v6825_v13 = vld [vmem:[#allocation75_spill] sm:$0xff] }
 0x12b   : > { %v3198_v26 = vpack.c.bf16 %v866_v62, %v854_v28  ;;  %v872_v47 = vand.u32 4294901760, %v871_v54  ;;  %v884_v24 = vand.u32 4294901760, %v883_v12  ;;  %3581 = vmatprep.subr.bf16.mxu0 %v3580_v22  ;;  %v6401_v35 = vand.u32 4294901760, %v4691_v58 }
 0x12c   : > { %v3582_v63 = vpack.c.bf16 %v2150_v30, %v2138_v10  ;;  %v2156_v40 = vand.u32 4294901760, %v2155_v14  ;;  %v6400_v11 = vand.u32 4294901760, %v4693_v39  ;;  %v2167_v56 = vsub.f32 %v4687_v1, %v6402_v16 }
 0x12d   : > { %3199 = vmatpush1.bf16.msra.mxu1 %v3198_v26  ;;  %v3200_v57 = vpack.c.bf16 %v884_v24, %v872_v47  ;;  %v6398_v49 = vand.u32 4294901760, %v4697_v21  ;;  %v6399_v54 = vand.u32 4294901760, %v4699_v32  ;;  %v877_v10 = vsub.f32 %v4691_v58, %v6401_v35  ;;  %v6771_v35 = vld [vmem:[#allocation210_spill] sm:$0xff] }
 0x12e   : > { %3583 = vmatpush1.bf16.msra.mxu0 %v3582_v63  ;;  %v889_v28 = vsub.f32 %v4693_v39, %v6400_v11  ;;  %v2168_v30 = vand.u32 4294901760, %v2167_v56  ;;  %v3204_v22 = vpack.c.bf16 %v4251_v19, %v4249_v18  ;;  %v3598_v16 = vpack.c.bf16 %v4327_v51, %v4325_v46  ;;  %v6772_v46 = vld [vmem:[#allocation119_spill] sm:$0xff]  ;;  %v6785_v51 = vld [vmem:[#allocation136_spill] sm:$0xff] }
 0x12f   : > { %3201 = vmatprep.subr.bf16.mxu1 %v3200_v57  ;;  %v2161_v24 = vsub.f32 %v4697_v21, %v6398_v49  ;;  %v2173_v62 = vsub.f32 %v4699_v32, %v6399_v54  ;;  %v878_v14 = vand.u32 4294901760, %v877_v10  ;;  %v3588_v57 = vpack.c.bf16 %v4257_v25, %v4253_v20  ;;  %v6762_v10 = vld [vmem:[#allocation27_spill] sm:$0xff]  ;;  %v6770_v54 = vld [vmem:[#allocation41_spill] sm:$0xff]  ;;  %v6800_v25 = vld [vmem:[#allocation160_spill] sm:$0xff] }
 0x130   : > { %v890_v47 = vand.u32 4294901760, %v889_v28  ;;  %v3584_v26 = vpack.c.bf16 %v2168_v30, %v2156_v40  ;;  %v3206_v49 = vpack.c.bf16 %v4264_v29, %v4261_v27  ;;  %v3590_v40 = vpack.c.bf16 %v4272_v42, %v4270_v41  ;;  %v6763_v30 = vld [vmem:[#allocation29_spill] sm:$0xff]  ;;  %v6802_v19 = vld [vmem:[#allocation164_spill] sm:$0xff]  ;;  %v6810_v29 = vld [vmem:[#allocation179_spill] sm:$0xff] }
 0x131   : > { %v2162_v50 = vand.u32 4294901760, %v2161_v24  ;;  %v2174_v12 = vand.u32 4294901760, %v2173_v62  ;;  %v3208_v28 = vpack.c.bf16 %v6762_v10, %v4274_v43  ;;  %v6764_v24 = vld [vmem:[#allocation30_spill] sm:$0xff]  ;;  %v3596_v11 = vpack.c.bf16 %v4312_v15, %v6770_v54  ;;  %v6792_v15 = vld [vmem:[#allocation147_spill] sm:$0xff]  ;;  %v6796_v42 = vld [vmem:[#allocation153_spill] sm:$0xff] }
 0x132   : > { %v3202_v63 = vpack.c.bf16 %v890_v47, %v878_v14  ;;  %3585 = vmatprep.subr.bf16.mxu0 %v3584_v26  ;;  %v3592_v62 = vpack.c.bf16 %v6764_v24, %v6763_v30  ;;  %v6765_v14 = vld [vmem:[#allocation31_spill] sm:$0xff]  ;;  %v6766_v47 = vld [vmem:[#allocation33_spill] sm:$0xff]  ;;  %v3216_v44 = vpack.c.bf16 %v4335_v59, %v4331_v55  ;;  %v3600_v4 = vpack.c.bf16 %v4342_v2, %v4339_v61  ;;  %v6773_v59 = vld [vmem:[#allocation120_spill] sm:$0xff] }
 0x133   : > { %v3586_v56 = vpack.c.bf16 %v2174_v12, %v2162_v50  ;;  %v3210_v26 = vpack.c.bf16 %v6766_v47, %v6765_v14  ;;  %v6767_v50 = vld [vmem:[#allocation34_spill] sm:$0xff]  ;;  %v6775_v55 = vld [vmem:[#allocation123_spill] sm:$0xff]  ;;  %v6776_v2 = vld [vmem:[#allocation124_spill] sm:$0xff] }
 0x134   : > { %3203 = vmatpush1.bf16.msra.mxu1 %v3202_v63  ;;  %v3594_v12 = vpack.c.bf16 %v4299_v6, %v6767_v50  ;;  %v6768_v63 = vld [vmem:[#allocation38_spill] sm:$0xff]  ;;  %v6787_v6 = vld [vmem:[#allocation140_spill] sm:$0xff]  ;;  %v6789_v47 = vld [vmem:[#allocation143_spill] sm:$0xff] }
 0x135   : > { %3587 = vmatpush1.bf16.msra.mxu0 %v3586_v56  ;;  %3205 = vmatprep.subr.bf16.mxu1 %v3204_v22  ;;  %v6769_v22 = vld [vmem:[#allocation39_spill] sm:$0xff]  ;;  %v6777_v61 = vld [vmem:[#allocation126_spill] sm:$0xff]  ;;  %v6803_v30 = vld [vmem:[#allocation165_spill] sm:$0xff] }
 0x136   : > { %3589 = vmatprep.subr.bf16.mxu0 %v3588_v57  ;;  %v3212_v56 = vpack.c.bf16 %v6769_v22, %v6768_v63  ;;  %v3214_v57 = vpack.c.bf16 %v4321_v37, %v4319_v36  ;;  %v6782_v54 = vld [vmem:[#allocation134_spill] sm:$0xff]  ;;  %v6784_v22 = vld [vmem:[#allocation207_spill] sm:$0xff]  ;;  %v6788_v37 = vld [vmem:[#allocation141_spill] sm:$0xff] }
 0x137   : > { %895 = vmatmul.mubr.f32.vlgmr.msra.gmra.mrb[0].mxu1 %v4771_v53  ;;  %v3218_v53 = vpack.c.bf16 %v4349_v38, %v4345_v23  ;;  %v6778_v38 = vld [vmem:[#allocation128_spill] sm:$0xff]  ;;  %v6779_v23 = vld [vmem:[#allocation129_spill] sm:$0xff]  ;;  %v6791_v24 = vld [vmem:[#allocation146_spill] sm:$0xff] }
 0x138   : > { %3207 = vmatpush1.bf16.msra.mxu1 %v3206_v49  ;;  %2179 = vmatmul.mubr.f32.vlgmr.msra.gmra.mrb[0].mxu0 %v6771_v35  ;;  %v3602_v49 = vpack.c.bf16 %v4355_v60, %v4353_v33  ;;  %v3220_v35 = vpack.c.bf16 %v4361_v5, %v4359_v7  ;;  %v6780_v60 = vld [vmem:[#allocation131_spill] sm:$0xff]  ;;  %v6790_v36 = vld [vmem:[#allocation144_spill] sm:$0xff]  ;;  %v6794_v10 = vld [vmem:[#allocation150_spill] sm:$0xff] }
 0x139   : > { %3591 = vmatpush1.bf16.msra.mxu0 %v3590_v40  ;;  %3209 = vmatprep.subr.bf16.mxu1 %v3208_v28  ;;  %v6774_v28 = vld [vmem:[#allocation122_spill] sm:$0xff]  ;;  %v6783_v5 = vld [vmem:[#allocation135_spill] sm:$0xff]  ;;  %v6805_v18 = vld [vmem:[#allocation168_spill] sm:$0xff] }
 0x13a   : > { %3593 = vmatprep.subr.bf16.mxu0 %v3592_v62  ;;  %v6781_v62 = vld [vmem:[#allocation132_spill] sm:$0xff]  ;;  %1095 = vmatprep.mubr.f32.mxu1 %v6784_v22  ;;  %v6786_v40 = vld [vmem:[#allocation138_spill] sm:$0xff]  ;;  %v6814_v33 = vld [vmem:[#allocation189_spill] sm:$0xff] }
 0x13b   : > { %v6801_v14 = vld [vmem:[#allocation162_spill] sm:$0xff]  ;;  %v6808_v63 = vld [vmem:[#allocation176_spill] sm:$0xff]  ;;  %2379 = vmatprep.mubr.f32.mxu0 %v6812_v34  ;;  %v6822_v27 = vld [vmem:[#allocation71_spill] sm:$0xff] }
 0x13c   : > { %3211 = vmatpush1.bf16.msra.mxu1 %v3210_v26  ;;  %v6807_v26 = vld [vmem:[#allocation174_spill] sm:$0xff]  ;;  %v6811_v50 = vld [vmem:[#allocation180_spill] sm:$0xff] }
 0x13d   : > { %3595 = vmatpush1.bf16.msra.mxu0 %v3594_v12  ;;  %3213 = vmatprep.subr.bf16.mxu1 %v3212_v56  ;;  %v6804_v56 = vld [vmem:[#allocation167_spill] sm:$0xff]  ;;  %v6813_v20 = vld [vmem:[#allocation182_spill] sm:$0xff]  ;;  %v6816_v43 = vld [vmem:[#allocation192_spill] sm:$0xff] }
 0x13e   : > { %3597 = vmatprep.subr.bf16.mxu0 %v3596_v11  ;;  %v6809_v11 = vld [vmem:[#allocation177_spill] sm:$0xff]  ;;  %v6818_v34 = vld [vmem:[#allocation64_spill] sm:$0xff]  ;;  %v6819_v22 = vld [vmem:[#allocation66_spill] sm:$0xff] }
 0x13f   : > { %v3604_v48 = vpack.c.bf16 %v6819_v22, %v6818_v34  ;;  %v6823_v41 = vld [vmem:[#allocation72_spill] sm:$0xff]  ;;  %v6827_v12 = vld [vmem:[#allocation78_spill] sm:$0xff]  ;;  %v6829_v34 = vld [vmem:[#allocation81_spill] sm:$0xff] }
 0x140   : > { %3215 = vmatpush1.bf16.msra.mxu1 %v3214_v57  ;;  %v3606_v45 = vpack.c.bf16 %v6823_v41, %v6822_v27  ;;  %v6824_v57 = vld [vmem:[#allocation74_spill] sm:$0xff]  ;;  %v6828_v22 = vld [vmem:[#allocation80_spill] sm:$0xff] }
 0x141   : > { %3599 = vmatpush1.bf16.msra.mxu0 %v3598_v16  ;;  %3217 = vmatprep.subr.bf16.mxu1 %v3216_v44  ;;  %v6821_v16 = vld [vmem:[#allocation69_spill] sm:$0xff]  ;;  %v3224_v1 = vpack.c.bf16 %v6825_v13, %v6824_v57  ;;  %v3226_v7 = vpack.c.bf16 %v6829_v34, %v6828_v22  ;;  %v6834_v41 = vld [vmem:[#allocation88_spill] sm:$0xff]  ;;  %v6835_v27 = vld [vmem:[#allocation90_spill] sm:$0xff] }
 0x142   : > { %3601 = vmatprep.subr.bf16.mxu0 %v3600_v4  ;;  %v3222_v44 = vpack.c.bf16 %v6821_v16, %v6820_v52  ;;  %v6826_v4 = vld [vmem:[#allocation76_spill] sm:$0xff]  ;;  %v6833_v52 = vld [vmem:[#allocation87_spill] sm:$0xff]  ;;  %v3612_v13 = vpack.c.bf16 %v6835_v27, %v6834_v41  ;;  %v6837_v57 = vld [vmem:[#allocation93_spill] sm:$0xff] }
 0x143   : > { %v3608_v58 = vpack.c.bf16 %v6827_v12, %v6826_v4  ;;  %v6831_v16 = vld [vmem:[#allocation84_spill] sm:$0xff]  ;;  %v6841_v22 = vld [vmem:[#allocation99_spill] sm:$0xff] }
 0x144   : > { %3219 = vmatpush1.bf16.msra.mxu1 %v3218_v53  ;;  %v6830_v53 = vld [vmem:[#allocation83_spill] sm:$0xff]  ;;  %v6839_v34 = vld [vmem:[#allocation96_spill] sm:$0xff] }
 0x145   : > { %3603 = vmatpush1.bf16.msra.mxu0 %v3602_v49  ;;  %3221 = vmatprep.subr.bf16.mxu1 %v3220_v35  ;;  %v3610_v49 = vpack.c.bf16 %v6831_v16, %v6830_v53  ;;  %v6832_v35 = vld [vmem:[#allocation86_spill] sm:$0xff]  ;;  %v6842_v16 = vld [vmem:[#allocation100_spill] sm:$0xff] }
 0x146   : > { %3605 = vmatprep.subr.bf16.mxu0 %v3604_v48  ;;  %v3228_v21 = vpack.c.bf16 %v6833_v52, %v6832_v35  ;;  %v6836_v48 = vld [vmem:[#allocation92_spill] sm:$0xff]  ;;  %v6843_v53 = vld [vmem:[#allocation102_spill] sm:$0xff]  ;;  %v6845_v35 = vld [vmem:[#allocation105_spill] sm:$0xff] }
 0x147   : > { %v3230_v12 = vpack.c.bf16 %v6837_v57, %v6836_v48  ;;  %v3616_v52 = vpack.c.bf16 %v6843_v53, %v6842_v16  ;;  %v6847_v57 = vld [vmem:[#allocation108_spill] sm:$0xff]  ;;  %v6849_v48 = vld [vmem:[#allocation111_spill] sm:$0xff] }
 0x148   : > { %3223 = vmatpush1.bf16.msra.mxu1 %v3222_v44  ;;  %v6838_v44 = vld [vmem:[#allocation95_spill] sm:$0xff] }
 0x149   : > { %3607 = vmatpush1.bf16.msra.mxu0 %v3606_v45  ;;  %3225 = vmatprep.subr.bf16.mxu1 %v3224_v1  ;;  %v3614_v45 = vpack.c.bf16 %v6839_v34, %v6838_v44  ;;  %v6840_v1 = vld [vmem:[#allocation98_spill] sm:$0xff]  ;;  %v6850_v34 = vld [vmem:[#allocation112_spill] sm:$0xff] }
 0x14a   : > { %3609 = vmatprep.subr.bf16.mxu0 %v3608_v58  ;;  %v3232_v4 = vpack.c.bf16 %v6841_v22, %v6840_v1  ;;  %v6844_v58 = vld [vmem:[#allocation104_spill] sm:$0xff]  ;;  %v6851_v44 = vld [vmem:[#allocation114_spill] sm:$0xff] }
 0x14b   : > { %v3234_v27 = vpack.c.bf16 %v6845_v35, %v6844_v58  ;;  %v3620_v22 = vpack.c.bf16 %v6851_v44, %v6850_v34 }
 0x14c   : > { %3227 = vmatpush1.bf16.msra.mxu1 %v3226_v7  ;;  %v6846_v7 = vld [vmem:[#allocation107_spill] sm:$0xff] }
 0x14d   : > { %3611 = vmatpush1.bf16.msra.mxu0 %v3610_v49  ;;  %3229 = vmatprep.subr.bf16.mxu1 %v3228_v21  ;;  %v3618_v49 = vpack.c.bf16 %v6847_v57, %v6846_v7  ;;  %v6848_v21 = vld [vmem:[#allocation110_spill] sm:$0xff] }
 0x14e   : > { %3613 = vmatprep.subr.bf16.mxu0 %v3612_v13  ;;  %v3236_v41 = vpack.c.bf16 %v6849_v48, %v6848_v21  ;;  %v6852_v13 = vpack.c.bf16 %v6712_v31, %v6711_v0 }
 0x150   : > { %3231 = vmatpush1.bf16.msra.mxu1 %v3230_v12  ;;  %v6853_v12 = vpack.c.bf16 %v6773_v59, %v6772_v46 }
 0x151   : > { %3615 = vmatpush1.bf16.msra.mxu0 %v3614_v45  ;;  %3233 = vmatprep.subr.bf16.mxu1 %v3232_v4  ;;  %v6854_v4 = vpack.c.bf16 %v6775_v55, %v6774_v28  ;;  %v6859_v45 = vpack.c.bf16 %v6786_v40, %v6785_v51 }
 0x152   : > { %3617 = vmatprep.subr.bf16.mxu0 %v3616_v52  ;;  %v6855_v52 = vpack.c.bf16 %v6777_v61, %v6776_v2 }
 0x154   : > { %3235 = vmatpush1.bf16.msra.mxu1 %v3234_v27  ;;  %v6856_v27 = vpack.c.bf16 %v6779_v23, %v6778_v38 }
 0x155   : > { %3619 = vmatpush1.bf16.msra.mxu0 %v3618_v49  ;;  %3237 = vmatprep.subr.bf16.mxu1 %v3236_v41  ;;  %v6857_v41 = vpack.c.bf16 %v6781_v62, %v6780_v60  ;;  %v6860_v49 = vpack.c.bf16 %v6788_v37, %v6787_v6  ;;  %v6871_v6 = vld [vmem:[#allocation158_spill] sm:$0xff] }
 0x156   : > { %3621 = vmatprep.subr.bf16.mxu0 %v3620_v22  ;;  %v6858_v22 = vpack.c.bf16 %v6783_v5, %v6782_v54 }
 0x158   : > { %3239 = vmatpush1.bf16.msra.mxu1 %v6852_v13  ;;  %v6861_v13 = vpack.c.bf16 %v6790_v36, %v6789_v47 }
 0x159   : > { %3623 = vmatpush1.bf16.msra.mxu0 %v6853_v12  ;;  %3241 = vmatprep.subr.bf16.mxu1 %v6854_v4  ;;  %v6862_v12 = vpack.c.bf16 %v6792_v15, %v6791_v24  ;;  %v6863_v4 = vld [vmem:[#allocation148_spill] sm:$0xff] }
 0x15a   : > { %3625 = vmatprep.subr.bf16.mxu0 %v6855_v52  ;;  %v6864_v52 = vpack.c.bf16 %v6794_v10, %v6863_v4 }
 0x15c   : > { %3243 = vmatpush1.bf16.msra.mxu1 %v6856_v27  ;;  %v6865_v27 = vld [vmem:[#allocation152_spill] sm:$0xff] }
 0x15d   : > { %3627 = vmatpush1.bf16.msra.mxu0 %v6857_v41  ;;  %3245 = vmatprep.subr.bf16.mxu1 %v6858_v22  ;;  %v6866_v41 = vpack.c.bf16 %v6796_v42, %v6865_v27  ;;  %v6867_v22 = vld [vmem:[#allocation156_spill] sm:$0xff]  ;;  %v6877_v42 = vld [vmem:[#allocation170_spill] sm:$0xff] }
 0x15e   : > { %3629 = vmatprep.subr.bf16.mxu0 %v6859_v45  ;;  %v6868_v45 = vld [vmem:[#allocation155_spill] sm:$0xff] }
 0x15f   : > { %v6869_v37 = vpack.c.bf16 %v6867_v22, %v6868_v45 }
 0x160   : > { %3247 = vmatpush1.bf16.msra.mxu1 %v6860_v49  ;;  %v6870_v49 = vld [vmem:[#allocation159_spill] sm:$0xff] }
 0x161   : > { %3631 = vmatpush1.bf16.msra.mxu0 %v6861_v13  ;;  %3249 = vmatprep.subr.bf16.mxu1 %v6862_v12  ;;  %v6872_v36 = vpack.c.bf16 %v6870_v49, %v6871_v6  ;;  %v6873_v13 = vpack.c.bf16 %v6801_v14, %v6800_v25  ;;  %v6874_v12 = vpack.c.bf16 %v6803_v30, %v6802_v19 }
 0x162   : > { %3633 = vmatprep.subr.bf16.mxu0 %v6864_v52  ;;  %v6875_v52 = vpack.c.bf16 %v6805_v18, %v6804_v56 }
 0x164   : > { %3251 = vmatpush1.bf16.msra.mxu1 %v6866_v41  ;;  %v6876_v41 = vld [vmem:[#allocation171_spill] sm:$0xff] }
 0x165   : > { %3635 = vmatpush1.bf16.msra.mxu0 %v6869_v37  ;;  %3253 = vmatprep.subr.bf16.mxu1 %v6872_v36  ;;  %v6878_v22 = vpack.c.bf16 %v6876_v41, %v6877_v42  ;;  %v6879_v37 = vld [vmem:[#allocation172_spill] sm:$0xff]  ;;  %v6881_v36 = vpack.c.bf16 %v6809_v11, %v6808_v63  ;;  %v6889_v11 = vld [vmem:[#allocation194_spill] sm:$0xff] }
 0x166   : > { %3637 = vmatprep.subr.bf16.mxu0 %v6873_v13  ;;  %v6880_v49 = vpack.c.bf16 %v6807_v26, %v6879_v37  ;;  %v6882_v13 = vpack.c.bf16 %v6811_v50, %v6810_v29  ;;  %v6892_v29 = vld [vmem:[#allocation196_spill] sm:$0xff]  ;;  %v6984_v26 = vld [vmem:[#allocation25_spill] sm:$0xff]  ;;  %v6986_v37 = vld [vmem:[#allocation27_spill] sm:$0xff] }
 0x168   : > { %3255 = vmatpush1.bf16.msra.mxu1 %v6874_v12  ;;  %v6883_v12 = vpack.c.bf16 %v6755_v17, %v6813_v20  ;;  %v6977_v20 = vld [vmem:[#allocation21_spill] sm:$0xff] }
 0x169   : > { %3639 = vmatpush1.bf16.msra.mxu0 %v6875_v52  ;;  %3257 = vmatprep.subr.bf16.mxu1 %v6878_v22  ;;  %v6884_v52 = vld [vmem:[#allocation184_spill] sm:$0xff]  ;;  %v6886_v22 = vpack.c.bf16 %v6814_v33, %v4654_v3 }
 0x16a   : > { %3641 = vmatprep.subr.bf16.mxu0 %v6880_v49  ;;  %v6885_v41 = vpack.c.bf16 %v6757_v9, %v6884_v52  ;;  %v6887_v49 = vpack.c.bf16 %v6816_v43, %v6815_v8  ;;  %v6899_v43 = vld [vmem:[#allocation17_spill] sm:$0xff]  ;;  %v6974_v52 = vld [vmem:[#allocation199_spill] sm:$0xff] }
 0x16c   : > { %3259 = vmatpush1.bf16.msra.mxu1 %v6881_v36  ;;  %v6888_v36 = vld [vmem:[#allocation195_spill] sm:$0xff] }
 0x16d   : > { %3643 = vmatpush1.bf16.msra.mxu0 %v6882_v13  ;;  %3261 = vmatprep.subr.bf16.mxu1 %v6883_v12  ;;  %v6890_v50 = vpack.c.bf16 %v6888_v36, %v6889_v11  ;;  %v6891_v13 = vld [vmem:[#allocation198_spill] sm:$0xff]  ;;  %v6894_v12 = vld [vmem:[#allocation200_spill] sm:$0xff]  ;;  %v6901_v36 = vld [vmem:[#allocation19_spill] sm:$0xff] }
 0x16e   : > { %3645 = vmatprep.subr.bf16.mxu0 %v6885_v41  ;;  %v6893_v17 = vpack.c.bf16 %v6891_v13, %v6892_v29  ;;  %v6895_v9 = vpack.c.bf16 %v4693_v39, %v6894_v12  ;;  %v6896_v41 = vld [vmem:[#allocation203_spill] sm:$0xff]  ;;  %v6903_v13 = vld [vmem:[#allocation22_spill] sm:$0xff]  ;;  %v6905_v39 = vld [vmem:[#allocation28_spill] sm:$0xff] }
 0x16f   : > { %v6897_v33 = vpack.c.bf16 %v4699_v32, %v6896_v41  ;;  %v6912_v41 = vld [vmem:[#allocation37_spill] sm:$0xff]  ;;  %v6914_v29 = vld [vmem:[#allocation43_spill] sm:$0xff] }
 0x170   : > { %3263 = vmatpush1.bf16.msra.mxu1 %v6886_v22  ;;  %v6898_v22 = vld [vmem:[#allocation13_spill] sm:$0xff] }
 0x171   : > { %3647 = vmatpush1.bf16.msra.mxu0 %v6887_v49  ;;  %3265 = vmatprep.subr.bf16.mxu1 %v6890_v50  ;;  %v6900_v49 = vld [vmem:[#allocation209_spill] sm:$0xff]  ;;  %v6902_v50 = vld [vmem:[#allocation212_spill] sm:$0xff] }
 0x172   : > { %3649 = vmatprep.subr.bf16.mxu0 %v6893_v17  ;;  %v6904_v17 = vld [vmem:[#allocation26_spill] sm:$0xff] }
 0x174   : > { %3267 = vmatpush1.bf16.msra.mxu1 %v6895_v9  ;;  %v6906_v9 = vld [vmem:[#allocation207_spill] sm:$0xff] }
 0x175   : > { %3651 = vmatpush1.bf16.msra.mxu0 %v6897_v33  ;;  %3269 = vmatprep.subr.bf16.mxu1 %v6898_v22  ;;  %v6907_v12 = vand.u32 4294901760, %v6906_v9  ;;  %v6908_v33 = vld [vmem:[#allocation211_spill] sm:$0xff]  ;;  %v6910_v22 = vld [vmem:[#allocation32_spill] sm:$0xff]  ;;  %v6919_v9 = vld [vmem:[#allocation58_spill] sm:$0xff] }
 0x176   : > { %3653 = vmatprep.subr.bf16.mxu0 %v6899_v43  ;;  %v6909_v32 = vand.u32 4294901760, %v6908_v33  ;;  %v6911_v43 = vld [vmem:[#allocation35_spill] sm:$0xff]  ;;  %v6921_v33 = vld [vmem:[#allocation65_spill] sm:$0xff] }
 0x177   : > { %1098 = vmatmul.mubr.f32.vlgmr.msra.gmra.mrb[0].mxu1 %v6900_v49 }
 0x178   : > { %3271 = vmatpush1.bf16.msra.mxu1 %v6901_v36  ;;  %2382 = vmatmul.mubr.f32.vlgmr.msra.gmra.mrb[0].mxu0 %v6902_v50  ;;  %v6913_v36 = vld [vmem:[#allocation40_spill] sm:$0xff] }
 0x179   : > { %3655 = vmatpush1.bf16.msra.mxu0 %v6903_v13  ;;  %3273 = vmatprep.subr.bf16.mxu1 %v6904_v17  ;;  %v6915_v13 = vld [vmem:[#allocation46_spill] sm:$0xff]  ;;  %v6916_v17 = vld [vmem:[#allocation49_spill] sm:$0xff] }
 0x17a   : > { %3657 = vmatprep.subr.bf16.mxu0 %v6905_v39  ;;  %1235 = vmatprep.mubr.f32.mxu1 %v6907_v12  ;;  %v6917_v39 = vld [vmem:[#allocation52_spill] sm:$0xff] }
 0x17b   : > { %2519 = vmatprep.mubr.f32.mxu0 %v6909_v32  ;;  %v6918_v12 = vld [vmem:[#allocation56_spill] sm:$0xff]  ;;  %v6920_v32 = vld [vmem:[#allocation61_spill] sm:$0xff] }
 0x17c   : > { %3275 = vmatpush1.bf16.msra.mxu1 %v6910_v22  ;;  %v6967_v22 = vld [vmem:[#allocation15_spill] sm:$0xff] }
 0x17d   : > { %3659 = vmatpush1.bf16.msra.mxu0 %v6911_v43  ;;  %3277 = vmatprep.subr.bf16.mxu1 %v6912_v41  ;;  %v6922_v43 = vld [vmem:[#allocation67_spill] sm:$0xff]  ;;  %v6923_v41 = vld [vmem:[#allocation70_spill] sm:$0xff] }
 0x17e   : > { %3661 = vmatprep.subr.bf16.mxu0 %v6913_v36  ;;  %v6924_v36 = vld [vmem:[#allocation73_spill] sm:$0xff] }
 0x180   : > { %3279 = vmatpush1.bf16.msra.mxu1 %v6914_v29  ;;  %v6925_v29 = vld [vmem:[#allocation77_spill] sm:$0xff] }
 0x181   : > { %3663 = vmatpush1.bf16.msra.mxu0 %v6915_v13  ;;  %3281 = vmatprep.subr.bf16.mxu1 %v6916_v17  ;;  %v6926_v13 = vld [vmem:[#allocation79_spill] sm:$0xff]  ;;  %v6927_v17 = vld [vmem:[#allocation82_spill] sm:$0xff] }
 0x182   : > { %3665 = vmatprep.subr.bf16.mxu0 %v6917_v39  ;;  %v6928_v39 = vld [vmem:[#allocation85_spill] sm:$0xff] }
 0x184   : > { %3283 = vmatpush1.bf16.msra.mxu1 %v6918_v12  ;;  %v6929_v12 = vld [vmem:[#allocation89_spill] sm:$0xff] }
 0x185   : > { %3667 = vmatpush1.bf16.msra.mxu0 %v6919_v9  ;;  %3285 = vmatprep.subr.bf16.mxu1 %v6920_v32  ;;  %v6930_v9 = vld [vmem:[#allocation91_spill] sm:$0xff]  ;;  %v6931_v32 = vld [vmem:[#allocation94_spill] sm:$0xff] }
 0x186   : > { %3669 = vmatprep.subr.bf16.mxu0 %v6921_v33  ;;  %v6932_v33 = vld [vmem:[#allocation97_spill] sm:$0xff] }
 0x188   : > { %3287 = vmatpush1.bf16.msra.mxu1 %v6922_v43  ;;  %v6933_v43 = vld [vmem:[#allocation101_spill] sm:$0xff] }
 0x189   : > { %3671 = vmatpush1.bf16.msra.mxu0 %v6923_v41  ;;  %3289 = vmatprep.subr.bf16.mxu1 %v6924_v36  ;;  %v6934_v41 = vld [vmem:[#allocation103_spill] sm:$0xff]  ;;  %v6935_v36 = vld [vmem:[#allocation106_spill] sm:$0xff] }
 0x18a   : > { %3673 = vmatprep.subr.bf16.mxu0 %v6925_v29  ;;  %v6936_v29 = vld [vmem:[#allocation109_spill] sm:$0xff] }
 0x18c   : > { %3291 = vmatpush1.bf16.msra.mxu1 %v6926_v13  ;;  %v6937_v13 = vld [vmem:[#allocation113_spill] sm:$0xff] }
 0x18d   : > { %3675 = vmatpush1.bf16.msra.mxu0 %v6927_v17  ;;  %3293 = vmatprep.subr.bf16.mxu1 %v6928_v39  ;;  %v6938_v17 = vld [vmem:[#allocation115_spill] sm:$0xff]  ;;  %v6939_v39 = vld [vmem:[#allocation118_spill] sm:$0xff] }
 0x18e   : > { %3677 = vmatprep.subr.bf16.mxu0 %v6929_v12  ;;  %v6940_v12 = vld [vmem:[#allocation121_spill] sm:$0xff] }
 0x190   : > { %3295 = vmatpush1.bf16.msra.mxu1 %v6930_v9  ;;  %v6941_v9 = vld [vmem:[#allocation125_spill] sm:$0xff] }
 0x191   : > { %3679 = vmatpush1.bf16.msra.mxu0 %v6931_v32  ;;  %3297 = vmatprep.subr.bf16.mxu1 %v6932_v33  ;;  %v6942_v32 = vld [vmem:[#allocation127_spill] sm:$0xff]  ;;  %v6943_v33 = vld [vmem:[#allocation130_spill] sm:$0xff] }
 0x192   : > { %3681 = vmatprep.subr.bf16.mxu0 %v6933_v43  ;;  %v6944_v43 = vld [vmem:[#allocation133_spill] sm:$0xff] }
 0x194   : > { %3299 = vmatpush1.bf16.msra.mxu1 %v6934_v41  ;;  %v6945_v41 = vld [vmem:[#allocation137_spill] sm:$0xff] }
 0x195   : > { %3683 = vmatpush1.bf16.msra.mxu0 %v6935_v36  ;;  %3301 = vmatprep.subr.bf16.mxu1 %v6936_v29  ;;  %v6946_v36 = vld [vmem:[#allocation139_spill] sm:$0xff]  ;;  %v6947_v29 = vld [vmem:[#allocation142_spill] sm:$0xff] }
 0x196   : > { %3685 = vmatprep.subr.bf16.mxu0 %v6937_v13  ;;  %v6948_v13 = vld [vmem:[#allocation145_spill] sm:$0xff] }
 0x198   : > { %3303 = vmatpush1.bf16.msra.mxu1 %v6938_v17  ;;  %v6949_v17 = vld [vmem:[#allocation149_spill] sm:$0xff] }
 0x199   : > { %3687 = vmatpush1.bf16.msra.mxu0 %v6939_v39  ;;  %3305 = vmatprep.subr.bf16.mxu1 %v6940_v12  ;;  %v6950_v39 = vld [vmem:[#allocation151_spill] sm:$0xff]  ;;  %v6951_v12 = vld [vmem:[#allocation154_spill] sm:$0xff] }
 0x19a   : > { %3689 = vmatprep.subr.bf16.mxu0 %v6941_v9  ;;  %v6952_v9 = vld [vmem:[#allocation157_spill] sm:$0xff] }
 0x19c   : > { %3307 = vmatpush1.bf16.msra.mxu1 %v6942_v32  ;;  %v6953_v32 = vld [vmem:[#allocation161_spill] sm:$0xff] }
 0x19d   : > { %3691 = vmatpush1.bf16.msra.mxu0 %v6943_v33  ;;  %3309 = vmatprep.subr.bf16.mxu1 %v6944_v43  ;;  %v6954_v33 = vld [vmem:[#allocation163_spill] sm:$0xff]  ;;  %v6955_v43 = vld [vmem:[#allocation166_spill] sm:$0xff] }
 0x19e   : > { %3693 = vmatprep.subr.bf16.mxu0 %v6945_v41  ;;  %v6956_v41 = vld [vmem:[#allocation169_spill] sm:$0xff] }
 0x1a0   : > { %3311 = vmatpush1.bf16.msra.mxu1 %v6946_v36  ;;  %v6957_v36 = vld [vmem:[#allocation173_spill] sm:$0xff] }
 0x1a1   : > { %3695 = vmatpush1.bf16.msra.mxu0 %v6947_v29  ;;  %3313 = vmatprep.subr.bf16.mxu1 %v6948_v13  ;;  %v6958_v29 = vld [vmem:[#allocation175_spill] sm:$0xff]  ;;  %v6959_v13 = vld [vmem:[#allocation178_spill] sm:$0xff] }
 0x1a2   : > { %3697 = vmatprep.subr.bf16.mxu0 %v6949_v17  ;;  %v6960_v17 = vld [vmem:[#allocation181_spill] sm:$0xff] }
 0x1a4   : > { %3315 = vmatpush1.bf16.msra.mxu1 %v6950_v39  ;;  %v6961_v39 = vld [vmem:[#allocation185_spill] sm:$0xff] }
 0x1a5   : > { %3699 = vmatpush1.bf16.msra.mxu0 %v6951_v12  ;;  %3317 = vmatprep.subr.bf16.mxu1 %v6952_v9  ;;  %v6962_v12 = vld [vmem:[#allocation187_spill] sm:$0xff]  ;;  %v6963_v9 = vld [vmem:[#allocation190_spill] sm:$0xff] }
 0x1a6   : > { %3701 = vmatprep.subr.bf16.mxu0 %v6953_v32  ;;  %v6964_v32 = vld [vmem:[#allocation193_spill] sm:$0xff] }
 0x1a8   : > { %3319 = vmatpush1.bf16.msra.mxu1 %v6954_v33  ;;  %v6965_v33 = vld [vmem:[#allocation14_spill] sm:$0xff] }
 0x1a9   : > { %3703 = vmatpush1.bf16.msra.mxu0 %v6955_v43  ;;  %3321 = vmatprep.subr.bf16.mxu1 %v6956_v41  ;;  %v6966_v43 = vand.u32 4294901760, %v6965_v33  ;;  %v6968_v41 = vand.u32 4294901760, %v6967_v22  ;;  %v6980_v33 = vld [vmem:[#allocation23_spill] sm:$0xff] }
 0x1aa   : > { %3705 = vmatprep.subr.bf16.mxu0 %v6957_v36  ;;  %v6969_v36 = vld [vmem:[#allocation197_spill] sm:$0xff]  ;;  %v6981_v22 = vand.u32 4294901760, %v6980_v33 }
 0x1ab   : > { %v3332_v11 = vpack.c.bf16 %v6968_v41, %v6966_v43  ;;  %v6982_v43 = vld [vmem:[#allocation24_spill] sm:$0xff] }
 0x1ac   : > { %3323 = vmatpush1.bf16.msra.mxu1 %v6958_v29  ;;  %v6970_v29 = vld [vmem:[#allocation16_spill] sm:$0xff]  ;;  %v6983_v41 = vand.u32 4294901760, %v6982_v43 }
 0x1ad   : > { %3707 = vmatpush1.bf16.msra.mxu0 %v6959_v13  ;;  %3325 = vmatprep.subr.bf16.mxu1 %v6960_v17  ;;  %v6971_v8 = vand.u32 4294901760, %v6970_v29  ;;  %v6972_v13 = vld [vmem:[#allocation18_spill] sm:$0xff]  ;;  %v6985_v29 = vand.u32 4294901760, %v6984_v26 }
 0x1ae   : > { %3709 = vmatprep.subr.bf16.mxu0 %v6961_v39  ;;  %v6973_v3 = vand.u32 4294901760, %v6972_v13  ;;  %v6975_v39 = vld [vmem:[#allocation20_spill] sm:$0xff]  ;;  %v6987_v13 = vand.u32 4294901760, %v6986_v37  ;;  %v6998_v37 = vld [vmem:[#allocation34_spill] sm:$0xff] }
 0x1b0   : > { %3327 = vmatpush1.bf16.msra.mxu1 %v6962_v12  ;;  %v3716_v17 = vpack.c.bf16 %v6973_v3, %v6971_v8  ;;  %v6976_v12 = vand.u32 4294901760, %v6975_v39  ;;  %v3336_v3 = vpack.c.bf16 %v6987_v13, %v6985_v29  ;;  %v6988_v8 = vld [vmem:[#allocation29_spill] sm:$0xff]  ;;  %v6990_v39 = vld [vmem:[#allocation30_spill] sm:$0xff] }
 0x1b1   : > { %3711 = vmatpush1.bf16.msra.mxu0 %v6963_v9  ;;  %3329 = vmatprep.subr.bf16.mxu1 %v6964_v32  ;;  %v6978_v9 = vand.u32 4294901760, %v6977_v20  ;;  %v6979_v32 = vld [vmem:[#allocation202_spill] sm:$0xff]  ;;  %v6991_v42 = vand.u32 4294901760, %v6990_v39 }
 0x1b2   : > { %3713 = vmatprep.subr.bf16.mxu0 %v6969_v36  ;;  %v3718_v36 = vpack.c.bf16 %v6983_v41, %v6981_v22  ;;  %v6996_v22 = vld [vmem:[#allocation33_spill] sm:$0xff]  ;;  %v7000_v41 = vld [vmem:[#allocation36_spill] sm:$0xff] }
 0x1b3   : > { %v3334_v63 = vpack.c.bf16 %v6978_v9, %v6976_v12  ;;  %v6992_v12 = vand.u32 4294901760, %v6900_v49  ;;  %v6994_v9 = vld [vmem:[#allocation31_spill] sm:$0xff]  ;;  %v6997_v26 = vand.u32 4294901760, %v6996_v22  ;;  %v7001_v29 = vand.u32 4294901760, %v7000_v41  ;;  %v7010_v22 = vld [vmem:[#allocation205_spill] sm:$0xff] }
 0x1b4   : > { %3331 = vmatpush1.bf16.msra.mxu1 %v6974_v52  ;;  %v6989_v52 = vand.u32 4294901760, %v6988_v8  ;;  %v6995_v33 = vand.u32 4294901760, %v6994_v9  ;;  %v7004_v49 = vld [vmem:[#allocation39_spill] sm:$0xff] }
 0x1b5   : > { %3715 = vmatpush1.bf16.msra.mxu0 %v6979_v32  ;;  %3333 = vmatprep.subr.bf16.mxu1 %v3332_v11  ;;  %v6993_v11 = vand.u32 4294901760, %v6902_v50  ;;  %v7005_v8 = vand.u32 4294901760, %v7004_v49  ;;  %v7006_v50 = vld [vmem:[#allocation41_spill] sm:$0xff]  ;;  %v7016_v41 = vld [vmem:[#allocation47_spill] sm:$0xff]  ;;  %v7020_v49 = vld [vmem:[#allocation50_spill] sm:$0xff] }
 0x1b6   : > { %3717 = vmatprep.subr.bf16.mxu0 %v3716_v17  ;;  %v3720_v20 = vpack.c.bf16 %v6991_v42, %v6989_v52  ;;  %v3338_v43 = vpack.c.bf16 %v6997_v26, %v6995_v33  ;;  %v6999_v17 = vand.u32 4294901760, %v6998_v37  ;;  %v7002_v42 = vld [vmem:[#allocation38_spill] sm:$0xff]  ;;  %v7007_v39 = vand.u32 4294901760, %v7006_v50  ;;  %v7014_v26 = vld [vmem:[#allocation45_spill] sm:$0xff]  ;;  %v7022_v50 = vld [vmem:[#allocation51_spill] sm:$0xff] }
 0x1b7   : > { %1239 = vmatmul.mubr.f32.vlgmr.msra.gmra.mrb[0].mxu1 %v6992_v12  ;;  %v7003_v52 = vand.u32 4294901760, %v7002_v42  ;;  %v7008_v12 = vld [vmem:[#allocation42_spill] sm:$0xff]  ;;  %v7015_v37 = vand.u32 4294901760, %v7014_v26 }
 0x1b8   : > { %3335 = vmatpush1.bf16.msra.mxu1 %v3334_v63  ;;  %2523 = vmatmul.mubr.f32.vlgmr.msra.gmra.mrb[0].mxu0 %v6993_v11  ;;  %v3722_v13 = vpack.c.bf16 %v7001_v29, %v6999_v17  ;;  %v7009_v11 = vand.u32 4294901760, %v7008_v12  ;;  %v7017_v29 = vand.u32 4294901760, %v7016_v41  ;;  %v7026_v32 = vld [vmem:[#allocation54_spill] sm:$0xff]  ;;  %v7032_v41 = vld [vmem:[#allocation59_spill] sm:$0xff] }
 0x1b9   : > { %3719 = vmatpush1.bf16.msra.mxu0 %v3718_v36  ;;  %3337 = vmatprep.subr.bf16.mxu1 %v3336_v3  ;;  %v3340_v63 = vpack.c.bf16 %v7005_v8, %v7003_v52  ;;  %v7011_v36 = vld [vmem:[#allocation208_spill] sm:$0xff]  ;;  %v7021_v8 = vand.u32 4294901760, %v7020_v49 }
 0x1ba   : > { %3721 = vmatprep.subr.bf16.mxu0 %v3720_v20  ;;  %v3724_v9 = vpack.c.bf16 %v7009_v11, %v7007_v39  ;;  %1502 = vmatprep.mubr.f32.mxu1 %v7010_v22  ;;  %v7012_v3 = vld [vmem:[#allocation44_spill] sm:$0xff]  ;;  %v7023_v39 = vand.u32 4294901760, %v7022_v50  ;;  %v7024_v11 = vld [vmem:[#allocation53_spill] sm:$0xff]  ;;  %v7038_v50 = vld [vmem:[#allocation63_spill] sm:$0xff] }
 0x1bb   : > { %2786 = vmatprep.mubr.f32.mxu0 %v7011_v36  ;;  %v7013_v33 = vand.u32 4294901760, %v7012_v3  ;;  %v7018_v20 = vld [vmem:[#allocation48_spill] sm:$0xff]  ;;  %v7027_v3 = vand.u32 4294901760, %v7026_v32 }
 0x1bc   : > { %3339 = vmatpush1.bf16.msra.mxu1 %v3338_v43  ;;  %v7019_v42 = vand.u32 4294901760, %v7018_v20  ;;  %v3344_v12 = vpack.c.bf16 %v7023_v39, %v7021_v8  ;;  %v7025_v43 = vand.u32 4294901760, %v7024_v11  ;;  %v7034_v20 = vld [vmem:[#allocation60_spill] sm:$0xff]  ;;  %v7036_v8 = vld [vmem:[#allocation62_spill] sm:$0xff]  ;;  %v7039_v39 = vand.u32 4294901760, %v7038_v50  ;;  %v7054_v50 = vld [vmem:[#allocation75_spill] sm:$0xff] }
 0x1bd   : > { %v3342_v17 = vpack.c.bf16 %v7015_v37, %v7013_v33  ;;  %3723 = vmatpush1.bf16.msra.mxu0 %v3722_v13  ;;  %3341 = vmatprep.subr.bf16.mxu1 %v3340_v63  ;;  %v7028_v33 = vld [vmem:[#allocation55_spill] sm:$0xff]  ;;  %v7030_v63 = vld [vmem:[#allocation57_spill] sm:$0xff]  ;;  %v7040_v32 = vld [vmem:[#allocation64_spill] sm:$0xff] }
 0x1be   : > { %v3726_v52 = vpack.c.bf16 %v7019_v42, %v7017_v29  ;;  %3725 = vmatprep.subr.bf16.mxu0 %v3724_v9  ;;  %v3728_v36 = vpack.c.bf16 %v7027_v3, %v7025_v43  ;;  %v7029_v13 = vand.u32 4294901760, %v7028_v33  ;;  %v7031_v26 = vand.u32 4294901760, %v7030_v63  ;;  %v7042_v43 = vld [vmem:[#allocation66_spill] sm:$0xff] }
 0x1bf   : > { %v7033_v29 = vand.u32 4294901760, %v7032_v41  ;;  %v7035_v42 = vand.u32 4294901760, %v7034_v20  ;;  %v7037_v9 = vand.u32 4294901760, %v7036_v8  ;;  %v7043_v3 = vand.u32 4294901760, %v7042_v43  ;;  %v7048_v41 = vld [vmem:[#allocation71_spill] sm:$0xff]  ;;  %v7050_v20 = vld [vmem:[#allocation72_spill] sm:$0xff] }
 0x1c0   : > { %3343 = vmatpush1.bf16.msra.mxu1 %v3342_v17  ;;  %v3346_v37 = vpack.c.bf16 %v7031_v26, %v7029_v13  ;;  %v7041_v17 = vand.u32 4294901760, %v7040_v32  ;;  %v7044_v13 = vld [vmem:[#allocation68_spill] sm:$0xff]  ;;  %v7058_v43 = vld [vmem:[#allocation78_spill] sm:$0xff] }
 0x1c1   : > { %3727 = vmatpush1.bf16.msra.mxu0 %v3726_v52  ;;  %3345 = vmatprep.subr.bf16.mxu1 %v3344_v12  ;;  %v3730_v49 = vpack.c.bf16 %v7035_v42, %v7033_v29  ;;  %v3348_v11 = vpack.c.bf16 %v7039_v39, %v7037_v9  ;;  %v7045_v52 = vand.u32 4294901760, %v7044_v13  ;;  %v7046_v12 = vld [vmem:[#allocation69_spill] sm:$0xff]  ;;  %v7049_v29 = vand.u32 4294901760, %v7048_v41  ;;  %v7052_v9 = vld [vmem:[#allocation74_spill] sm:$0xff]  ;;  %v7064_v41 = vld [vmem:[#allocation83_spill] sm:$0xff] }
 0x1c2   : > { %3729 = vmatprep.subr.bf16.mxu0 %v3728_v36  ;;  %v3732_v33 = vpack.c.bf16 %v7043_v3, %v7041_v17  ;;  %v7047_v63 = vand.u32 4294901760, %v7046_v12  ;;  %v7051_v42 = vand.u32 4294901760, %v7050_v20  ;;  %v7053_v36 = vand.u32 4294901760, %v7052_v9  ;;  %v7056_v17 = vld [vmem:[#allocation76_spill] sm:$0xff] }
 0x1c3   : > { %v7055_v39 = vand.u32 4294901760, %v7054_v50  ;;  %v7059_v3 = vand.u32 4294901760, %v7058_v43  ;;  %v7066_v20 = vld [vmem:[#allocation84_spill] sm:$0xff]  ;;  %v7070_v50 = vld [vmem:[#allocation87_spill] sm:$0xff]  ;;  %v7074_v43 = vld [vmem:[#allocation90_spill] sm:$0xff] }
 0x1c4   : > { %3347 = vmatpush1.bf16.msra.mxu1 %v3346_v37  ;;  %v3350_v26 = vpack.c.bf16 %v7047_v63, %v7045_v52  ;;  %v3734_v8 = vpack.c.bf16 %v7051_v42, %v7049_v29  ;;  %v7057_v37 = vand.u32 4294901760, %v7056_v17  ;;  %v7060_v52 = vld [vmem:[#allocation80_spill] sm:$0xff]  ;;  %v7065_v29 = vand.u32 4294901760, %v7064_v41  ;;  %v7080_v41 = vld [vmem:[#allocation95_spill] sm:$0xff] }
 0x1c5   : > { %3731 = vmatpush1.bf16.msra.mxu0 %v3730_v49  ;;  %3349 = vmatprep.subr.bf16.mxu1 %v3348_v11  ;;  %v3352_v32 = vpack.c.bf16 %v7055_v39, %v7053_v36  ;;  %v7061_v49 = vand.u32 4294901760, %v7060_v52  ;;  %v7062_v11 = vld [vmem:[#allocation81_spill] sm:$0xff]  ;;  %v7067_v42 = vand.u32 4294901760, %v7066_v20  ;;  %v7068_v36 = vld [vmem:[#allocation86_spill] sm:$0xff]  ;;  %v7071_v39 = vand.u32 4294901760, %v7070_v50  ;;  %v7082_v20 = vld [vmem:[#allocation96_spill] sm:$0xff] }
 0x1c6   : > { %3733 = vmatprep.subr.bf16.mxu0 %v3732_v33  ;;  %v3736_v13 = vpack.c.bf16 %v7059_v3, %v7057_v37  ;;  %v7063_v12 = vand.u32 4294901760, %v7062_v11  ;;  %v7069_v33 = vand.u32 4294901760, %v7068_v36  ;;  %v7072_v37 = vld [vmem:[#allocation88_spill] sm:$0xff]  ;;  %v7075_v3 = vand.u32 4294901760, %v7074_v43 }
 0x1c7   : > { %v3738_v9 = vpack.c.bf16 %v7067_v42, %v7065_v29  ;;  %v7081_v29 = vand.u32 4294901760, %v7080_v41  ;;  %v7083_v42 = vand.u32 4294901760, %v7082_v20  ;;  %v7106_v20 = vand.u32 4294901760, %v6779_v23  ;;  %v7113_v23 = vld [vmem:[#allocation140_spill] sm:$0xff] }
 0x1c8   : > { %3351 = vmatpush1.bf16.msra.mxu1 %v3350_v26  ;;  %v3354_v63 = vpack.c.bf16 %v7063_v12, %v7061_v49  ;;  %v3356_v17 = vpack.c.bf16 %v7071_v39, %v7069_v33  ;;  %v7073_v26 = vand.u32 4294901760, %v7072_v37  ;;  %v7076_v49 = vld [vmem:[#allocation92_spill] sm:$0xff]  ;;  %v7085_v33 = vld [vmem:[#allocation99_spill] sm:$0xff]  ;;  %v7088_v37 = vand.u32 4294901760, %v6843_v53 }
 0x1c9   : > { %3735 = vmatpush1.bf16.msra.mxu0 %v3734_v8  ;;  %3353 = vmatprep.subr.bf16.mxu1 %v3352_v32  ;;  %v7077_v8 = vand.u32 4294901760, %v7076_v49  ;;  %v7078_v32 = vld [vmem:[#allocation93_spill] sm:$0xff]  ;;  %v3742_v36 = vpack.c.bf16 %v7083_v42, %v7081_v29  ;;  %v7086_v50 = vand.u32 4294901760, %v7085_v33  ;;  %v7095_v53 = vand.u32 4294901760, %v6850_v34 }
 0x1ca   : > { %3737 = vmatprep.subr.bf16.mxu0 %v3736_v13  ;;  %v3740_v52 = vpack.c.bf16 %v7075_v3, %v7073_v26  ;;  %v7079_v11 = vand.u32 4294901760, %v7078_v32  ;;  %v7084_v13 = vand.u32 4294901760, %v6840_v1  ;;  %v7091_v3 = vand.u32 4294901760, %v6846_v7 }
 0x1cb   : > { %v7092_v1 = vand.u32 4294901760, %v6847_v57  ;;  %v7099_v57 = vand.u32 4294901760, %v6772_v46  ;;  %v7102_v34 = vand.u32 4294901760, %v6775_v55  ;;  %v7109_v42 = vand.u32 4294901760, %v6782_v54  ;;  %v7118_v54 = vld [vmem:[#allocation144_spill] sm:$0xff] }
 0x1cc   : > { %3355 = vmatpush1.bf16.msra.mxu1 %v3354_v63  ;;  %v3358_v12 = vpack.c.bf16 %v7079_v11, %v7077_v8  ;;  %v3360_v39 = vpack.c.bf16 %v7086_v50, %v7084_v13  ;;  %v7087_v63 = vand.u32 4294901760, %v6842_v16  ;;  %v7094_v16 = vand.u32 4294901760, %v6849_v48  ;;  %v7115_v50 = vld [vmem:[#allocation141_spill] sm:$0xff] }
 0x1cd   : > { %3739 = vmatpush1.bf16.msra.mxu0 %v3738_v9  ;;  %3357 = vmatprep.subr.bf16.mxu1 %v3356_v17  ;;  %v7089_v9 = vand.u32 4294901760, %v6844_v58  ;;  %v7090_v17 = vand.u32 4294901760, %v6845_v35  ;;  %v3746_v49 = vpack.c.bf16 %v7092_v1, %v7091_v3  ;;  %v7096_v58 = vand.u32 4294901760, %v6851_v44  ;;  %v7125_v3 = vld [vmem:[#allocation153_spill] sm:$0xff] }
 0x1ce   : > { %3741 = vmatprep.subr.bf16.mxu0 %v3740_v52  ;;  %v3744_v26 = vpack.c.bf16 %v7088_v37, %v7087_v63  ;;  %v7093_v52 = vand.u32 4294901760, %v6848_v21  ;;  %v7097_v35 = vand.u32 4294901760, %v6711_v0  ;;  %v7098_v11 = vand.u32 4294901760, %v6712_v31 }
 0x1cf   : > { %v3362_v43 = vpack.c.bf16 %v7090_v17, %v7089_v9  ;;  %v3748_v32 = vpack.c.bf16 %v7096_v58, %v7095_v53  ;;  %v7100_v21 = vand.u32 4294901760, %v6773_v59  ;;  %v7103_v44 = vand.u32 4294901760, %v6776_v2 }
 0x1d0   : > { %3359 = vmatpush1.bf16.msra.mxu1 %v3358_v12  ;;  %v3364_v8 = vpack.c.bf16 %v7094_v16, %v7093_v52  ;;  %v3366_v7 = vpack.c.bf16 %v7098_v11, %v7097_v35  ;;  %v7101_v12 = vand.u32 4294901760, %v6774_v28  ;;  %v7104_v0 = vand.u32 4294901760, %v6777_v61 }
 0x1d1   : > { %3743 = vmatpush1.bf16.msra.mxu0 %v3742_v36  ;;  %3361 = vmatprep.subr.bf16.mxu1 %v3360_v39  ;;  %v3750_v48 = vpack.c.bf16 %v7100_v21, %v7099_v57  ;;  %v7105_v31 = vand.u32 4294901760, %v6778_v38  ;;  %v7107_v59 = vand.u32 4294901760, %v6780_v60  ;;  %v7108_v28 = vand.u32 4294901760, %v6781_v62  ;;  %v7139_v57 = vld [vmem:[#allocation170_spill] sm:$0xff] }
 0x1d2   : > { %3745 = vmatprep.subr.bf16.mxu0 %v3744_v26  ;;  %v3368_v41 = vpack.c.bf16 %v7102_v34, %v7101_v12  ;;  %v3752_v29 = vpack.c.bf16 %v7104_v0, %v7103_v44  ;;  %v7110_v2 = vand.u32 4294901760, %v6783_v5  ;;  %v7111_v61 = vand.u32 4294901760, %v6785_v51 }
 0x1d3   : > { %v3370_v46 = vpack.c.bf16 %v7106_v20, %v7105_v31  ;;  %v3754_v55 = vpack.c.bf16 %v7108_v28, %v7107_v59  ;;  %v7112_v38 = vand.u32 4294901760, %v6786_v40  ;;  %v7114_v33 = vand.u32 4294901760, %v7113_v23  ;;  %v7161_v23 = vld [vmem:[#allocation186_spill] sm:$0xff] }
 0x1d4   : > { %3363 = vmatpush1.bf16.msra.mxu1 %v3362_v43  ;;  %v3372_v36 = vpack.c.bf16 %v7110_v2, %v7109_v42  ;;  %v7116_v39 = vand.u32 4294901760, %v7115_v50  ;;  %v7117_v62 = vand.u32 4294901760, %v6789_v47  ;;  %v7119_v63 = vand.u32 4294901760, %v7118_v54  ;;  %v7157_v2 = vld [vmem:[#allocation183_spill] sm:$0xff] }
 0x1d5   : > { %3747 = vmatpush1.bf16.msra.mxu0 %v3746_v49  ;;  %3365 = vmatprep.subr.bf16.mxu1 %v3364_v8  ;;  %v3756_v13 = vpack.c.bf16 %v7112_v38, %v7111_v61  ;;  %v7120_v37 = vand.u32 4294901760, %v6791_v24  ;;  %v7121_v51 = vand.u32 4294901760, %v6792_v15  ;;  %v7122_v40 = vand.u32 4294901760, %v6863_v4  ;;  %v7128_v24 = vld [vmem:[#allocation156_spill] sm:$0xff]  ;;  %v7131_v8 = vld [vmem:[#allocation159_spill] sm:$0xff] }
 0x1d6   : > { %3749 = vmatprep.subr.bf16.mxu0 %v3748_v32  ;;  %v3374_v60 = vpack.c.bf16 %v7116_v39, %v7114_v33  ;;  %v3758_v5 = vpack.c.bf16 %v7119_v63, %v7117_v62  ;;  %v7123_v9 = vand.u32 4294901760, %v6794_v10  ;;  %v7124_v43 = vand.u32 4294901760, %v6865_v27  ;;  %v7159_v38 = vld [vmem:[#allocation184_spill] sm:$0xff]  ;;  %v7165_v62 = vld [vmem:[#allocation189_spill] sm:$0xff] }
 0x1d7   : > { %v3376_v26 = vpack.c.bf16 %v7121_v51, %v7120_v37  ;;  %v7126_v1 = vand.u32 4294901760, %v7125_v3  ;;  %v7127_v49 = vand.u32 4294901760, %v6868_v45  ;;  %v7129_v52 = vand.u32 4294901760, %v7128_v24  ;;  %v7163_v39 = vld [vmem:[#allocation188_spill] sm:$0xff]  ;;  %v7177_v24 = vld [vmem:[#allocation198_spill] sm:$0xff] }
 0x1d8   : > { %3367 = vmatpush1.bf16.msra.mxu1 %v3366_v7  ;;  %v3760_v17 = vpack.c.bf16 %v7123_v9, %v7122_v40  ;;  %v7130_v16 = vand.u32 4294901760, %v6871_v6  ;;  %v7132_v4 = vand.u32 4294901760, %v7131_v8  ;;  %v7133_v10 = vand.u32 4294901760, %v6800_v25  ;;  %v7169_v51 = vld [vmem:[#allocation192_spill] sm:$0xff]  ;;  %v7171_v9 = vld [vmem:[#allocation194_spill] sm:$0xff] }
 0x1d9   : > { %3751 = vmatpush1.bf16.msra.mxu0 %v3750_v48  ;;  %3369 = vmatprep.subr.bf16.mxu1 %v3368_v41  ;;  %v3378_v47 = vpack.c.bf16 %v7126_v1, %v7124_v43  ;;  %v3762_v15 = vpack.c.bf16 %v7129_v52, %v7127_v49  ;;  %v7134_v27 = vand.u32 4294901760, %v6801_v14  ;;  %v7135_v32 = vand.u32 4294901760, %v6802_v19  ;;  %v7141_v48 = vld [vmem:[#allocation171_spill] sm:$0xff]  ;;  %v7143_v14 = vld [vmem:[#allocation172_spill] sm:$0xff]  ;;  %v7145_v41 = vld [vmem:[#allocation174_spill] sm:$0xff] }
 0x1da   : > { %3753 = vmatprep.subr.bf16.mxu0 %v3752_v29  ;;  %v3380_v53 = vpack.c.bf16 %v7132_v4, %v7130_v16  ;;  %v7136_v35 = vand.u32 4294901760, %v6803_v30  ;;  %v7137_v11 = vand.u32 4294901760, %v6804_v56  ;;  %v7138_v6 = vand.u32 4294901760, %v6805_v18  ;;  %v7147_v30 = vld [vmem:[#allocation176_spill] sm:$0xff]  ;;  %v7149_v29 = vld [vmem:[#allocation177_spill] sm:$0xff]  ;;  %v7151_v18 = vld [vmem:[#allocation179_spill] sm:$0xff] }
 0x1db   : > { %v3764_v58 = vpack.c.bf16 %v7134_v27, %v7133_v10  ;;  %v7140_v21 = vand.u32 4294901760, %v7139_v57  ;;  %v7142_v25 = vand.u32 4294901760, %v7141_v48  ;;  %v7144_v34 = vand.u32 4294901760, %v7143_v14  ;;  %v7173_v43 = vld [vmem:[#allocation195_spill] sm:$0xff]  ;;  %v7179_v16 = vld [vmem:[#allocation200_spill] sm:$0xff]  ;;  %v7181_v4 = vld [vmem:[#allocation201_spill] sm:$0xff] }
 0x1dc   : > { %3371 = vmatpush1.bf16.msra.mxu1 %v3370_v46  ;;  %v3382_v45 = vpack.c.bf16 %v7136_v35, %v7135_v32  ;;  %v3766_v7 = vpack.c.bf16 %v7138_v6, %v7137_v11  ;;  %v7146_v19 = vand.u32 4294901760, %v7145_v41  ;;  %v7148_v0 = vand.u32 4294901760, %v7147_v30  ;;  %v7153_v46 = vld [vmem:[#allocation180_spill] sm:$0xff]  ;;  %v7183_v27 = vld [vmem:[#allocation203_spill] sm:$0xff]  ;;  %v7187_v11 = vld [vmem:[#allocation13_spill] sm:$0xff] }
 0x1dd   : > { %3755 = vmatpush1.bf16.msra.mxu0 %v3754_v55  ;;  %3373 = vmatprep.subr.bf16.mxu1 %v3372_v36  ;;  %v3384_v12 = vpack.c.bf16 %v7142_v25, %v7140_v21  ;;  %v7150_v31 = vand.u32 4294901760, %v7149_v29  ;;  %v7152_v20 = vand.u32 4294901760, %v7151_v18  ;;  %v7154_v59 = vand.u32 4294901760, %v7153_v46  ;;  %v7155_v55 = vld [vmem:[#allocation182_spill] sm:$0xff]  ;;  %v7185_v32 = vld [vmem:[#allocation204_spill] sm:$0xff]  ;;  %v7188_v6 = vld [vmem:[#allocation17_spill] sm:$0xff] }
 0x1de   : > { %3757 = vmatprep.subr.bf16.mxu0 %v3756_v13  ;;  %v3768_v44 = vpack.c.bf16 %v7146_v19, %v7144_v34  ;;  %v7156_v42 = vand.u32 4294901760, %v7155_v55  ;;  %v7158_v36 = vand.u32 4294901760, %v7157_v2  ;;  %v7160_v13 = vand.u32 4294901760, %v7159_v38  ;;  %v7190_v57 = vld [vmem:[#allocation19_spill] sm:$0xff]  ;;  %v7191_v21 = vld [vmem:[#allocation210_spill] sm:$0xff]  ;;  %v7195_v14 = vld [vmem:[#allocation208_spill] sm:$0xff] }
 0x1df   : > { %v3386_v56 = vpack.c.bf16 %v7150_v31, %v7148_v0  ;;  %v3770_v28 = vpack.c.bf16 %v7154_v59, %v7152_v20  ;;  %v7162_v33 = vand.u32 4294901760, %v7161_v23  ;;  %v7166_v54 = vand.u32 4294901760, %v7165_v62  ;;  %v7192_v48 = vld [vmem:[#allocation22_spill] sm:$0xff]  ;;  %v7196_v34 = vld [vmem:[#allocation32_spill] sm:$0xff]  ;;  %v7197_v41 = vld [vmem:[#allocation35_spill] sm:$0xff] }
 0x1e0   : > { %3375 = vmatpush1.bf16.msra.mxu1 %v3374_v60  ;;  %v3388_v61 = vpack.c.bf16 %v7158_v36, %v7156_v42  ;;  %v7164_v60 = vand.u32 4294901760, %v7163_v39  ;;  %v7174_v3 = vand.u32 4294901760, %v7173_v43  ;;  %v7178_v52 = vand.u32 4294901760, %v7177_v24  ;;  %v7193_v25 = vld [vmem:[#allocation26_spill] sm:$0xff]  ;;  %v7198_v19 = vld [vmem:[#allocation37_spill] sm:$0xff]  ;;  %v7200_v30 = vld [vmem:[#allocation43_spill] sm:$0xff] }
 0x1e1   : > { %3759 = vmatpush1.bf16.msra.mxu0 %v3758_v5  ;;  %3377 = vmatprep.subr.bf16.mxu1 %v3376_v26  ;;  %v3772_v50 = vpack.c.bf16 %v7162_v33, %v7160_v13  ;;  %v7167_v5 = vld [vmem:[#allocation191_spill] sm:$0xff]  ;;  %v7170_v26 = vand.u32 4294901760, %v7169_v51  ;;  %v7180_v8 = vand.u32 4294901760, %v7179_v16  ;;  %v7186_v35 = vand.u32 4294901760, %v7185_v32  ;;  %v7201_v0 = vld [vmem:[#allocation46_spill] sm:$0xff]  ;;  %v7202_v29 = vld [vmem:[#allocation49_spill] sm:$0xff] }
 0x1e2   : > { %3761 = vmatprep.subr.bf16.mxu0 %v3760_v17  ;;  %v3390_v63 = vpack.c.bf16 %v7166_v54, %v7164_v60  ;;  %v7168_v37 = vand.u32 4294901760, %v7167_v5  ;;  %v7172_v17 = vand.u32 4294901760, %v7171_v9  ;;  %v7203_v31 = vld [vmem:[#allocation52_spill] sm:$0xff]  ;;  %v7206_v18 = vld [vmem:[#allocation61_spill] sm:$0xff]  ;;  %v7208_v46 = vld [vmem:[#allocation67_spill] sm:$0xff] }
 0x1e3   : > { %v7207_v20 = vld [vmem:[#allocation65_spill] sm:$0xff]  ;;  %v7209_v59 = vld [vmem:[#allocation70_spill] sm:$0xff]  ;;  %v7212_v42 = vld [vmem:[#allocation79_spill] sm:$0xff] }
 0x1e4   : > { %3379 = vmatpush1.bf16.msra.mxu1 %v3378_v47  ;;  %v3774_v40 = vpack.c.bf16 %v7170_v26, %v7168_v37  ;;  %v3392_v1 = vpack.c.bf16 %v7174_v3, %v7172_v17  ;;  %v7175_v47 = vld [vmem:[#allocation196_spill] sm:$0xff]  ;;  %v7211_v55 = vld [vmem:[#allocation77_spill] sm:$0xff]  ;;  %v7213_v2 = vld [vmem:[#allocation82_spill] sm:$0xff] }
 0x1e5   : > { %3763 = vmatpush1.bf16.msra.mxu0 %v3762_v15  ;;  %3381 = vmatprep.subr.bf16.mxu1 %v3380_v53  ;;  %v7176_v49 = vand.u32 4294901760, %v7175_v47  ;;  %v7182_v53 = vand.u32 4294901760, %v7181_v4  ;;  %v7214_v36 = vld [vmem:[#allocation85_spill] sm:$0xff]  ;;  %v7216_v38 = vld [vmem:[#allocation91_spill] sm:$0xff]  ;;  %v7217_v13 = vld [vmem:[#allocation94_spill] sm:$0xff] }
 0x1e6   : > { %3765 = vmatprep.subr.bf16.mxu0 %v3764_v58  ;;  %v7184_v58 = vand.u32 4294901760, %v7183_v27  ;;  %v7218_v23 = vld [vmem:[#allocation97_spill] sm:$0xff]  ;;  %v7221_v39 = vld [vmem:[#allocation106_spill] sm:$0xff]  ;;  %v7224_v54 = vld [vmem:[#allocation115_spill] sm:$0xff] }
 0x1e7   : > { %v3776_v15 = vpack.c.bf16 %v7178_v52, %v7176_v49  ;;  %v3394_v10 = vpack.c.bf16 %v7182_v53, %v7180_v8  ;;  %v7219_v33 = vld [vmem:[#allocation101_spill] sm:$0xff]  ;;  %v7228_v51 = vld [vmem:[#allocation127_spill] sm:$0xff]  ;;  %v7229_v26 = vld [vmem:[#allocation130_spill] sm:$0xff] }
 0x1e8   : > { %3383 = vmatpush1.bf16.msra.mxu1 %v3382_v45  ;;  %v3778_v45 = vpack.c.bf16 %v7186_v35, %v7184_v58  ;;  %v7222_v60 = vld [vmem:[#allocation109_spill] sm:$0xff]  ;;  %v7232_v17 = vld [vmem:[#allocation139_spill] sm:$0xff]  ;;  %v7233_v43 = vld [vmem:[#allocation142_spill] sm:$0xff] }
 0x1e9   : > { %3767 = vmatpush1.bf16.msra.mxu0 %v3766_v7  ;;  %3385 = vmatprep.subr.bf16.mxu1 %v3384_v12  ;;  %v7189_v7 = vld [vmem:[#allocation206_spill] sm:$0xff]  ;;  %v7194_v12 = vld [vmem:[#allocation28_spill] sm:$0xff]  ;;  %v7223_v62 = vld [vmem:[#allocation113_spill] sm:$0xff] }
 0x1ea   : > { %3769 = vmatprep.subr.bf16.mxu0 %v3768_v44  ;;  %v7199_v44 = vld [vmem:[#allocation40_spill] sm:$0xff]  ;;  %v7226_v5 = vld [vmem:[#allocation121_spill] sm:$0xff]  ;;  %v7236_v47 = vld [vmem:[#allocation151_spill] sm:$0xff] }
 0x1eb   : > { %v7227_v37 = vld [vmem:[#allocation125_spill] sm:$0xff]  ;;  %v7237_v49 = vld [vmem:[#allocation154_spill] sm:$0xff]  ;;  %v7244_v53 = vld [vmem:[#allocation175_spill] sm:$0xff] }
 0x1ec   : > { %3387 = vmatpush1.bf16.msra.mxu1 %v3386_v56  ;;  %v7204_v56 = vld [vmem:[#allocation56_spill] sm:$0xff]  ;;  %v7231_v9 = vld [vmem:[#allocation137_spill] sm:$0xff]  ;;  %v7241_v16 = vld [vmem:[#allocation166_spill] sm:$0xff] }
 0x1ed   : > { %3771 = vmatpush1.bf16.msra.mxu0 %v3770_v28  ;;  %3389 = vmatprep.subr.bf16.mxu1 %v3388_v61  ;;  %v7210_v28 = vld [vmem:[#allocation73_spill] sm:$0xff]  ;;  %v7248_v32 = vld [vmem:[#allocation187_spill] sm:$0xff]  ;;  %v7249_v35 = vld [vmem:[#allocation190_spill] sm:$0xff] }
 0x1ee   : > { %3773 = vmatprep.subr.bf16.mxu0 %v3772_v50  ;;  %v7215_v61 = vld [vmem:[#allocation89_spill] sm:$0xff]  ;;  %v7220_v50 = vld [vmem:[#allocation103_spill] sm:$0xff] }
 0x1ef   : > { %v7234_v3 = vld [vmem:[#allocation145_spill] sm:$0xff] }
 0x1f0   : > { %3391 = vmatpush1.bf16.msra.mxu1 %v3390_v63  ;;  %v7225_v63 = vld [vmem:[#allocation118_spill] sm:$0xff]  ;;  %v7238_v24 = vld [vmem:[#allocation157_spill] sm:$0xff] }
 0x1f1   : > { %3775 = vmatpush1.bf16.msra.mxu0 %v3774_v40  ;;  %3393 = vmatprep.subr.bf16.mxu1 %v3392_v1  ;;  %v7230_v40 = vld [vmem:[#allocation133_spill] sm:$0xff] }
 0x1f2   : > { %3777 = vmatprep.subr.bf16.mxu0 %v3776_v15  ;;  %v7235_v1 = vld [vmem:[#allocation149_spill] sm:$0xff]  ;;  %v7240_v15 = vld [vmem:[#allocation163_spill] sm:$0xff] }
 0x1f3   : > { %v7239_v52 = vld [vmem:[#allocation161_spill] sm:$0xff] }
 0x1f4   : > { %3395 = vmatpush1.bf16.msra.mxu1 %v3394_v10  ;;  %v7242_v8 = vld [vmem:[#allocation169_spill] sm:$0xff]  ;;  %v7245_v10 = vld [vmem:[#allocation178_spill] sm:$0xff] }
 0x1f5   : > { %3779 = vmatpush1.bf16.msra.mxu0 %v3778_v45  ;;  %3397 = vmatprep.subr.bf16.mxu1 %v7187_v11  ;;  %v7243_v4 = vld [vmem:[#allocation173_spill] sm:$0xff] }
 0x1f6   : > { %3781 = vmatprep.subr.bf16.mxu0 %v7188_v6  ;;  %v7246_v27 = vld [vmem:[#allocation181_spill] sm:$0xff]  ;;  %v7252_v6 = vld [vmem:[#allocation199_spill] sm:$0xff] }
 0x1f7   : > { %1504 = vmatmul.mubr.f32.vlgmr.msra.gmra.mrb[0].mxu1 %v7189_v7  ;;  %v7247_v58 = vld [vmem:[#allocation185_spill] sm:$0xff] }
 0x1f8   : > { %3399 = vmatpush1.bf16.msra.mxu1 %v7190_v57  ;;  %2788 = vmatmul.mubr.f32.vlgmr.msra.gmra.mrb[0].mxu0 %v7191_v21  ;;  %v7250_v45 = vld [vmem:[#allocation193_spill] sm:$0xff]  ;;  %v7253_v57 = vld [vmem:[#allocation202_spill] sm:$0xff] }
 0x1f9   : > { %3783 = vmatpush1.bf16.msra.mxu0 %v7192_v48  ;;  %3401 = vmatprep.subr.bf16.mxu1 %v7193_v25  ;;  %v7251_v11 = vld [vmem:[#allocation197_spill] sm:$0xff]  ;;  %v362_v48 = vstv %s361_s19 }
 0x1fa   : > { %3785 = vmatprep.subr.bf16.mxu0 %v7194_v12  ;;  %1639 = vmatprep.mubr.f32.mxu1 %v7010_v22  ;;  %v7205_v22 = vld [vmem:[#allocation58_spill] sm:$0xff] }
 0x1fb   : > { %2923 = vmatprep.mubr.f32.mxu0 %v7195_v14 }
 0x1fc   : > { %3403 = vmatpush1.bf16.msra.mxu1 %v7196_v34 }
 0x1fd   : > { %3787 = vmatpush1.bf16.msra.mxu0 %v7197_v41  ;;  %3405 = vmatprep.subr.bf16.mxu1 %v7198_v19 }
 0x1fe   : > { %3789 = vmatprep.subr.bf16.mxu0 %v7199_v44 }
 0x200   : > { %3407 = vmatpush1.bf16.msra.mxu1 %v7200_v30 }
 0x201   : > { %3791 = vmatpush1.bf16.msra.mxu0 %v7201_v0  ;;  %3409 = vmatprep.subr.bf16.mxu1 %v7202_v29 }
 0x202   : > { %3793 = vmatprep.subr.bf16.mxu0 %v7203_v31 }
 0x204   : > { %3411 = vmatpush1.bf16.msra.mxu1 %v7204_v56 }
 0x205   : > { %3795 = vmatpush1.bf16.msra.mxu0 %v7205_v22  ;;  %3413 = vmatprep.subr.bf16.mxu1 %v7206_v18  ;;  %v7254_v22 = vlaneseq }
 0x206   : > { %3797 = vmatprep.subr.bf16.mxu0 %v7207_v20 }
 0x207   : > { %v2945_v18 = vshrl.u32 %v7254_v22, 7 }
 0x208   : > { %3415 = vmatpush1.bf16.msra.mxu1 %v7208_v46 }
 0x209   : > { %3799 = vmatpush1.bf16.msra.mxu0 %v7209_v59  ;;  %3417 = vmatprep.subr.bf16.mxu1 %v7210_v28  ;;  %v2946_v20 = vsub.s32 0, %v2945_v18 }
 0x20a   : > { %3801 = vmatprep.subr.bf16.mxu0 %v7211_v55 }
 0x20c   : > { %3419 = vmatpush1.bf16.msra.mxu1 %v7212_v42  ;;  %v2943_v42 = vld [vmem:[%s4237_s6] sm:$0xff] }
 0x20d   : > { %3803 = vmatpush1.bf16.msra.mxu0 %v7213_v2  ;;  %3421 = vmatprep.subr.bf16.mxu1 %v7214_v36 }
 0x20e   : > { %3805 = vmatprep.subr.bf16.mxu0 %v7215_v61 }
 0x210   : > { %3423 = vmatpush1.bf16.msra.mxu1 %v7216_v38 }
 0x211   : > { %3807 = vmatpush1.bf16.msra.mxu0 %v7217_v13  ;;  %3425 = vmatprep.subr.bf16.mxu1 %v7218_v23 }
 0x212   : > { %3809 = vmatprep.subr.bf16.mxu0 %v7219_v33 }
 0x214   : > { %3427 = vmatpush1.bf16.msra.mxu1 %v7220_v50 }
 0x215   : > { %3811 = vmatpush1.bf16.msra.mxu0 %v7221_v39  ;;  %3429 = vmatprep.subr.bf16.mxu1 %v7222_v60 }
 0x216   : > { %3813 = vmatprep.subr.bf16.mxu0 %v7223_v62 }
 0x218   : > { %3431 = vmatpush1.bf16.msra.mxu1 %v7224_v54 }
 0x219   : > { %3815 = vmatpush1.bf16.msra.mxu0 %v7225_v63  ;;  %3433 = vmatprep.subr.bf16.mxu1 %v7226_v5 }
 0x21a   : > { %3817 = vmatprep.subr.bf16.mxu0 %v7227_v37 }
 0x21c   : > { %3435 = vmatpush1.bf16.msra.mxu1 %v7228_v51 }
 0x21d   : > { %3819 = vmatpush1.bf16.msra.mxu0 %v7229_v26  ;;  %3437 = vmatprep.subr.bf16.mxu1 %v7230_v40 }
 0x21e   : > { %3821 = vmatprep.subr.bf16.mxu0 %v7231_v9 }
 0x220   : > { %3439 = vmatpush1.bf16.msra.mxu1 %v7232_v17 }
 0x221   : > { %3823 = vmatpush1.bf16.msra.mxu0 %v7233_v43  ;;  %3441 = vmatprep.subr.bf16.mxu1 %v7234_v3 }
 0x222   : > { %3825 = vmatprep.subr.bf16.mxu0 %v7235_v1 }
 0x224   : > { %3443 = vmatpush1.bf16.msra.mxu1 %v7236_v47 }
 0x225   : > { %3827 = vmatpush1.bf16.msra.mxu0 %v7237_v49  ;;  %3445 = vmatprep.subr.bf16.mxu1 %v7238_v24 }
 0x226   : > { %3829 = vmatprep.subr.bf16.mxu0 %v7239_v52 }
 0x228   : > { %3447 = vmatpush1.bf16.msra.mxu1 %v7240_v15 }
 0x229   : > { %3831 = vmatpush1.bf16.msra.mxu0 %v7241_v16  ;;  %3449 = vmatprep.subr.bf16.mxu1 %v7242_v8 }
 0x22a   : > { %3833 = vmatprep.subr.bf16.mxu0 %v7243_v4 }
 0x22c   : > { %3451 = vmatpush1.bf16.msra.mxu1 %v7244_v53 }
 0x22d   : > { %3835 = vmatpush1.bf16.msra.mxu0 %v7245_v10  ;;  %3453 = vmatprep.subr.bf16.mxu1 %v7246_v27 }
 0x22e   : > { %3837 = vmatprep.subr.bf16.mxu0 %v7247_v58 }
 0x230   : > { %3455 = vmatpush1.bf16.msra.mxu1 %v7248_v32 }
 0x231   : > { %3839 = vmatpush1.bf16.msra.mxu0 %v7249_v35  ;;  %3457 = vmatprep.subr.bf16.mxu1 %v7250_v45 }
 0x232   : > { %3841 = vmatprep.subr.bf16.mxu0 %v7251_v11 }
 0x234   : > { %3459 = vmatpush1.bf16.msra.mxu1 %v7252_v6 }
 0x235   : > { %3843 = vmatpush1.bf16.msra.mxu0 %v7253_v57 }
 0x237   : > { %1641 = vmatmul.mubr.f32.vlgmr.msra.gmra.mrb[0].mxu1 %v7189_v7 }
 0x238   : > { %2925 = vmatmul.mubr.f32.vlgmr.msra.gmra.mrb[0].mxu0 %v7191_v21 }
 0x30a   : > { %v1642_v25 = vpop.f32.mrb[0].mxu1 }
 0x30b   : > { %v3844_v12 = vadd.f32 %v1642_v25, %v362_v48  ;;  %v2926_v14 = vpop.f32.mrb[0].mxu0  ;;  %v1644_v34 = vpop.f32.mrb[1].mxu1 }
 0x30c   : > { %v3846_v41 = vadd.f32 %v1644_v34, %v362_v48  ;;  %v2928_v19 = vpop.f32.mrb[1].mxu0 }
 0x30d   : > { %v3845_v44 = vadd.f32 %v3844_v12, %v2926_v14 }
 0x30e   : > { %v3847_v30 = vadd.f32 %v3846_v41, %v2928_v19 }
 0x30f   : > { %v3067_v0 = vmul.f32 -1.442695, %v3845_v44 }
 0x310   : > { %v3068_v29 = vmul.f32 -1.442695, %v3847_v30 }
 0x311   : > { %3928 = vpow2.f32 %v3067_v0 }
 0x312   : > { %3930 = vpow2.f32 %v3068_v29 }
 0x31b   : > { %v3929_v7 = vpop.eup %3928 }
 0x31c   : > { %v3931_v31 = vpop.eup %3930  ;;  %v2937_v21 = vadd.f32 1.0, %v3929_v7 }
 0x31d   : > { %v2938_v56 = vadd.f32 1.0, %v3931_v31 }
 0x31e   : > { %3932 = vrcp.f32 %v2937_v21 }
 0x31f   : > { %3934 = vrcp.f32 %v2938_v56 }
 0x328   : > { %v3933_v46 = vpop.eup %3932 }
 0x329   : > { %v3935_v59 = vpop.eup %3934  ;;  %v2947_v28 = vrot.slane %v3933_v46, %v2946_v20 }
 0x32a   : > { %v2951_v55 = vrot.slane %v3935_v59, %v2946_v20 }
 0x32c   : > { %v2954_v2 = vcombine.low %v2947_v28, %v2951_v55 }
 0x32e   : > { %v2956_v36 = vmul.f32 %v2954_v2, %v2943_v42 }
 0x330   : > { %2957 = vst [vmem:[%s202_s4] sm:$0xff] %v2956_v36 }
 0x331   : > { %4007 = shalt.err (!%p4004_p7)
}
 0x332   : > { %s4008_s12 = scalar_lea.hbm %s5896_s7, 128  ;;  %s4012_s29 = scalar_lea.hbm %s5943_s3, 256 }
 0x333   : > { %p4009_p9 = scmp.ne.s32.totalorder %s5896_s7, %s4008_s12  ;;  %p4013_p0 = scmp.lt.u32.totalorder %s5896_s7, %s5943_s3 }
 0x334   : > { %p4014_p11 = scmp.lt.u32.totalorder %s4012_s29, %s4008_s12  ;;  %p4016_p4 = scmp.lt.u32.totalorder %s4008_s12, %s5896_s7 }
 0x335   : > { %p4010_p2 = pnand %p4009_p9, %p4186_p12 }
 0x336   : > { %p4015_p1 = por %p4014_p11, %p4013_p0 }
 0x337   : > { %p4011_p5 = pneg %p4010_p2 }
 0x338   : > { %p4017_p6 = por %p4016_p4, %p4015_p1 }
 0x33a   : > { %p4018_p8 = pnand %p4017_p6, %p4011_p5 }
 0x33c   : > { %4021 = shalt.err (!%p4018_p8)
}
 0x33d   : > { %3874 = dma.vmem_to_hbm [thread:$0]  (%p4186_p12), %s5898_s26, 128, %s5896_s7, %s2959_s8  }
 0x33e PF: > { %s2985_s23 = sand.u32 1, %s4052_s14   ;;  %p7255_p10 = scmp.ne.s32.totalorder %s6463_s20, 0 }
 0x33f   : > { %p7256_p13 = scmp.ge.s32.totalorder %s4064_s17, 2  ;;  %s2986_s6 = scalar_lea.sflag [#allocation6], %s2985_s23 }
 0x341   : > { %p3885_p3 = pnand %p7256_p13, %p7255_p10 }
 0x343   : > { %4047 = dma.done.wait (!%p3885_p3), %s2986_s6, 128  }
 0x344   : > { %4049 = vsyncadd (!%p3885_p3), %s2986_s6, 4294967168  ;;  %p18_p7 = scmp.ge.s32.totalorder %s4151_s25, 4   ;;  %s7257_s14 = smov %s4056_s15 }
 0x345   : > { %s7258_s15 = smov %s4060_s16  ;;  %s7259_s16 = smov %s4182_s13 }
 0x346   : > { %s7260_s17 = smov %s4151_s25  ;;  %20 = sbr.rel (!%p18_p7) target bundleno = 8 (0x8), region = 85 }
 0x34d   :  { %2991 = vsyncpa [#allocation5], 1 }
 0x34e   :  { %2993 = vsyncpa [#allocation5 + $0x1], 1 }
 0x34f   :  { %2994 = vsyncpa [#allocation8], 1 }
 0x350   :  { %2995 = vsyncpa [#allocation6], 1 }
 0x351   :  { %2997 = vsyncpa [#allocation6 + $0x1], 1 }

</bundles_post_ra>
